<compile_context>
chip_gen: v7x
topology: tpu7x:2x2x1
jax: 0.10.0
libtpu: 0.0.40
codegen_flags: <defaults>
</compile_context>

<pallas_src>
import functools

import jax
import jax.numpy as jnp
import numpy as np
from jax.experimental import pallas as pl
from jax.experimental.pallas import tpu as pltpu

# ----- hyperparameters mirroring DGMG.__init__ --------------------------------
NODE_H = 80                      # opt.node_hidden_size
GRAPH_H = 2 * NODE_H             # graph_hidden_size (DGMG default: 2*node_hidden)
COND = 32                        # opt.img_feature_len -> class_conditioning_size
EDGE_H = 80                      # opt.edge_hidden_size
NUM_SHIFTS = 7                   # opt.num_shifts
NUM_NODE_TYPES = 2               # opt.num_node_types
DEC_HID = 40                     # opt.decision_layer_hidden_size
PROP_HID = 40                    # opt.prop_mlp_hidden_size
NUM_PROP_ROUNDS = 2              # opt.num_prop_rounds

B = 2                            # batch of graphs
N = 8                            # nodes per (synthetic, dense) graph
N_CAND = N - 1                   # destination candidates (all but the new node)

N_NODE_OUT = NUM_NODE_TYPES + 1                  # 3
N_EDGE_OUT = 3
N_TYPE_OUT = NUM_SHIFTS * NUM_SHIFTS             # 49

# block-diagonal {node, edge, dest} tail layout
DOUT_PAD = 64                    # each head's last layer padded to 64 lanes
TRI_OUT = 3 * DOUT_PAD           # 192
DEST_COL = 2 * DOUT_PAD          # dest head's single logit column

# packed decision-output slab (lane offsets inside the [B, 128] output)
SLAB_W = 128
SLAB_NODE, SLAB_EDGE, SLAB_DEST, SLAB_TYPE = 0, 8, 16, 64

HP = 128                         # 128-lane padded width used in the prop kernel


# ================================ kernels =====================================
def decision_kernel(hv_ref, cond_ref,
                    ge_w_ref, ge_b_ref,
                    w1hg_ref, w1hl_ref, w1cand_ref, w1tdst_ref, w1c_ref, b1_ref,
                    w2tri_ref, b2tri_ref, w3tri_ref, b3tri_ref, w4tri_ref, b4tri_ref,
                    w2t_ref, b2t_ref, w3t_ref, b3t_ref, w4t_ref, b4t_ref,
                    hg_ref, slab_ref, *, temperature):
    """GraphEmbed + all four decision MLP heads in one launch.

    {node, edge, dest} tails run as one block-diagonal matmul chain over
    B*N_CAND rows; outputs are packed into a single lane-dense [B, 128] slab."""
    dot = lambda a, b: jnp.dot(a, b, preferred_element_type=jnp.float32)
    relu = lambda x: jnp.maximum(x, 0.0)

    def log_softmax_lanes(x):
        x = x / temperature
        m = jnp.max(x, axis=-1, keepdims=True)
        z = x - m
        return z - jnp.log(jnp.sum(jnp.exp(z), axis=-1, keepdims=True))

    hv = hv_ref[...]                                            # [B, N, H]
    cond = cond_ref[...]                                        # [B, COND]

    # --- GraphEmbed: single fused [map|gate] matmul over all B*N nodes ---
    hv2 = hv.reshape(B * N, NODE_H)
    proj = dot(hv2, ge_w_ref[...]) + ge_b_ref[...]              # [B*N, GRAPH_H+1]
    gate = jax.nn.sigmoid(proj[:, GRAPH_H:GRAPH_H + 1])
    hG = jnp.sum((gate * proj[:, :GRAPH_H]).reshape(B, N, GRAPH_H), axis=1)
    hg_ref[...] = hG                                            # [B, GRAPH_H]

    h_last = hv[:, N - 1, :]                                    # [B, H]
    cand = hv[:, :N_CAND, :]                                    # [B, N_CAND, H]

    # --- layer-1 pre-activations with concatenated W1 blocks (5 dots total) ---
    hg_part = dot(hG, w1hg_ref[...])                            # [B, 80]   node|edge
    hl_part = dot(h_last, w1hl_ref[...])                        # [B, 120]  edge|dest_src|type_src
    c_part = dot(cond, w1c_ref[...])                            # [B, 160]  node|edge|dest|type
    b1 = b1_ref[...]                                            # [1, 160]

    pre_node = hg_part[:, :DEC_HID] + c_part[:, :DEC_HID] + b1[:, :DEC_HID]
    pre_edge = (hg_part[:, DEC_HID:2 * DEC_HID] + hl_part[:, :DEC_HID]
                + c_part[:, DEC_HID:2 * DEC_HID] + b1[:, DEC_HID:2 * DEC_HID])
    pre_dest_shared = (hl_part[:, DEC_HID:2 * DEC_HID]
                       + c_part[:, 2 * DEC_HID:3 * DEC_HID]
                       + b1[:, 2 * DEC_HID:3 * DEC_HID])        # [B, 40]

    cand2 = cand.reshape(B * N_CAND, NODE_H)
    pre_dest = (dot(cand2, w1cand_ref[...]).reshape(B, N_CAND, DEC_HID)
                + pre_dest_shared[:, None, :])                  # [B, N_CAND, 40]

    # --- block-diagonal tail over {node, edge, dest} (3 dots instead of 9) ---
    pre_tri = jnp.concatenate(
        [jnp.broadcast_to(pre_node[:, None, :], (B, N_CAND, DEC_HID)),
         jnp.broadcast_to(pre_edge[:, None, :], (B, N_CAND, DEC_HID)),
         pre_dest], axis=-1).reshape(B * N_CAND, 3 * DEC_HID)   # [B*N_CAND, 120]
    h = relu(pre_tri)
    h = relu(dot(h, w2tri_ref[...]) + b2tri_ref[...])
    h = relu(dot(h, w3tri_ref[...]) + b3tri_ref[...])
    out_tri = dot(h, w4tri_ref[...]) + b4tri_ref[...]           # [B*N_CAND, 192]
    out_tri3 = out_tri.reshape(B, N_CAND, TRI_OUT)

    logits_node = out_tri3[:, 0, 0:N_NODE_OUT]                  # [B, 3]
    logits_edge = out_tri3[:, 0, DOUT_PAD:DOUT_PAD + N_EDGE_OUT]  # [B, 3]
    dest_scores = out_tri3[:, :, DEST_COL]                      # [B, N_CAND]

    logp_node = log_softmax_lanes(logits_node)
    logp_edge = log_softmax_lanes(logits_edge)
    logp_dest = log_softmax_lanes(dest_scores)                  # [B, N_CAND]

    # --- greedy destination pick + h_dest gather (vectorized, no B loop) ---
    idx = jax.lax.broadcasted_iota(jnp.int32, (B, N_CAND), 1)
    mx = jnp.max(logp_dest, axis=-1, keepdims=True)
    pick = jnp.min(jnp.where(logp_dest >= mx, idx, N_CAND), axis=-1, keepdims=True)
    onehot = (idx == pick).astype(jnp.float32)                  # [B, N_CAND]
    h_dest = jnp.sum(onehot[:, :, None] * cand, axis=1)         # [B, H]

    # --- choose_edge_type head: MLP([h_src, h_dest, cond]) ---
    pre_type = (hl_part[:, 2 * DEC_HID:3 * DEC_HID] + dot(h_dest, w1tdst_ref[...])
                + c_part[:, 3 * DEC_HID:4 * DEC_HID] + b1[:, 3 * DEC_HID:4 * DEC_HID])
    ht = relu(pre_type)
    ht = relu(dot(ht, w2t_ref[...]) + b2t_ref[...])
    ht = relu(dot(ht, w3t_ref[...]) + b3t_ref[...])
    logp_type = log_softmax_lanes(dot(ht, w4t_ref[...]) + b4t_ref[...])  # [B, 49]

    # --- assemble the lane-dense [B, 128] slab in registers, store once ---
    z = lambda w: jnp.zeros((B, w), jnp.float32)
    slab_ref[...] = jnp.concatenate(
        [logp_node, z(SLAB_EDGE - N_NODE_OUT),
         logp_edge, z(SLAB_DEST - SLAB_EDGE - N_EDGE_OUT),
         logp_dest, z(SLAB_TYPE - SLAB_DEST - N_CAND),
         logp_type, z(SLAB_W - SLAB_TYPE - N_TYPE_OUT)], axis=-1)


def prop_kernel(h_ref, e_ref, s_ref,
                w1uv_ref, w1e_ref, b1_ref, w2_ref, b2_ref, w3_ref, b3_ref,
                w4_ref, b4_ref, wi_ref, bi_ref, wh_ref, bh_ref,
                out_ref):
    """Both DGMG propagation rounds, both graphs batched into the matmul rows.
       msg_{u->v} = MLP4([h_u, h_v, e_uv]); a = S @ msg; h = GRU(a, h).
       Node state is kept 128-lane padded; pad lanes provably stay zero."""
    dot = lambda a, b: jnp.dot(a, b, preferred_element_type=jnp.float32)
    relu = lambda x: jnp.maximum(x, 0.0)

    h0 = h_ref[...].reshape(B * N, NODE_H)                      # [16, 80]
    h = jnp.concatenate([h0, jnp.zeros((B * N, HP - NODE_H), jnp.float32)], axis=1)
    e2 = e_ref[...].reshape(B * N * N, EDGE_H)                  # [128, 80]
    S = s_ref[...]                                              # [16, 128]

    for r in range(NUM_PROP_ROUNDS):                            # static unroll
        # message MLP layer 1: sender/receiver/edge blocks, 128-aligned splits
        uv = dot(h, w1uv_ref[r])                                # [16, 256]
        u_part = uv[:, :HP].reshape(B, N, HP)                   # sender   (edge axis u)
        v_part = uv[:, HP:].reshape(B, N, HP)                   # receiver (edge axis v)
        e_part = dot(e2, w1e_ref[r]).reshape(B, N, N, HP)
        m = relu(u_part[:, :, None, :] + v_part[:, None, :, :] + e_part + b1_ref[r])
        m = m.reshape(B * N * N, HP)                            # [128, 128]
        m = relu(dot(m, w2_ref[r]) + b2_ref[r])
        m = relu(dot(m, w3_ref[r]) + b3_ref[r])
        msg = dot(m, w4_ref[r]) + b4_ref[r]                     # [128, 2*NODE_H]

        # aggregation over senders as ONE MXU matmul against the selection matrix
        a = dot(S, msg)                                         # [16, 2*NODE_H]

        # GRUCell with fused, 128-lane-aligned [r|z|n] gate blocks (2 matmuls)
        gi = dot(a, wi_ref[r]) + bi_ref[r]                      # [16, 384]
        gh = dot(h, wh_ref[r]) + bh_ref[r]                      # [16, 384]
        rg = jax.nn.sigmoid(gi[:, :HP] + gh[:, :HP])
        zg = jax.nn.sigmoid(gi[:, HP:2 * HP] + gh[:, HP:2 * HP])
        ng = jnp.tanh(gi[:, 2 * HP:] + rg * gh[:, 2 * HP:])
        h = (1.0 - zg) * ng + zg * h                            # pad lanes stay 0

    out_ref[...] = h[:, :NODE_H].reshape(B, N, NODE_H)


# ================================ wrappers ====================================
def _const_spec(a):
    return pl.BlockSpec(a.shape, lambda *idx, nd=a.ndim: (0,) * nd)


_DEC_KEYS = ('ge_w', 'ge_b', 'w1_hg', 'w1_hl', 'w1_cand', 'w1_tdst', 'w1_c', 'b1',
             'w2_tri', 'b2_tri', 'w3_tri', 'b3_tri', 'w4_tri', 'b4_tri',
             'w2_t', 'b2_t', 'w3_t', 'b3_t', 'w4_t', 'b4_t')
_PROP_KEYS = ('w1uv', 'w1e', 'b1', 'w2', 'b2', 'w3', 'b3',
              'w4', 'b4', 'wi', 'bi', 'wh', 'bh')


def decision_forward(hv, cond, dp, *, temperature=1.0):
    weights = [dp[k] for k in _DEC_KEYS]
    kernel = functools.partial(decision_kernel, temperature=temperature)
    hG, slab = pl.pallas_call(
        kernel,
        out_shape=(jax.ShapeDtypeStruct((B, GRAPH_H), jnp.float32),
                   jax.ShapeDtypeStruct((B, SLAB_W), jnp.float32)),
        grid=(1,),
        in_specs=[pl.BlockSpec((B, N, NODE_H), lambda i: (0, 0, 0)),
                  pl.BlockSpec((B, COND), lambda i: (0, 0))]
                 + [_const_spec(a) for a in weights],
        out_specs=(pl.BlockSpec((B, GRAPH_H), lambda i: (0, 0)),
                   pl.BlockSpec((B, SLAB_W), lambda i: (0, 0))),
        compiler_params=pltpu.CompilerParams(dimension_semantics=("arbitrary",)),
    )(hv, cond, *weights)
    logp_node = slab[:, SLAB_NODE:SLAB_NODE + N_NODE_OUT]
    logp_edge = slab[:, SLAB_EDGE:SLAB_EDGE + N_EDGE_OUT]
    logp_dest = slab[:, SLAB_DEST:SLAB_DEST + N_CAND]
    logp_type = slab[:, SLAB_TYPE:SLAB_TYPE + N_TYPE_OUT]
    return hG, logp_node, logp_edge, logp_dest, logp_type


def build_select_matrix(adj):
    """S[(b, v), (b, u, v)] = adj[b, u, v], so a = S @ msg_flat aggregates senders."""
    eye_b = jnp.eye(B, dtype=adj.dtype)
    eye_n = jnp.eye(N, dtype=adj.dtype)
    S = jnp.einsum('bc,cuw,vw->bvcuw', eye_b, adj, eye_n)
    return S.reshape(B * N, B * N * N)


def graph_prop(hv, edge_feat, adj, pp):
    S = build_select_matrix(adj)
    weights = [pp[k] for k in _PROP_KEYS]
    return pl.pallas_call(
        prop_kernel,
        out_shape=jax.ShapeDtypeStruct((B, N, NODE_H), jnp.float32),
        grid=(1,),
        in_specs=[pl.BlockSpec((B, N, NODE_H), lambda i: (0, 0, 0)),
                  pl.BlockSpec((B, N, N, EDGE_H), lambda i: (0, 0, 0, 0)),
                  pl.BlockSpec((B * N, B * N * N), lambda i: (0, 0))]
                 + [_const_spec(a) for a in weights],
        out_specs=pl.BlockSpec((B, N, NODE_H), lambda i: (0, 0, 0)),
        input_output_aliases={0: 0},      # updated node states overwrite hv in place
        compiler_params=pltpu.CompilerParams(dimension_semantics=("arbitrary",)),
    )(hv, edge_feat, S, *weights)


# ============================ parameter init ==================================
def dense(key, din, dout):
    kw, kb = jax.random.split(key)
    s = 1.0 / np.sqrt(din)
    return (jax.random.uniform(kw, (din, dout), jnp.float32, -s, s),
            jax.random.uniform(kb, (1, dout), jnp.float32, -s, s))


def mlp4_params(key, din, hid, dout):
    k = jax.random.split(key, 4)
    return [dense(k[0], din, hid), dense(k[1], hid, hid),
            dense(k[2], hid, hid), dense(k[3], hid, dout)]


def init_params(key):
    keys = jax.random.split(key, 6 + NUM_PROP_ROUNDS)
    p = {
        'graph_embed': {'gate': dense(keys[0], NODE_H, 1),
                        'map': dense(keys[1], NODE_H, GRAPH_H)},
        'add_node': mlp4_params(keys[2], GRAPH_H + COND, DEC_HID, N_NODE_OUT),
        'add_edge': mlp4_params(keys[3], GRAPH_H + NODE_H + COND, DEC_HID, N_EDGE_OUT),
        'choose_dest': mlp4_params(keys[4], 2 * NODE_H + COND, DEC_HID, 1),
        'choose_edge_type': mlp4_params(keys[5], 2 * NODE_H + COND, DEC_HID, N_TYPE_OUT),
        'prop': [],
    }
    for r in range(NUM_PROP_ROUNDS):
        kr = jax.random.split(keys[6 + r], 7)
        p['prop'].append({
            'msg': mlp4_params(kr[0], 2 * NODE_H + EDGE_H, PROP_HID, 2 * NODE_H),
            'gru_i': [dense(kr[1], 2 * NODE_H, NODE_H),
                      dense(kr[2], 2 * NODE_H, NODE_H),
                      dense(kr[3], 2 * NODE_H, NODE_H)],
            'gru_h': [dense(kr[4], NODE_H, NODE_H),
                      dense(kr[5], NODE_H, NODE_H),
                      dense(kr[6], NODE_H, NODE_H)],
        })
    return p


# -------- weight packing (done once, in plain JAX, outside the kernels) -------
def _blkdiag(mats):
    rows = sum(m.shape[0] for m in mats)
    cols = sum(m.shape[1] for m in mats)
    out = jnp.zeros((rows, cols), jnp.float32)
    r = c = 0
    for m in mats:
        out = out.at[r:r + m.shape[0], c:c + m.shape[1]].set(m)
        r += m.shape[0]
        c += m.shape[1]
    return out


def _pad_cols(m, width):
    return jnp.pad(m, ((0, 0), (0, width - m.shape[1])))


def _pad_rows(m, rows):
    return jnp.pad(m, ((0, rows - m.shape[0]), (0, 0)))


def pack_decision_params(p):
    (wg, bg), (wm, bm) = p['graph_embed']['gate'], p['graph_embed']['map']
    ge_w = jnp.concatenate([wm, wg], axis=1)                    # [80, 161]
    ge_b = jnp.concatenate([bm, bg], axis=1)                    # [1, 161]

    an, ae, cd, ct = p['add_node'], p['add_edge'], p['choose_dest'], p['choose_edge_type']
    G, H, C = GRAPH_H, NODE_H, COND
    an_w1, ae_w1, cd_w1, ct_w1 = an[0][0], ae[0][0], cd[0][0], ct[0][0]

    w1_hg = jnp.concatenate([an_w1[:G], ae_w1[:G]], axis=1)                    # [160, 80]
    w1_hl = jnp.concatenate([ae_w1[G:G + H], cd_w1[H:2 * H], ct_w1[:H]], axis=1)  # [80, 120]
    w1_cand = cd_w1[:H]                                                        # [80, 40]
    w1_tdst = ct_w1[H:2 * H]                                                   # [80, 40]
    w1_c = jnp.concatenate([an_w1[G:G + C], ae_w1[G + H:G + H + C],
                            cd_w1[2 * H:2 * H + C], ct_w1[2 * H:2 * H + C]], axis=1)  # [32, 160]
    b1 = jnp.concatenate([an[0][1], ae[0][1], cd[0][1], ct[0][1]], axis=1)     # [1, 160]

    tri = [an, ae, cd]                                          # block-diag {node,edge,dest}
    w2_tri = _blkdiag([h[1][0] for h in tri])
    b2_tri = jnp.concatenate([h[1][1] for h in tri], axis=1)
    w3_tri = _blkdiag([h[2][0] for h in tri])
    b3_tri = jnp.concatenate([h[2][1] for h in tri], axis=1)
    w4_tri = _blkdiag([_pad_cols(h[3][0], DOUT_PAD) for h in tri])             # [120, 192]
    b4_tri = jnp.concatenate([_pad_cols(h[3][1], DOUT_PAD) for h in tri], axis=1)

    (w2_t, b2_t), (w3_t, b3_t), (w4_t, b4_t) = ct[1], ct[2], ct[3]
    return dict(ge_w=ge_w, ge_b=ge_b, w1_hg=w1_hg, w1_hl=w1_hl, w1_cand=w1_cand,
                w1_tdst=w1_tdst, w1_c=w1_c, b1=b1,
                w2_tri=w2_tri, b2_tri=b2_tri, w3_tri=w3_tri, b3_tri=b3_tri,
                w4_tri=w4_tri, b4_tri=b4_tri,
                w2_t=w2_t, b2_t=b2_t, w3_t=w3_t, b3_t=b3_t, w4_t=w4_t, b4_t=b4_t)


def pack_prop_params(prop_list):
    def per_round(pr):
        (w1, b1), (w2, b2), (w3, b3), (w4, b4) = pr['msg']
        (wir, bir), (wiz, biz), (win, bin_) = pr['gru_i']
        (whr, bhr), (whz, bhz), (whn, bhn) = pr['gru_h']
        H = NODE_H
        # message MLP: split W1 into sender / receiver / edge, 128-lane aligned
        w1u = _pad_cols(w1[:H], HP)
        w1v = _pad_cols(w1[H:2 * H], HP)
        w1uv = _pad_rows(jnp.concatenate([w1u, w1v], axis=1), HP)   # [128, 256]
        w1e = _pad_cols(w1[2 * H:], HP)                             # [80, 128]
        b1p = _pad_cols(b1, HP)
        w2p = _pad_rows(_pad_cols(w2, HP), HP)                      # [128, 128]
        b2p = _pad_cols(b2, HP)
        w3p = _pad_rows(_pad_cols(w3, HP), HP)
        b3p = _pad_cols(b3, HP)
        w4p = _pad_rows(w4, HP)                                     # [128, 160]
        # GRU: [r|z|n] gates, each padded to 128 lanes; wh rows padded to 128
        wi = jnp.concatenate([_pad_cols(wir, HP), _pad_cols(wiz, HP),
                              _pad_cols(win, HP)], axis=1)          # [160, 384]
        bi = jnp.concatenate([_pad_cols(bir, HP), _pad_cols(biz, HP),
                              _pad_cols(bin_, HP)], axis=1)
        wh = _pad_rows(jnp.concatenate([_pad_cols(whr, HP), _pad_cols(whz, HP),
                                        _pad_cols(whn, HP)], axis=1), HP)  # [128, 384]
        bh = jnp.concatenate([_pad_cols(bhr, HP), _pad_cols(bhz, HP),
                              _pad_cols(bhn, HP)], axis=1)
        return dict(w1uv=w1uv, w1e=w1e, b1=b1p, w2=w2p, b2=b2p, w3=w3p, b3=b3p,
                    w4=w4p, b4=b4, wi=wi, bi=bi, wh=wh, bh=bh)
    rounds = [per_round(pr) for pr in prop_list]
    return {k: jnp.stack([r[k] for r in rounds]) for k in rounds[0]}


# ============================ pure-JAX reference ==============================
def ref_graph_embed(hv, p):
    (wg, bg), (wm, bm) = p['gate'], p['map']
    gate = jax.nn.sigmoid(hv @ wg + bg)
    return jnp.sum(gate * (hv @ wm + bm), axis=1)


def ref_mlp4(x, layers, log_softmax=True, temperature=1.0):
    (w1, b1), (w2, b2), (w3, b3), (w4, b4) = layers
    h = jax.nn.relu(x @ w1 + b1)
    h = jax.nn.relu(h @ w2 + b2)
    h = jax.nn.relu(h @ w3 + b3)
    out = h @ w4 + b4
    if log_softmax:
        out = jax.nn.log_softmax(out / temperature, axis=-1)
    return out


def ref_decisions(hv, cond, p, temperature=1.0):
    hG = ref_graph_embed(hv, p['graph_embed'])
    h_last = hv[:, -1, :]
    logp_node = ref_mlp4(jnp.concatenate([hG, cond], -1), p['add_node'],
                         temperature=temperature)
    logp_edge = ref_mlp4(jnp.concatenate([hG, h_last, cond], -1), p['add_edge'],
                         temperature=temperature)
    cand = hv[:, :N_CAND, :].reshape(B * N_CAND, NODE_H)
    src_b = jnp.broadcast_to(h_last[:, None, :], (B, N_CAND, NODE_H)).reshape(-1, NODE_H)
    cond_b = jnp.broadcast_to(cond[:, None, :], (B, N_CAND, COND)).reshape(-1, COND)
    scores = ref_mlp4(jnp.concatenate([cand, src_b, cond_b], -1), p['choose_dest'],
                      log_softmax=False)
    logp_dest = jax.nn.log_softmax(scores.reshape(B, N_CAND) / temperature, axis=-1)
    dest_idx = jnp.argmax(logp_dest, axis=-1)
    h_dest = hv[jnp.arange(B), dest_idx]
    logp_type = ref_mlp4(jnp.concatenate([h_last, h_dest, cond], -1),
                         p['choose_edge_type'], temperature=temperature)
    return hG, logp_node, logp_edge, logp_dest, logp_type


def ref_prop_round(hv, edge_feat, adj, p):
    hu = jnp.broadcast_to(hv[:, :, None, :], (B, N, N, NODE_H))
    hd = jnp.broadcast_to(hv[:, None, :, :], (B, N, N, NODE_H))
    x = jnp.concatenate([hu, hd, edge_feat], -1)
    (w1, b1), (w2, b2), (w3, b3), (w4, b4) = p['msg']
    m = jax.nn.relu(x @ w1 + b1)
    m = jax.nn.relu(m @ w2 + b2)
    m = jax.nn.relu(m @ w3 + b3)
    msg = (m @ w4 + b4) * adj[..., None]
    a = jnp.sum(msg, axis=1)
    (wir, bir), (wiz, biz), (win, bin_) = p['gru_i']
    (whr, bhr), (whz, bhz), (whn, bhn) = p['gru_h']
    r = jax.nn.sigmoid(a @ wir + bir + hv @ whr + bhr)
    z = jax.nn.sigmoid(a @ wiz + biz + hv @ whz + bhz)
    n = jnp.tanh(a @ win + bin_ + r * (hv @ whn + bhn))
    return (1.0 - z) * n + z * hv


# ================================= main =======================================
if __name__ == "__main__":
    key = jax.random.PRNGKey(0)
    ks = jax.random.split(key, 8)

    # synthetic "mid-generation" state (nodes already embedded, dense edges)
    hv = jax.random.normal(ks[0], (B, N, NODE_H), jnp.float32)
    edge_feat = jax.random.normal(ks[1], (B, N, N, EDGE_H), jnp.float32)
    adj = (jax.random.uniform(ks[2], (B, N, N)) < 0.4).astype(jnp.float32)
    cond = jax.random.normal(ks[3], (B, COND), jnp.float32)   # class_conditioning_tensor
    params = init_params(ks[4])

    dec_p = pack_decision_params(params)
    prop_p = pack_prop_params(params['prop'])

    # pure-JAX reference (computed first, at highest matmul precision, so the
    # tightened tolerance is meaningful and hv is free to be aliased afterwards)
    with jax.default_matmul_precision("highest"):
        r_hG, r_node, r_edge, r_dest, r_type = ref_decisions(hv, cond, params)
        r_h = hv
        for r in range(NUM_PROP_ROUNDS):
            r_h = ref_prop_round(r_h, edge_feat, adj, params['prop'][r])
    jax.block_until_ready((r_hG, r_node, r_edge, r_dest, r_type, r_h))

    # 1) fused decision kernel: readout + add_node / add_edge / choose_dest /
    #    choose_edge_type, batched choose_dest, block-diag tails, one slab store
    hG, logp_node, logp_edge, logp_dest, logp_type = decision_forward(
        hv, cond, dec_p, temperature=1.0)

    # 2) fused propagation kernel: both rounds, both graphs batched into rows,
    #    hv aliased in place
    h_new = graph_prop(hv, edge_feat, adj, prop_p)

    # get_log_prob(): sum of the (greedily) chosen decisions' log probs
    def pick(lp):
        return lp[jnp.arange(lp.shape[0]), jnp.argmax(lp, axis=-1)]
    log_prob = (pick(logp_node).sum() + pick(logp_edge).sum()
                + pick(logp_dest).sum() + pick(logp_type).sum())

    outs = jax.block_until_ready((hG, logp_node, logp_edge, logp_dest,
                                  logp_type, h_new, log_prob))

    tol = dict(rtol=1e-3, atol=1e-3)
    np.testing.assert_allclose(np.asarray(hG), np.asarray(r_hG), **tol)
    np.testing.assert_allclose(np.asarray(logp_node), np.asarray(r_node), **tol)
    np.testing.assert_allclose(np.asarray(logp_edge), np.asarray(r_edge), **tol)
    np.testing.assert_allclose(np.asarray(logp_dest), np.asarray(r_dest), **tol)
    np.testing.assert_allclose(np.asarray(logp_type), np.asarray(r_type), **tol)
    np.testing.assert_allclose(np.asarray(h_new), np.asarray(r_h), **tol)

    print("KERNEL_OK")
</pallas_src>

<mosaic_0001>
module attributes {stable_mosaic.version = 11 : i64} {
  func.func @decision_kernel(%arg0: i32, %arg1: memref<2x8x80xf32, #tpu.memory_space<vmem>>, %arg2: memref<2x32xf32, #tpu.memory_space<vmem>>, %arg3: memref<80x161xf32, #tpu.memory_space<vmem>>, %arg4: memref<1x161xf32, #tpu.memory_space<vmem>>, %arg5: memref<160x80xf32, #tpu.memory_space<vmem>>, %arg6: memref<80x120xf32, #tpu.memory_space<vmem>>, %arg7: memref<80x40xf32, #tpu.memory_space<vmem>>, %arg8: memref<80x40xf32, #tpu.memory_space<vmem>>, %arg9: memref<32x160xf32, #tpu.memory_space<vmem>>, %arg10: memref<1x160xf32, #tpu.memory_space<vmem>>, %arg11: memref<120x120xf32, #tpu.memory_space<vmem>>, %arg12: memref<1x120xf32, #tpu.memory_space<vmem>>, %arg13: memref<120x120xf32, #tpu.memory_space<vmem>>, %arg14: memref<1x120xf32, #tpu.memory_space<vmem>>, %arg15: memref<120x192xf32, #tpu.memory_space<vmem>>, %arg16: memref<1x192xf32, #tpu.memory_space<vmem>>, %arg17: memref<40x40xf32, #tpu.memory_space<vmem>>, %arg18: memref<1x40xf32, #tpu.memory_space<vmem>>, %arg19: memref<40x40xf32, #tpu.memory_space<vmem>>, %arg20: memref<1x40xf32, #tpu.memory_space<vmem>>, %arg21: memref<40x49xf32, #tpu.memory_space<vmem>>, %arg22: memref<1x49xf32, #tpu.memory_space<vmem>>, %arg23: memref<2x160xf32, #tpu.memory_space<vmem>>, %arg24: memref<2x128xf32, #tpu.memory_space<vmem>>) attributes {dimension_semantics = [#tpu.dimension_semantics<arbitrary>], iteration_bounds = array<i64: 1>, scalar_prefetch = 0 : i64, scratch_operands = 0 : i64, tpu.core_type = #tpu.core_type<tc>, window_params = [{pipeline_mode = #tpu.pipeline_mode<synchronous>, transform_indices = @transform_0, window_bounds = array<i64: 2, 8, 80>}, {pipeline_mode = #tpu.pipeline_mode<synchronous>, transform_indices = @transform_1, window_bounds = array<i64: 2, 32>}, {pipeline_mode = #tpu.pipeline_mode<synchronous>, transform_indices = @transform_2, window_bounds = array<i64: 80, 161>}, {pipeline_mode = #tpu.pipeline_mode<synchronous>, transform_indices = @transform_3, window_bounds = array<i64: 1, 161>}, {pipeline_mode = #tpu.pipeline_mode<synchronous>, transform_indices = @transform_4, window_bounds = array<i64: 160, 80>}, {pipeline_mode = #tpu.pipeline_mode<synchronous>, transform_indices = @transform_5, window_bounds = array<i64: 80, 120>}, {pipeline_mode = #tpu.pipeline_mode<synchronous>, transform_indices = @transform_6, window_bounds = array<i64: 80, 40>}, {pipeline_mode = #tpu.pipeline_mode<synchronous>, transform_indices = @transform_7, window_bounds = array<i64: 80, 40>}, {pipeline_mode = #tpu.pipeline_mode<synchronous>, transform_indices = @transform_8, window_bounds = array<i64: 32, 160>}, {pipeline_mode = #tpu.pipeline_mode<synchronous>, transform_indices = @transform_9, window_bounds = array<i64: 1, 160>}, {pipeline_mode = #tpu.pipeline_mode<synchronous>, transform_indices = @transform_10, window_bounds = array<i64: 120, 120>}, {pipeline_mode = #tpu.pipeline_mode<synchronous>, transform_indices = @transform_11, window_bounds = array<i64: 1, 120>}, {pipeline_mode = #tpu.pipeline_mode<synchronous>, transform_indices = @transform_12, window_bounds = array<i64: 120, 120>}, {pipeline_mode = #tpu.pipeline_mode<synchronous>, transform_indices = @transform_13, window_bounds = array<i64: 1, 120>}, {pipeline_mode = #tpu.pipeline_mode<synchronous>, transform_indices = @transform_14, window_bounds = array<i64: 120, 192>}, {pipeline_mode = #tpu.pipeline_mode<synchronous>, transform_indices = @transform_15, window_bounds = array<i64: 1, 192>}, {pipeline_mode = #tpu.pipeline_mode<synchronous>, transform_indices = @transform_16, window_bounds = array<i64: 40, 40>}, {pipeline_mode = #tpu.pipeline_mode<synchronous>, transform_indices = @transform_17, window_bounds = array<i64: 1, 40>}, {pipeline_mode = #tpu.pipeline_mode<synchronous>, transform_indices = @transform_18, window_bounds = array<i64: 40, 40>}, {pipeline_mode = #tpu.pipeline_mode<synchronous>, transform_indices = @transform_19, window_bounds = array<i64: 1, 40>}, {pipeline_mode = #tpu.pipeline_mode<synchronous>, transform_indices = @transform_20, window_bounds = array<i64: 40, 49>}, {pipeline_mode = #tpu.pipeline_mode<synchronous>, transform_indices = @transform_21, window_bounds = array<i64: 1, 49>}, {pipeline_mode = #tpu.pipeline_mode<synchronous>, transform_indices = @transform_22, window_bounds = array<i64: 2, 160>}, {pipeline_mode = #tpu.pipeline_mode<synchronous>, transform_indices = @transform_23, window_bounds = array<i64: 2, 128>}]} {
    %c0 = arith.constant 0 : index
    %c0_0 = arith.constant 0 : index
    %c0_1 = arith.constant 0 : index
    %0 = vector.load %arg1[%c0, %c0_0, %c0_1] : memref<2x8x80xf32, #tpu.memory_space<vmem>>, vector<2x8x80xf32>
    %c0_2 = arith.constant 0 : index
    %c0_3 = arith.constant 0 : index
    %1 = vector.load %arg2[%c0_2, %c0_3] : memref<2x32xf32, #tpu.memory_space<vmem>>, vector<2x32xf32>
    %2 = vector.shape_cast %0 : vector<2x8x80xf32> to vector<16x80xf32>
    %c0_4 = arith.constant 0 : index
    %c0_5 = arith.constant 0 : index
    %3 = vector.load %arg3[%c0_4, %c0_5] : memref<80x161xf32, #tpu.memory_space<vmem>>, vector<80x161xf32>
    %cst = arith.constant dense<0.000000e+00> : vector<16x161xf32>
    %4 = tpu.matmul %2, %3, %cst {dimension_numbers = #tpu.dot_dimension_numbers<[1], [0], [0], [1], [0, 0, 1, 1], [], []>} : vector<16x80xf32>, vector<80x161xf32>, vector<16x161xf32> -> vector<16x161xf32>
    %c0_6 = arith.constant 0 : index
    %c0_7 = arith.constant 0 : index
    %5 = vector.load %arg4[%c0_6, %c0_7] : memref<1x161xf32, #tpu.memory_space<vmem>>, vector<1x161xf32>
    %6 = vector.broadcast %5 : vector<1x161xf32> to vector<16x161xf32>
    %7 = arith.addf %4, %6 : vector<16x161xf32>
    %8 = vector.extract_strided_slice %7 {offsets = [0, 160], sizes = [16, 1], strides = [1, 1]} : vector<16x161xf32> to vector<16x1xf32>
    %9 = arith.negf %8 : vector<16x1xf32>
    %10 = math.exp %9 : vector<16x1xf32>
    %cst_8 = arith.constant 1.000000e+00 : f32
    %11 = vector.broadcast %cst_8 : f32 to vector<16x1xf32>
    %12 = arith.addf %11, %10 : vector<16x1xf32>
    %13 = arith.divf %11, %12 : vector<16x1xf32>
    %14 = vector.extract_strided_slice %7 {offsets = [0, 0], sizes = [16, 160], strides = [1, 1]} : vector<16x161xf32> to vector<16x160xf32>
    %15 = vector.broadcast %13 : vector<16x1xf32> to vector<16x160xf32>
    %16 = arith.mulf %15, %14 : vector<16x160xf32>
    %17 = vector.shape_cast %16 : vector<16x160xf32> to vector<2x8x160xf32>
    %cst_9 = arith.constant dense<0.000000e+00> : vector<2x160xf32>
    %18 = vector.multi_reduction <add>, %17, %cst_9 [1] : vector<2x8x160xf32> to vector<2x160xf32>
    %c0_10 = arith.constant 0 : index
    %c0_11 = arith.constant 0 : index
    %19 = vector.load %arg23[%c0_10, %c0_11] : memref<2x160xf32, #tpu.memory_space<vmem>>, vector<2x160xf32>
    tpu.vector_store %arg23[%c0_10, %c0_11], %18 {strides = array<i32>} : memref<2x160xf32, #tpu.memory_space<vmem>>, vector<2x160xf32>,
    %20 = vector.extract_strided_slice %0 {offsets = [0, 7, 0], sizes = [2, 1, 80], strides = [1, 1, 1]} : vector<2x8x80xf32> to vector<2x1x80xf32>
    %21 = vector.shape_cast %20 : vector<2x1x80xf32> to vector<2x80xf32>
    %22 = vector.extract_strided_slice %0 {offsets = [0, 0, 0], sizes = [2, 7, 80], strides = [1, 1, 1]} : vector<2x8x80xf32> to vector<2x7x80xf32>
    %c0_12 = arith.constant 0 : index
    %c0_13 = arith.constant 0 : index
    %23 = vector.load %arg5[%c0_12, %c0_13] : memref<160x80xf32, #tpu.memory_space<vmem>>, vector<160x80xf32>
    %cst_14 = arith.constant dense<0.000000e+00> : vector<2x80xf32>
    %24 = tpu.matmul %18, %23, %cst_14 {dimension_numbers = #tpu.dot_dimension_numbers<[1], [0], [0], [1], [0, 0, 1, 1], [], []>} : vector<2x160xf32>, vector<160x80xf32>, vector<2x80xf32> -> vector<2x80xf32>
    %c0_15 = arith.constant 0 : index
    %c0_16 = arith.constant 0 : index
    %25 = vector.load %arg6[%c0_15, %c0_16] : memref<80x120xf32, #tpu.memory_space<vmem>>, vector<80x120xf32>
    %cst_17 = arith.constant dense<0.000000e+00> : vector<2x120xf32>
    %26 = tpu.matmul %21, %25, %cst_17 {dimension_numbers = #tpu.dot_dimension_numbers<[1], [0], [0], [1], [0, 0, 1, 1], [], []>} : vector<2x80xf32>, vector<80x120xf32>, vector<2x120xf32> -> vector<2x120xf32>
    %c0_18 = arith.constant 0 : index
    %c0_19 = arith.constant 0 : index
    %27 = vector.load %arg9[%c0_18, %c0_19] : memref<32x160xf32, #tpu.memory_space<vmem>>, vector<32x160xf32>
    %cst_20 = arith.constant dense<0.000000e+00> : vector<2x160xf32>
    %28 = tpu.matmul %1, %27, %cst_20 {dimension_numbers = #tpu.dot_dimension_numbers<[1], [0], [0], [1], [0, 0, 1, 1], [], []>} : vector<2x32xf32>, vector<32x160xf32>, vector<2x160xf32> -> vector<2x160xf32>
    %c0_21 = arith.constant 0 : index
    %c0_22 = arith.constant 0 : index
    %29 = vector.load %arg10[%c0_21, %c0_22] : memref<1x160xf32, #tpu.memory_space<vmem>>, vector<1x160xf32>
    %30 = vector.extract_strided_slice %24 {offsets = [0, 0], sizes = [2, 40], strides = [1, 1]} : vector<2x80xf32> to vector<2x40xf32>
    %31 = vector.extract_strided_slice %28 {offsets = [0, 0], sizes = [2, 40], strides = [1, 1]} : vector<2x160xf32> to vector<2x40xf32>
    %32 = arith.addf %30, %31 : vector<2x40xf32>
    %33 = vector.extract_strided_slice %29 {offsets = [0, 0], sizes = [1, 40], strides = [1, 1]} : vector<1x160xf32> to vector<1x40xf32>
    %34 = vector.broadcast %33 : vector<1x40xf32> to vector<2x40xf32>
    %35 = arith.addf %32, %34 : vector<2x40xf32>
    %36 = vector.extract_strided_slice %24 {offsets = [0, 40], sizes = [2, 40], strides = [1, 1]} : vector<2x80xf32> to vector<2x40xf32>
    %37 = vector.extract_strided_slice %26 {offsets = [0, 0], sizes = [2, 40], strides = [1, 1]} : vector<2x120xf32> to vector<2x40xf32>
    %38 = arith.addf %36, %37 : vector<2x40xf32>
    %39 = vector.extract_strided_slice %28 {offsets = [0, 40], sizes = [2, 40], strides = [1, 1]} : vector<2x160xf32> to vector<2x40xf32>
    %40 = arith.addf %38, %39 : vector<2x40xf32>
    %41 = vector.extract_strided_slice %29 {offsets = [0, 40], sizes = [1, 40], strides = [1, 1]} : vector<1x160xf32> to vector<1x40xf32>
    %42 = vector.broadcast %41 : vector<1x40xf32> to vector<2x40xf32>
    %43 = arith.addf %40, %42 : vector<2x40xf32>
    %44 = vector.extract_strided_slice %26 {offsets = [0, 40], sizes = [2, 40], strides = [1, 1]} : vector<2x120xf32> to vector<2x40xf32>
    %45 = vector.extract_strided_slice %28 {offsets = [0, 80], sizes = [2, 40], strides = [1, 1]} : vector<2x160xf32> to vector<2x40xf32>
    %46 = arith.addf %44, %45 : vector<2x40xf32>
    %47 = vector.extract_strided_slice %29 {offsets = [0, 80], sizes = [1, 40], strides = [1, 1]} : vector<1x160xf32> to vector<1x40xf32>
    %48 = vector.broadcast %47 : vector<1x40xf32> to vector<2x40xf32>
    %49 = arith.addf %46, %48 : vector<2x40xf32>
    %50 = vector.shape_cast %22 : vector<2x7x80xf32> to vector<14x80xf32>
    %c0_23 = arith.constant 0 : index
    %c0_24 = arith.constant 0 : index
    %51 = vector.load %arg7[%c0_23, %c0_24] : memref<80x40xf32, #tpu.memory_space<vmem>>, vector<80x40xf32>
    %cst_25 = arith.constant dense<0.000000e+00> : vector<14x40xf32>
    %52 = tpu.matmul %50, %51, %cst_25 {dimension_numbers = #tpu.dot_dimension_numbers<[1], [0], [0], [1], [0, 0, 1, 1], [], []>} : vector<14x80xf32>, vector<80x40xf32>, vector<14x40xf32> -> vector<14x40xf32>
    %53 = vector.shape_cast %52 : vector<14x40xf32> to vector<2x7x40xf32>
    %54 = vector.shape_cast %49 : vector<2x40xf32> to vector<2x1x40xf32>
    %55 = vector.broadcast %54 : vector<2x1x40xf32> to vector<2x7x40xf32>
    %56 = arith.addf %53, %55 : vector<2x7x40xf32>
    %57 = vector.shape_cast %35 : vector<2x40xf32> to vector<2x1x40xf32>
    %58 = vector.shape_cast %57 : vector<2x1x40xf32> to vector<2x1x40xf32>
    %59 = vector.broadcast %58 : vector<2x1x40xf32> to vector<2x7x40xf32>
    %60 = vector.shape_cast %43 : vector<2x40xf32> to vector<2x1x40xf32>
    %61 = vector.shape_cast %60 : vector<2x1x40xf32> to vector<2x1x40xf32>
    %62 = vector.broadcast %61 : vector<2x1x40xf32> to vector<2x7x40xf32>
    %63 = tpu.concatenate %59, %62, %56 in 2 : vector<2x7x40xf32>, vector<2x7x40xf32>, vector<2x7x40xf32> -> vector<2x7x120xf32>
    %64 = vector.shape_cast %63 : vector<2x7x120xf32> to vector<14x120xf32>
    %cst_26 = arith.constant 0.000000e+00 : f32
    %65 = vector.broadcast %cst_26 : f32 to vector<14x120xf32>
    %66 = arith.maximumf %64, %65 : vector<14x120xf32>
    %c0_27 = arith.constant 0 : index
    %c0_28 = arith.constant 0 : index
    %67 = vector.load %arg11[%c0_27, %c0_28] : memref<120x120xf32, #tpu.memory_space<vmem>>, vector<120x120xf32>
    %cst_29 = arith.constant dense<0.000000e+00> : vector<14x120xf32>
    %68 = tpu.matmul %66, %67, %cst_29 {dimension_numbers = #tpu.dot_dimension_numbers<[1], [0], [0], [1], [0, 0, 1, 1], [], []>} : vector<14x120xf32>, vector<120x120xf32>, vector<14x120xf32> -> vector<14x120xf32>
    %c0_30 = arith.constant 0 : index
    %c0_31 = arith.constant 0 : index
    %69 = vector.load %arg12[%c0_30, %c0_31] : memref<1x120xf32, #tpu.memory_space<vmem>>, vector<1x120xf32>
    %70 = vector.broadcast %69 : vector<1x120xf32> to vector<14x120xf32>
    %71 = arith.addf %68, %70 : vector<14x120xf32>
    %cst_32 = arith.constant 0.000000e+00 : f32
    %72 = vector.broadcast %cst_32 : f32 to vector<14x120xf32>
    %73 = arith.maximumf %71, %72 : vector<14x120xf32>
    %c0_33 = arith.constant 0 : index
    %c0_34 = arith.constant 0 : index
    %74 = vector.load %arg13[%c0_33, %c0_34] : memref<120x120xf32, #tpu.memory_space<vmem>>, vector<120x120xf32>
    %cst_35 = arith.constant dense<0.000000e+00> : vector<14x120xf32>
    %75 = tpu.matmul %73, %74, %cst_35 {dimension_numbers = #tpu.dot_dimension_numbers<[1], [0], [0], [1], [0, 0, 1, 1], [], []>} : vector<14x120xf32>, vector<120x120xf32>, vector<14x120xf32> -> vector<14x120xf32>
    %c0_36 = arith.constant 0 : index
    %c0_37 = arith.constant 0 : index
    %76 = vector.load %arg14[%c0_36, %c0_37] : memref<1x120xf32, #tpu.memory_space<vmem>>, vector<1x120xf32>
    %77 = vector.broadcast %76 : vector<1x120xf32> to vector<14x120xf32>
    %78 = arith.addf %75, %77 : vector<14x120xf32>
    %cst_38 = arith.constant 0.000000e+00 : f32
    %79 = vector.broadcast %cst_38 : f32 to vector<14x120xf32>
    %80 = arith.maximumf %78, %79 : vector<14x120xf32>
    %c0_39 = arith.constant 0 : index
    %c0_40 = arith.constant 0 : index
    %81 = vector.load %arg15[%c0_39, %c0_40] : memref<120x192xf32, #tpu.memory_space<vmem>>, vector<120x192xf32>
    %cst_41 = arith.constant dense<0.000000e+00> : vector<14x192xf32>
    %82 = tpu.matmul %80, %81, %cst_41 {dimension_numbers = #tpu.dot_dimension_numbers<[1], [0], [0], [1], [0, 0, 1, 1], [], []>} : vector<14x120xf32>, vector<120x192xf32>, vector<14x192xf32> -> vector<14x192xf32>
    %c0_42 = arith.constant 0 : index
    %c0_43 = arith.constant 0 : index
    %83 = vector.load %arg16[%c0_42, %c0_43] : memref<1x192xf32, #tpu.memory_space<vmem>>, vector<1x192xf32>
    %84 = vector.broadcast %83 : vector<1x192xf32> to vector<14x192xf32>
    %85 = arith.addf %82, %84 : vector<14x192xf32>
    %86 = vector.shape_cast %85 : vector<14x192xf32> to vector<2x7x192xf32>
    %87 = vector.extract_strided_slice %86 {offsets = [0, 0, 0], sizes = [2, 1, 3], strides = [1, 1, 1]} : vector<2x7x192xf32> to vector<2x1x3xf32>
    %88 = vector.shape_cast %87 : vector<2x1x3xf32> to vector<2x3xf32>
    %89 = vector.extract_strided_slice %86 {offsets = [0, 0, 64], sizes = [2, 1, 3], strides = [1, 1, 1]} : vector<2x7x192xf32> to vector<2x1x3xf32>
    %90 = vector.shape_cast %89 : vector<2x1x3xf32> to vector<2x3xf32>
    %91 = vector.extract_strided_slice %86 {offsets = [0, 0, 128], sizes = [2, 7, 1], strides = [1, 1, 1]} : vector<2x7x192xf32> to vector<2x7x1xf32>
    %92 = vector.shape_cast %91 : vector<2x7x1xf32> to vector<2x7xf32>
    %cst_44 = arith.constant 1.000000e+00 : f32
    %93 = vector.broadcast %cst_44 : f32 to vector<2x3xf32>
    %94 = arith.divf %88, %93 : vector<2x3xf32>
    %cst_45 = arith.constant dense<0xFF800000> : vector<2xf32>
    %95 = vector.multi_reduction <maximumf>, %94, %cst_45 [1] : vector<2x3xf32> to vector<2xf32>
    %96 = vector.shape_cast %95 : vector<2xf32> to vector<2x1xf32>
    %97 = vector.broadcast %96 : vector<2x1xf32> to vector<2x3xf32>
    %98 = arith.subf %94, %97 : vector<2x3xf32>
    %99 = math.exp %98 : vector<2x3xf32>
    %cst_46 = arith.constant dense<0.000000e+00> : vector<2xf32>
    %100 = vector.multi_reduction <add>, %99, %cst_46 [1] : vector<2x3xf32> to vector<2xf32>
    %101 = vector.shape_cast %100 : vector<2xf32> to vector<2x1xf32>
    %102 = math.log %101 : vector<2x1xf32>
    %103 = vector.broadcast %102 : vector<2x1xf32> to vector<2x3xf32>
    %104 = arith.subf %98, %103 : vector<2x3xf32>
    %cst_47 = arith.constant 1.000000e+00 : f32
    %105 = vector.broadcast %cst_47 : f32 to vector<2x3xf32>
    %106 = arith.divf %90, %105 : vector<2x3xf32>
    %cst_48 = arith.constant dense<0xFF800000> : vector<2xf32>
    %107 = vector.multi_reduction <maximumf>, %106, %cst_48 [1] : vector<2x3xf32> to vector<2xf32>
    %108 = vector.shape_cast %107 : vector<2xf32> to vector<2x1xf32>
    %109 = vector.broadcast %108 : vector<2x1xf32> to vector<2x3xf32>
    %110 = arith.subf %106, %109 : vector<2x3xf32>
    %111 = math.exp %110 : vector<2x3xf32>
    %cst_49 = arith.constant dense<0.000000e+00> : vector<2xf32>
    %112 = vector.multi_reduction <add>, %111, %cst_49 [1] : vector<2x3xf32> to vector<2xf32>
    %113 = vector.shape_cast %112 : vector<2xf32> to vector<2x1xf32>
    %114 = math.log %113 : vector<2x1xf32>
    %115 = vector.broadcast %114 : vector<2x1xf32> to vector<2x3xf32>
    %116 = arith.subf %110, %115 : vector<2x3xf32>
    %cst_50 = arith.constant 1.000000e+00 : f32
    %117 = vector.broadcast %cst_50 : f32 to vector<2x7xf32>
    %118 = arith.divf %92, %117 : vector<2x7xf32>
    %cst_51 = arith.constant dense<0xFF800000> : vector<2xf32>
    %119 = vector.multi_reduction <maximumf>, %118, %cst_51 [1] : vector<2x7xf32> to vector<2xf32>
    %120 = vector.shape_cast %119 : vector<2xf32> to vector<2x1xf32>
    %121 = vector.broadcast %120 : vector<2x1xf32> to vector<2x7xf32>
    %122 = arith.subf %118, %121 : vector<2x7xf32>
    %123 = math.exp %122 : vector<2x7xf32>
    %cst_52 = arith.constant dense<0.000000e+00> : vector<2xf32>
    %124 = vector.multi_reduction <add>, %123, %cst_52 [1] : vector<2x7xf32> to vector<2xf32>
    %125 = vector.shape_cast %124 : vector<2xf32> to vector<2x1xf32>
    %126 = math.log %125 : vector<2x1xf32>
    %127 = vector.broadcast %126 : vector<2x1xf32> to vector<2x7xf32>
    %128 = arith.subf %122, %127 : vector<2x7xf32>
    %129 = tpu.iota {dimensions = array<i32: 1>} : vector<2x7xi32>
    %cst_53 = arith.constant dense<0xFF800000> : vector<2xf32>
    %130 = vector.multi_reduction <maximumf>, %128, %cst_53 [1] : vector<2x7xf32> to vector<2xf32>
    %131 = vector.shape_cast %130 : vector<2xf32> to vector<2x1xf32>
    %132 = vector.broadcast %131 : vector<2x1xf32> to vector<2x7xf32>
    %133 = arith.cmpf oge, %128, %132 : vector<2x7xf32>
    %c7_i32 = arith.constant 7 : i32
    %134 = vector.broadcast %c7_i32 : i32 to vector<2x7xi32>
    %135 = arith.select %133, %129, %134 : vector<2x7xi1>, vector<2x7xi32>
    %cst_54 = arith.constant dense<2147483647> : vector<2xi32>
    %136 = vector.multi_reduction <minsi>, %135, %cst_54 [1] : vector<2x7xi32> to vector<2xi32>
    %137 = vector.shape_cast %136 : vector<2xi32> to vector<2x1xi32>
    %138 = vector.broadcast %137 : vector<2x1xi32> to vector<2x7xi32>
    %139 = arith.cmpi eq, %129, %138 : vector<2x7xi32>
    %140 = arith.extui %139 : vector<2x7xi1> to vector<2x7xi32>
    %141 = arith.sitofp %140 : vector<2x7xi32> to vector<2x7xf32>
    %142 = vector.shape_cast %141 : vector<2x7xf32> to vector<2x7x1xf32>
    %143 = vector.broadcast %142 : vector<2x7x1xf32> to vector<2x7x80xf32>
    %144 = arith.mulf %143, %22 : vector<2x7x80xf32>
    %cst_55 = arith.constant dense<0.000000e+00> : vector<2x80xf32>
    %145 = vector.multi_reduction <add>, %144, %cst_55 [1] : vector<2x7x80xf32> to vector<2x80xf32>
    %146 = vector.extract_strided_slice %26 {offsets = [0, 80], sizes = [2, 40], strides = [1, 1]} : vector<2x120xf32> to vector<2x40xf32>
    %c0_56 = arith.constant 0 : index
    %c0_57 = arith.constant 0 : index
    %147 = vector.load %arg8[%c0_56, %c0_57] : memref<80x40xf32, #tpu.memory_space<vmem>>, vector<80x40xf32>
    %cst_58 = arith.constant dense<0.000000e+00> : vector<2x40xf32>
    %148 = tpu.matmul %145, %147, %cst_58 {dimension_numbers = #tpu.dot_dimension_numbers<[1], [0], [0], [1], [0, 0, 1, 1], [], []>} : vector<2x80xf32>, vector<80x40xf32>, vector<2x40xf32> -> vector<2x40xf32>
    %149 = arith.addf %146, %148 : vector<2x40xf32>
    %150 = vector.extract_strided_slice %28 {offsets = [0, 120], sizes = [2, 40], strides = [1, 1]} : vector<2x160xf32> to vector<2x40xf32>
    %151 = arith.addf %149, %150 : vector<2x40xf32>
    %152 = vector.extract_strided_slice %29 {offsets = [0, 120], sizes = [1, 40], strides = [1, 1]} : vector<1x160xf32> to vector<1x40xf32>
    %153 = vector.broadcast %152 : vector<1x40xf32> to vector<2x40xf32>
    %154 = arith.addf %151, %153 : vector<2x40xf32>
    %cst_59 = arith.constant 0.000000e+00 : f32
    %155 = vector.broadcast %cst_59 : f32 to vector<2x40xf32>
    %156 = arith.maximumf %154, %155 : vector<2x40xf32>
    %c0_60 = arith.constant 0 : index
    %c0_61 = arith.constant 0 : index
    %157 = vector.load %arg17[%c0_60, %c0_61] : memref<40x40xf32, #tpu.memory_space<vmem>>, vector<40x40xf32>
    %cst_62 = arith.constant dense<0.000000e+00> : vector<2x40xf32>
    %158 = tpu.matmul %156, %157, %cst_62 {dimension_numbers = #tpu.dot_dimension_numbers<[1], [0], [0], [1], [0, 0, 1, 1], [], []>} : vector<2x40xf32>, vector<40x40xf32>, vector<2x40xf32> -> vector<2x40xf32>
    %c0_63 = arith.constant 0 : index
    %c0_64 = arith.constant 0 : index
    %159 = vector.load %arg18[%c0_63, %c0_64] : memref<1x40xf32, #tpu.memory_space<vmem>>, vector<1x40xf32>
    %160 = vector.broadcast %159 : vector<1x40xf32> to vector<2x40xf32>
    %161 = arith.addf %158, %160 : vector<2x40xf32>
    %cst_65 = arith.constant 0.000000e+00 : f32
    %162 = vector.broadcast %cst_65 : f32 to vector<2x40xf32>
    %163 = arith.maximumf %161, %162 : vector<2x40xf32>
    %c0_66 = arith.constant 0 : index
    %c0_67 = arith.constant 0 : index
    %164 = vector.load %arg19[%c0_66, %c0_67] : memref<40x40xf32, #tpu.memory_space<vmem>>, vector<40x40xf32>
    %cst_68 = arith.constant dense<0.000000e+00> : vector<2x40xf32>
    %165 = tpu.matmul %163, %164, %cst_68 {dimension_numbers = #tpu.dot_dimension_numbers<[1], [0], [0], [1], [0, 0, 1, 1], [], []>} : vector<2x40xf32>, vector<40x40xf32>, vector<2x40xf32> -> vector<2x40xf32>
    %c0_69 = arith.constant 0 : index
    %c0_70 = arith.constant 0 : index
    %166 = vector.load %arg20[%c0_69, %c0_70] : memref<1x40xf32, #tpu.memory_space<vmem>>, vector<1x40xf32>
    %167 = vector.broadcast %166 : vector<1x40xf32> to vector<2x40xf32>
    %168 = arith.addf %165, %167 : vector<2x40xf32>
    %cst_71 = arith.constant 0.000000e+00 : f32
    %169 = vector.broadcast %cst_71 : f32 to vector<2x40xf32>
    %170 = arith.maximumf %168, %169 : vector<2x40xf32>
    %c0_72 = arith.constant 0 : index
    %c0_73 = arith.constant 0 : index
    %171 = vector.load %arg21[%c0_72, %c0_73] : memref<40x49xf32, #tpu.memory_space<vmem>>, vector<40x49xf32>
    %cst_74 = arith.constant dense<0.000000e+00> : vector<2x49xf32>
    %172 = tpu.matmul %170, %171, %cst_74 {dimension_numbers = #tpu.dot_dimension_numbers<[1], [0], [0], [1], [0, 0, 1, 1], [], []>} : vector<2x40xf32>, vector<40x49xf32>, vector<2x49xf32> -> vector<2x49xf32>
    %c0_75 = arith.constant 0 : index
    %c0_76 = arith.constant 0 : index
    %173 = vector.load %arg22[%c0_75, %c0_76] : memref<1x49xf32, #tpu.memory_space<vmem>>, vector<1x49xf32>
    %174 = vector.broadcast %173 : vector<1x49xf32> to vector<2x49xf32>
    %175 = arith.addf %172, %174 : vector<2x49xf32>
    %cst_77 = arith.constant 1.000000e+00 : f32
    %176 = vector.broadcast %cst_77 : f32 to vector<2x49xf32>
    %177 = arith.divf %175, %176 : vector<2x49xf32>
    %cst_78 = arith.constant dense<0xFF800000> : vector<2xf32>
    %178 = vector.multi_reduction <maximumf>, %177, %cst_78 [1] : vector<2x49xf32> to vector<2xf32>
    %179 = vector.shape_cast %178 : vector<2xf32> to vector<2x1xf32>
    %180 = vector.broadcast %179 : vector<2x1xf32> to vector<2x49xf32>
    %181 = arith.subf %177, %180 : vector<2x49xf32>
    %182 = math.exp %181 : vector<2x49xf32>
    %cst_79 = arith.constant dense<0.000000e+00> : vector<2xf32>
    %183 = vector.multi_reduction <add>, %182, %cst_79 [1] : vector<2x49xf32> to vector<2xf32>
    %184 = vector.shape_cast %183 : vector<2xf32> to vector<2x1xf32>
    %185 = math.log %184 : vector<2x1xf32>
    %186 = vector.broadcast %185 : vector<2x1xf32> to vector<2x49xf32>
    %187 = arith.subf %181, %186 : vector<2x49xf32>
    %cst_80 = arith.constant 0.000000e+00 : f32
    %188 = vector.broadcast %cst_80 : f32 to vector<2x5xf32>
    %cst_81 = arith.constant 0.000000e+00 : f32
    %189 = vector.broadcast %cst_81 : f32 to vector<2x5xf32>
    %cst_82 = arith.constant 0.000000e+00 : f32
    %190 = vector.broadcast %cst_82 : f32 to vector<2x41xf32>
    %cst_83 = arith.constant 0.000000e+00 : f32
    %191 = vector.broadcast %cst_83 : f32 to vector<2x15xf32>
    %192 = tpu.concatenate %104, %188, %116, %189, %128, %190, %187, %191 in 1 : vector<2x3xf32>, vector<2x5xf32>, vector<2x3xf32>, vector<2x5xf32>, vector<2x7xf32>, vector<2x41xf32>, vector<2x49xf32>, vector<2x15xf32> -> vector<2x128xf32>
    %c0_84 = arith.constant 0 : index
    %c0_85 = arith.constant 0 : index
    %193 = vector.load %arg24[%c0_84, %c0_85] : memref<2x128xf32, #tpu.memory_space<vmem>>, vector<2x128xf32>
    tpu.vector_store %arg24[%c0_84, %c0_85], %192 {strides = array<i32>} : memref<2x128xf32, #tpu.memory_space<vmem>>, vector<2x128xf32>,
    return
  }
  func.func @transform_0(%arg0: i32) -> (i32, i32, i32) {
    %c0_i32 = arith.constant 0 : i32
    %c0_i32_0 = arith.constant 0 : i32
    %c0_i32_1 = arith.constant 0 : i32
    %c0_i32_2 = arith.constant 0 : i32
    return %c0_i32, %c0_i32_0, %c0_i32_1 : i32, i32, i32
  }
  func.func @transform_1(%arg0: i32) -> (i32, i32) {
    %c0_i32 = arith.constant 0 : i32
    %c0_i32_0 = arith.constant 0 : i32
    %c0_i32_1 = arith.constant 0 : i32
    return %c0_i32, %c0_i32_0 : i32, i32
  }
  func.func @transform_2(%arg0: i32) -> (i32, i32) {
    %c0_i32 = arith.constant 0 : i32
    %c0_i32_0 = arith.constant 0 : i32
    %c0_i32_1 = arith.constant 0 : i32
    return %c0_i32, %c0_i32_0 : i32, i32
  }
  func.func @transform_3(%arg0: i32) -> (i32, i32) {
    %c0_i32 = arith.constant 0 : i32
    %c0_i32_0 = arith.constant 0 : i32
    %c0_i32_1 = arith.constant 0 : i32
    return %c0_i32, %c0_i32_0 : i32, i32
  }
  func.func @transform_4(%arg0: i32) -> (i32, i32) {
    %c0_i32 = arith.constant 0 : i32
    %c0_i32_0 = arith.constant 0 : i32
    %c0_i32_1 = arith.constant 0 : i32
    return %c0_i32, %c0_i32_0 : i32, i32
  }
  func.func @transform_5(%arg0: i32) -> (i32, i32) {
    %c0_i32 = arith.constant 0 : i32
    %c0_i32_0 = arith.constant 0 : i32
    %c0_i32_1 = arith.constant 0 : i32
    return %c0_i32, %c0_i32_0 : i32, i32
  }
  func.func @transform_6(%arg0: i32) -> (i32, i32) {
    %c0_i32 = arith.constant 0 : i32
    %c0_i32_0 = arith.constant 0 : i32
    %c0_i32_1 = arith.constant 0 : i32
    return %c0_i32, %c0_i32_0 : i32, i32
  }
  func.func @transform_7(%arg0: i32) -> (i32, i32) {
    %c0_i32 = arith.constant 0 : i32
    %c0_i32_0 = arith.constant 0 : i32
    %c0_i32_1 = arith.constant 0 : i32
    return %c0_i32, %c0_i32_0 : i32, i32
  }
  func.func @transform_8(%arg0: i32) -> (i32, i32) {
    %c0_i32 = arith.constant 0 : i32
    %c0_i32_0 = arith.constant 0 : i32
    %c0_i32_1 = arith.constant 0 : i32
    return %c0_i32, %c0_i32_0 : i32, i32
  }
  func.func @transform_9(%arg0: i32) -> (i32, i32) {
    %c0_i32 = arith.constant 0 : i32
    %c0_i32_0 = arith.constant 0 : i32
    %c0_i32_1 = arith.constant 0 : i32
    return %c0_i32, %c0_i32_0 : i32, i32
  }
  func.func @transform_10(%arg0: i32) -> (i32, i32) {
    %c0_i32 = arith.constant 0 : i32
    %c0_i32_0 = arith.constant 0 : i32
    %c0_i32_1 = arith.constant 0 : i32
    return %c0_i32, %c0_i32_0 : i32, i32
  }
  func.func @transform_11(%arg0: i32) -> (i32, i32) {
    %c0_i32 = arith.constant 0 : i32
    %c0_i32_0 = arith.constant 0 : i32
    %c0_i32_1 = arith.constant 0 : i32
    return %c0_i32, %c0_i32_0 : i32, i32
  }
  func.func @transform_12(%arg0: i32) -> (i32, i32) {
    %c0_i32 = arith.constant 0 : i32
    %c0_i32_0 = arith.constant 0 : i32
    %c0_i32_1 = arith.constant 0 : i32
    return %c0_i32, %c0_i32_0 : i32, i32
  }
  func.func @transform_13(%arg0: i32) -> (i32, i32) {
    %c0_i32 = arith.constant 0 : i32
    %c0_i32_0 = arith.constant 0 : i32
    %c0_i32_1 = arith.constant 0 : i32
    return %c0_i32, %c0_i32_0 : i32, i32
  }
  func.func @transform_14(%arg0: i32) -> (i32, i32) {
    %c0_i32 = arith.constant 0 : i32
    %c0_i32_0 = arith.constant 0 : i32
    %c0_i32_1 = arith.constant 0 : i32
    return %c0_i32, %c0_i32_0 : i32, i32
  }
  func.func @transform_15(%arg0: i32) -> (i32, i32) {
    %c0_i32 = arith.constant 0 : i32
    %c0_i32_0 = arith.constant 0 : i32
    %c0_i32_1 = arith.constant 0 : i32
    return %c0_i32, %c0_i32_0 : i32, i32
  }
  func.func @transform_16(%arg0: i32) -> (i32, i32) {
    %c0_i32 = arith.constant 0 : i32
    %c0_i32_0 = arith.constant 0 : i32
    %c0_i32_1 = arith.constant 0 : i32
    return %c0_i32, %c0_i32_0 : i32, i32
  }
  func.func @transform_17(%arg0: i32) -> (i32, i32) {
    %c0_i32 = arith.constant 0 : i32
    %c0_i32_0 = arith.constant 0 : i32
    %c0_i32_1 = arith.constant 0 : i32
    return %c0_i32, %c0_i32_0 : i32, i32
  }
  func.func @transform_18(%arg0: i32) -> (i32, i32) {
    %c0_i32 = arith.constant 0 : i32
    %c0_i32_0 = arith.constant 0 : i32
    %c0_i32_1 = arith.constant 0 : i32
    return %c0_i32, %c0_i32_0 : i32, i32
  }
  func.func @transform_19(%arg0: i32) -> (i32, i32) {
    %c0_i32 = arith.constant 0 : i32
    %c0_i32_0 = arith.constant 0 : i32
    %c0_i32_1 = arith.constant 0 : i32
    return %c0_i32, %c0_i32_0 : i32, i32
  }
  func.func @transform_20(%arg0: i32) -> (i32, i32) {
    %c0_i32 = arith.constant 0 : i32
    %c0_i32_0 = arith.constant 0 : i32
    %c0_i32_1 = arith.constant 0 : i32
    return %c0_i32, %c0_i32_0 : i32, i32
  }
  func.func @transform_21(%arg0: i32) -> (i32, i32) {
    %c0_i32 = arith.constant 0 : i32
    %c0_i32_0 = arith.constant 0 : i32
    %c0_i32_1 = arith.constant 0 : i32
    return %c0_i32, %c0_i32_0 : i32, i32
  }
  func.func @transform_22(%arg0: i32) -> (i32, i32) {
    %c0_i32 = arith.constant 0 : i32
    %c0_i32_0 = arith.constant 0 : i32
    %c0_i32_1 = arith.constant 0 : i32
    return %c0_i32, %c0_i32_0 : i32, i32
  }
  func.func @transform_23(%arg0: i32) -> (i32, i32) {
    %c0_i32 = arith.constant 0 : i32
    %c0_i32_0 = arith.constant 0 : i32
    %c0_i32_1 = arith.constant 0 : i32
    return %c0_i32, %c0_i32_0 : i32, i32
  }
}

</mosaic_0001>

<bundles_post_ra>
// kernel: tpu_custom_call.1
= control target key start
LH: loop header
LB: loop body
LE: loop exit
PB: predicated region body
PF: predicated region fallthrough
CT: control target
= control target key end

     0   :  { %s6085_s0 = inlined_call_operand.hbm [shape: f32[2,8,80], index: 0, kind: input, shape index: {}]   ;;  %s6086_s1 = inlined_call_operand.vmem [shape: f32[2,32], index: 1, kind: input, shape index: {}]   ;;  %s6087_s2 = inlined_call_operand.vmem [shape: f32[80,161], index: 2, kind: input, shape index: {}]   ;;  %s6088_s3 = inlined_call_operand.vmem [shape: f32[1,161], index: 3, kind: input, shape index: {}]   ;;  %s6089_s4 = inlined_call_operand.vmem [shape: f32[160,80], index: 4, kind: input, shape index: {}]   ;;  %s6090_s5 = inlined_call_operand.vmem [shape: f32[80,120], index: 5, kind: input, shape index: {}]   ;;  %s6091_s6 = inlined_call_operand.vmem [shape: f32[80,40], index: 6, kind: input, shape index: {}]   ;;  %s6092_s7 = inlined_call_operand.vmem [shape: f32[80,40], index: 7, kind: input, shape index: {}]   ;;  %s6093_s8 = inlined_call_operand.hbm [shape: f32[32,160], index: 8, kind: input, shape index: {}]   ;;  %s6094_s9 = inlined_call_operand.vmem [shape: f32[1,160], index: 9, kind: input, shape index: {}]   ;;  %s6095_s10 = inlined_call_operand.vmem [shape: f32[120,120], index: 10, kind: input, shape index: {}]   ;;  %s6096_s11 = inlined_call_operand.vmem [shape: f32[1,120], index: 11, kind: input, shape index: {}]   ;;  %s6097_s12 = inlined_call_operand.hbm [shape: f32[120,120], index: 12, kind: input, shape index: {}]   ;;  %s6098_s13 = inlined_call_operand.vmem [shape: f32[1,120], index: 13, kind: input, shape index: {}]   ;;  %s6099_s14 = inlined_call_operand.vmem [shape: f32[120,192], index: 14, kind: input, shape index: {}]   ;;  %s6100_s15 = inlined_call_operand.vmem [shape: f32[1,192], index: 15, kind: input, shape index: {}]   ;;  %s6101_s16 = inlined_call_operand.hbm [shape: f32[40,40], index: 16, kind: input, shape index: {}]   ;;  %s6102_s17 = inlined_call_operand.vmem [shape: f32[1,40], index: 17, kind: input, shape index: {}]   ;;  %s6103_s18 = inlined_call_operand.hbm [shape: f32[40,40], index: 18, kind: input, shape index: {}]   ;;  %s6104_s19 = inlined_call_operand.vmem [shape: f32[1,40], index: 19, kind: input, shape index: {}]   ;;  %s6105_s20 = inlined_call_operand.hbm [shape: f32[40,49], index: 20, kind: input, shape index: {}]   ;;  %s6106_s21 = inlined_call_operand.vmem [shape: f32[1,49], index: 21, kind: input, shape index: {}]   ;;  %s6107_s22 = inlined_call_operand.hbm [shape: f32[2,160], index: 22, kind: output, shape index: {0}]   ;;  %s6108_s23 = inlined_call_operand.hbm [shape: f32[2,128], index: 23, kind: output, shape index: {1}]  }
   0x1   :  { %6116 = sst [smem:[#allocation22_spill]] %s6085_s0 }
   0x2   :  { %6117 = sst [smem:[#allocation23_spill]] %s6086_s1 }
   0x3   :  { %6118 = sst [smem:[#allocation24_spill]] %s6087_s2 }
   0x4   :  { %6119 = sst [smem:[#allocation25_spill]] %s6088_s3 }
   0x5   :  { %6120 = sst [smem:[#allocation26_spill]] %s6089_s4 }
   0x6   :  { %6121 = sst [smem:[#allocation27_spill]] %s6090_s5 }
   0x7   :  { %6122 = sst [smem:[#allocation28_spill]] %s6091_s6 }
   0x8   :  { %6123 = sst [smem:[#allocation29_spill]] %s6092_s7 }
   0x9   :  { %6124 = sst [smem:[#allocation30_spill]] %s6108_s23 }
   0xa   :  { %29 = vsyncpa [#allocation3], 0 }
   0xb   :  { %30 = vsyncpa [#allocation6], 0 }
   0xc   :  { %31 = vsyncpa [#allocation9], 0 }
   0xd   :  { %32 = vsyncpa [#allocation12], 0 }
   0xe   :  { %33 = vsyncpa [#allocation4], 0 }
   0xf   :  { %34 = vsyncpa [#allocation15], 0  ;;  %s4706_s4 = smov [#allocation5]   ;;  %s4518_s5 = scalar_lea.hbm %s6093_s8, 1024 }
  0x10   :  { %s66_s30 = sshll.u32 %s4706_s4, 4  ;;  %p4519_p0 = scmp.ne.s32.totalorder %s6093_s8, %s4518_s5  ;;  %s67_s30 = int_to_ptr.vmem [resolvable:$true] %s66_s30 }
  0x11   :  { %p4522_p1 = scmp.lt.u32.totalorder %s4518_s5, %s6093_s8 }
  0x13   :  { %p4524_p2 = pnand %p4522_p1, %p4519_p0 }
  0x15   :  { %4527 = shalt.err (!%p4524_p2)
}
  0x16   :  { %s4528_s27 = scalar_lea.vmem %s67_s30, 1024  ;;  %p4533_p4 = scmp.lt.s32.totalorder %s67_s30, %s67_s30 }
  0x17   :  { %p4529_p3 = scmp.ne.s32.totalorder %s67_s30, %s4528_s27  ;;  %p4534_p5 = scmp.lt.s32.totalorder %s4528_s27, %s4528_s27 }
  0x19   :  { %p4535_p6 = por %p4534_p5, %p4533_p4 }
  0x1b   :  { %p4536_p7 = pnand %p4535_p6, %p4529_p3 }
  0x1d   :  { %4539 = shalt.err (!%p4536_p7)
}
  0x1e   :  { %s4707_s7 = smov 256   ;;  %s4708_s28 = smov 16  }
  0x1f   :  { %72 = dma.hbm_to_vmem [thread:$0]  %s6093_s8, 1024, %s67_s30, [#allocation6], %s4707_s7, %s4707_s7, %s4708_s28  }
  0x20   :  { %s4709_s0 = smov [#allocation8]   ;;  %s4710_s24 = smov [#allocation2]  }
  0x21   :  { %s102_s4 = sshll.u32 %s4709_s0, 4  ;;  %s40_s25 = sshll.u32 %s4710_s24, 4  ;;  %s103_s4 = int_to_ptr.vmem [resolvable:$true] %s102_s4  ;;  %s41_s25 = int_to_ptr.vmem [resolvable:$true] %s40_s25 }
  0x22   :  { %s4540_s26 = scalar_lea.hbm %s6101_s16, 640 }
  0x23   :  { %p4541_p8 = scmp.ne.s32.totalorder %s6101_s16, %s4540_s26  ;;  %p4544_p9 = scmp.lt.u32.totalorder %s4540_s26, %s6101_s16 }
  0x25   :  { %p4546_p10 = pnand %p4544_p9, %p4541_p8 }
  0x27   :  { %4549 = shalt.err (!%p4546_p10)
}
  0x28   :  { %s4550_s8 = scalar_lea.vmem %s103_s4, 640  ;;  %p4555_p12 = scmp.lt.s32.totalorder %s103_s4, %s103_s4 }
  0x29   :  { %p4551_p11 = scmp.ne.s32.totalorder %s103_s4, %s4550_s8  ;;  %p4556_p13 = scmp.lt.s32.totalorder %s4550_s8, %s4550_s8 }
  0x2b   :  { %p4557_p0 = por %p4556_p13, %p4555_p12 }
  0x2d   :  { %p4558_p1 = pnand %p4557_p0, %p4551_p11 }
  0x2f   :  { %4561 = shalt.err (!%p4558_p1)
}
  0x30   :  { %s4711_s30 = smov 128   ;;  %s4712_s7 = smov 8  }
  0x31   :  { %108 = dma.hbm_to_vmem [thread:$0]  %s6101_s16, 640, %s103_s4, [#allocation9], %s4711_s30, %s4711_s30, %s4712_s7  }
  0x32   :  { %s6125_s0 = sld [smem:[#allocation22_spill]] }
  0x38   :  { %s4562_s24 = scalar_lea.hbm %s6125_s0, 256 }
  0x39   :  { %p4563_p2 = scmp.ne.s32.totalorder %s6125_s0, %s4562_s24  ;;  %p4566_p3 = scmp.lt.u32.totalorder %s4562_s24, %s6125_s0 }
  0x3b   :  { %p4568_p4 = pnand %p4566_p3, %p4563_p2 }
  0x3d   :  { %4571 = shalt.err (!%p4568_p4)
}
  0x3e   :  { %s4572_s6 = scalar_lea.vmem %s41_s25, 256  ;;  %p4577_p6 = scmp.lt.s32.totalorder %s41_s25, %s41_s25 }
  0x3f   :  { %p4573_p5 = scmp.ne.s32.totalorder %s41_s25, %s4572_s6  ;;  %p4578_p7 = scmp.lt.s32.totalorder %s4572_s6, %s4572_s6 }
  0x41   :  { %p4579_p8 = por %p4578_p7, %p4577_p6 }
  0x43   :  { %p4580_p9 = pnand %p4579_p8, %p4573_p5 }
  0x45   :  { %4583 = shalt.err (!%p4580_p9)
}
  0x46   :  { %46 = dma.hbm_to_vmem [thread:$0]  %s6125_s0, 256, %s41_s25, [#allocation3], %s4711_s30, %s4711_s30, %s4712_s7  }
  0x47   :  { %s4713_s27 = smov [#allocation7]   ;;  %s4714_s28 = smov [#allocation10]  }
  0x48   :  { %s84_s8 = sshll.u32 %s4713_s27, 4  ;;  %s116_s29 = sshll.u32 %s4714_s28, 4  ;;  %s85_s8 = int_to_ptr.vmem [resolvable:$true] %s84_s8  ;;  %s117_s29 = int_to_ptr.vmem [resolvable:$true] %s116_s29 }
  0x49   :  { %s4584_s24 = scalar_lea.hbm %s6097_s12, 1920 }
  0x4a   :  { %p4585_p10 = scmp.ne.s32.totalorder %s6097_s12, %s4584_s24  ;;  %p4588_p11 = scmp.lt.u32.totalorder %s4584_s24, %s6097_s12 }
  0x4c   :  { %p4590_p12 = pnand %p4588_p11, %p4585_p10 }
  0x4e   :  { %4593 = shalt.err (!%p4590_p12)
}
  0x4f   :  { %s4594_s25 = scalar_lea.vmem %s85_s8, 1920  ;;  %p4599_p0 = scmp.lt.s32.totalorder %s85_s8, %s85_s8 }
  0x50   :  { %p4595_p13 = scmp.ne.s32.totalorder %s85_s8, %s4594_s25  ;;  %p4600_p1 = scmp.lt.s32.totalorder %s4594_s25, %s4594_s25 }
  0x52   :  { %p4601_p2 = por %p4600_p1, %p4599_p0 }
  0x54   :  { %p4602_p3 = pnand %p4601_p2, %p4595_p13 }
  0x56   :  { %4605 = shalt.err (!%p4602_p3)
}
  0x57   :  { %90 = dma.hbm_to_vmem [thread:$0]  %s6097_s12, 1920, %s85_s8, [#allocation6], %s4711_s30, %s4711_s30, %s4712_s7  }
  0x58   :  { %s4606_s27 = scalar_lea.hbm %s6103_s18, 640 }
  0x59   :  { %p4607_p4 = scmp.ne.s32.totalorder %s6103_s18, %s4606_s27  ;;  %p4610_p5 = scmp.lt.u32.totalorder %s4606_s27, %s6103_s18 }
  0x5b   :  { %p4612_p6 = pnand %p4610_p5, %p4607_p4 }
  0x5d   :  { %4615 = shalt.err (!%p4612_p6)
}
  0x5e   :  { %s4616_s5 = scalar_lea.vmem %s117_s29, 640  ;;  %p4621_p8 = scmp.lt.s32.totalorder %s117_s29, %s117_s29 }
  0x5f   :  { %p4617_p7 = scmp.ne.s32.totalorder %s117_s29, %s4616_s5  ;;  %p4622_p9 = scmp.lt.s32.totalorder %s4616_s5, %s4616_s5 }
  0x61   :  { %p4623_p10 = por %p4622_p9, %p4621_p8 }
  0x63   :  { %p4624_p11 = pnand %p4623_p10, %p4617_p7 }
  0x65   :  { %4627 = shalt.err (!%p4624_p11)
}
  0x66   :  { %122 = dma.hbm_to_vmem [thread:$0]  %s6103_s18, 640, %s117_s29, [#allocation9], %s4711_s30, %s4711_s30, %s4712_s7  }
  0x67   :  { %s4715_s1 = smov [#allocation11]   ;;  %s4628_s0 = scalar_lea.hbm %s6105_s20, 640 }
  0x68   :  { %s130_s26 = sshll.u32 %s4715_s1, 4  ;;  %p4629_p12 = scmp.ne.s32.totalorder %s6105_s20, %s4628_s0  ;;  %s131_s26 = int_to_ptr.vmem [resolvable:$true] %s130_s26 }
  0x69   :  { %p4632_p13 = scmp.lt.u32.totalorder %s4628_s0, %s6105_s20 }
  0x6b   :  { %p4634_p0 = pnand %p4632_p13, %p4629_p12 }
  0x6d   :  { %4637 = shalt.err (!%p4634_p0)
}
  0x6e   :  { %s4638_s28 = scalar_lea.vmem %s131_s26, 640  ;;  %p4643_p2 = scmp.lt.s32.totalorder %s131_s26, %s131_s26 }
  0x6f   :  { %p4639_p1 = scmp.ne.s32.totalorder %s131_s26, %s4638_s28  ;;  %p4644_p3 = scmp.lt.s32.totalorder %s4638_s28, %s4638_s28 }
  0x71   :  { %p4645_p4 = por %p4644_p3, %p4643_p2 }
  0x73   :  { %p4646_p5 = pnand %p4645_p4, %p4639_p1 }
  0x75   :  { %4649 = shalt.err (!%p4646_p5)
}
  0x76   :  { %136 = dma.hbm_to_vmem [thread:$0]  %s6105_s20, 640, %s131_s26, [#allocation12], %s4711_s30, %s4711_s30, %s4712_s7  }
  0x77   :  { %4694 = dma.done.wait [#allocation3], 256  }
  0x78   :  { %4695 = vsyncadd [#allocation3], 4294967040 }
  0x79   :  { %4696 = dma.done.wait [#allocation6], 2944  }
  0x7a   :  { %4697 = vsyncadd [#allocation6], 4294964352 }
  0x7b   :  { %4698 = dma.done.wait [#allocation9], 1280  }
  0x7c   :  { %4699 = vsyncadd [#allocation9], 4294966016 }
  0x7d   :  { %4700 = dma.done.wait [#allocation12], 640  }
  0x7e   :  { %4701 = vsyncadd [#allocation12], 4294966656  ;;  %v4716_v0 = vmov 0.0   ;;  %v4717_v1 = vmov 0.0|0.0   ;;  %s6126_s24 = sld [smem:[#allocation24_spill]]  ;;  %s6127_s5 = sld [smem:[#allocation27_spill]] }
  0x7f   :  { %263 = vmatprep.mubr.f32.mxu0 %v4716_v0  ;;  %4241 = vmatprep.subr.bf16.mxu1 %v4717_v1  ;;  %v5006_v34 = vld [vmem:[#allocation2] sm:$0xff]  ;;  %vm192_vm0 = vcmask 654336   ;;  %v5018_v38 = vld [vmem:[#allocation2 + $0x8] sm:$0xff]  ;;  %vm4718_vm1 = vmmov 0   ;;  %v548_v48 = vld [vmem:[#allocation5 + $0x8] sm:$0xff]  ;;  %vm354_vm2 = vcmask 1041409  }
  0x80   :  { %v550_v49 = vld [vmem:[#allocation5 + $0x18] sm:$0xff]  ;;  %v472_v50 = vrot.slane %v5006_v34, 7  ;;  %v473_v51 = vrot.slane %v5018_v38, 6  ;;  %v547_v54 = vld [vmem:[#allocation5] sm:$0xff]  ;;  %v549_v55 = vld [vmem:[#allocation5 + $0x10] sm:$0xff]  ;;  %vm308_vm3 = vcmask 261120  }
  0x81   :  { %v4286_v53 = vpack.c.bf16 %v550_v49, %v548_v48  ;;  %v552_v56 = vld [vmem:[#allocation5 + $0x28] sm:$0xff]  ;;  %v554_v57 = vld [vmem:[#allocation5 + $0x38] sm:$0xff]  ;;  %v4288_v59 = vpack.c.bf16 %v549_v55, %v547_v54  ;;  %v551_v61 = vld [vmem:[#allocation5 + $0x20] sm:$0xff]  ;;  %s6129_s7 = sld [smem:[#allocation26_spill]]  ;;  %s6130_s6 = sld [smem:[#allocation25_spill]]  ;;  %vm356_vm4 = vcmask 1043459  }
  0x82   :  { %v474_v58 = vsel %vm354_vm2, %v473_v51, %v472_v50  ;;  %v4290_v60 = vpack.c.bf16 %v554_v57, %v552_v56  ;;  %v553_v62 = vld [vmem:[#allocation5 + $0x30] sm:$0xff]  ;;  %s4720_s0 = smov 88   ;;  %s6131_s25 = sld [smem:[#allocation28_spill]]  ;;  %vm363_vm5 = vcmask 1041408   ;;  %vm364_vm6 = vcmask 257026  }
  0x83   :  { %v4292_v63 = vpack.c.bf16 %v553_v62, %v551_v61  ;;  %vm358_vm7 = vcmask 1045509   ;;  %vm360_vm8 = vcmask 1047559   ;;  %vm365_vm9 = vmor %vm364_vm6, %vm363_vm5  ;;  %s4723_s2 = smov 40   ;;  %vm1405_vm10 = vcmask 326656  }
  0x84   :  { %v161_v2 = vld [vmem:[%s6126_s24 + $0x8] sm:$0xff]  ;;  %v163_v3 = vld [vmem:[%s6126_s24 + $0x18] sm:$0xff]  ;;  %v160_v4 = vld [vmem:[%s6126_s24] sm:$0xff]  ;;  %vm1661_vm11 = vcmask 982016   ;;  %vm2351_vm12 = vcmask 50176  }
  0x85   :  { %v4221_v5 = vpack.c.bf16 %v163_v3, %v161_v2  ;;  %v162_v6 = vld [vmem:[%s6126_s24 + $0x10] sm:$0xff]  ;;  %v165_v7 = vld [vmem:[%s6126_s24 + $0x28] sm:$0xff]  ;;  %v167_v8 = vld [vmem:[%s6126_s24 + $0x38] sm:$0xff]  ;;  %v4719_v3 = vmov 32  }
  0x86   :  { %v4223_v9 = vpack.c.bf16 %v162_v6, %v160_v4  ;;  %v4225_v10 = vpack.c.bf16 %v167_v8, %v165_v7  ;;  %v164_v11 = vld [vmem:[%s6126_s24 + $0x20] sm:$0xff]  ;;  %v166_v12 = vld [vmem:[%s6126_s24 + $0x30] sm:$0xff]  ;;  %v169_v13 = vld [vmem:[%s6126_s24 + $0x48] sm:$0xff]  ;;  %4456 = vset.pattern.permute.xlu0 %v4719_v3  ;;  %v4721_v3 = vmov 1966171168  }
  0x87   :  { %4222 = vmatprep.subr.bf16.mxu0 %v4221_v5  ;;  %v171_v14 = vld [vmem:[%s6126_s24 + $0x58] sm:$0xff]  ;;  %v4227_v15 = vpack.c.bf16 %v166_v12, %v164_v11  ;;  %v168_v17 = vld [vmem:[%s6126_s24 + $0x40] sm:$0xff]  ;;  %v170_v18 = vld [vmem:[%s6126_s24 + $0x50] sm:$0xff] }
  0x88   :  { %4224 = vmatpush1.bf16.msra.mxu0 %v4223_v9  ;;  %v4229_v16 = vpack.c.bf16 %v171_v14, %v169_v13  ;;  %v173_v19 = vld [vmem:[%s6126_s24 + $0x68] sm:$0xff]  ;;  %v175_v20 = vld [vmem:[%s6126_s24 + $0x78] sm:$0xff]  ;;  %v4231_v21 = vpack.c.bf16 %v170_v18, %v168_v17  ;;  %v172_v23 = vld [vmem:[%s6126_s24 + $0x60] sm:$0xff] }
  0x89   :  { %4226 = vmatprep.subr.bf16.mxu0 %v4225_v10  ;;  %v4233_v22 = vpack.c.bf16 %v175_v20, %v173_v19  ;;  %v174_v24 = vld [vmem:[%s6126_s24 + $0x70] sm:$0xff]  ;;  %v177_v25 = vld [vmem:[%s6126_s24 + $0x88] sm:$0xff]  ;;  %v179_v26 = vld [vmem:[%s6126_s24 + $0x98] sm:$0xff]  ;;  %v182_v10 = vlaneseq }
  0x8a   :  { %v4235_v27 = vpack.c.bf16 %v174_v24, %v172_v23  ;;  %v4237_v28 = vpack.c.bf16 %v179_v26, %v177_v25  ;;  %v176_v29 = vld [vmem:[%s6126_s24 + $0x80] sm:$0xff]  ;;  %v178_v30 = vld [vmem:[%s6126_s24 + $0x90] sm:$0xff]  ;;  %v463_v33 = vld [vmem:[%s6127_s5 + $0x8] sm:$0xff]  ;;  %s6134_s24 = sld [smem:[#allocation29_spill]] }
  0x8b   :  { %v4239_v31 = vpack.c.bf16 %v178_v30, %v176_v29  ;;  %v462_v32 = vld [vmem:[%s6127_s5] sm:$0xff]  ;;  %v464_v36 = vld [vmem:[%s6127_s5 + $0x10] sm:$0xff]  ;;  %v465_v37 = vld [vmem:[%s6127_s5 + $0x18] sm:$0xff]  ;;  %v5070_v11 = vshrl.u32 %v182_v10, 7 }
  0x8c   :  { %4228 = vmatpush1.bf16.msra.mxu0 %v4227_v15  ;;  %v4272_v35 = vpack.c.bf16 %v463_v33, %v462_v32  ;;  %v4275_v39 = vpack.c.bf16 %v465_v37, %v464_v36  ;;  %v466_v40 = vld [vmem:[%s6127_s5 + $0x20] sm:$0xff]  ;;  %v467_v41 = vld [vmem:[%s6127_s5 + $0x28] sm:$0xff]  ;;  %v468_v43 = vld [vmem:[%s6127_s5 + $0x30] sm:$0xff] }
  0x8d   :  { %4230 = vmatprep.subr.bf16.mxu0 %v4229_v16  ;;  %v4278_v42 = vpack.c.bf16 %v467_v41, %v466_v40  ;;  %v469_v44 = vld [vmem:[%s6127_s5 + $0x38] sm:$0xff]  ;;  %v470_v46 = vld [vmem:[%s6127_s5 + $0x40] sm:$0xff]  ;;  %v471_v47 = vld [vmem:[%s6127_s5 + $0x48] sm:$0xff]  ;;  %s6128_s5 = sld [smem:[#allocation23_spill]]  ;;  %v5073_v12 = vsub.s32 1, %v5070_v11  ;;  %v5118_v41 = vsub.s32 0, %v5070_v11 }
  0x8e   :  { %v4281_v45 = vpack.c.bf16 %v469_v44, %v468_v43  ;;  %v4284_v52 = vpack.c.bf16 %v471_v47, %v470_v46  ;;  %v367_v4 = vld [vmem:[%s6129_s7] sm:$0xff]  ;;  %v368_v5 = vld [vmem:[%s6129_s7 + $0x8] sm:$0xff]  ;;  %v369_v6 = vld [vmem:[%s6129_s7 + $0x10] sm:$0xff] }
  0x8f   :  { %v4242_v7 = vpack.c.bf16 %v368_v5, %v367_v4  ;;  %v370_v8 = vld [vmem:[%s6129_s7 + $0x18] sm:$0xff]  ;;  %v5078_v13 = vld [vmem:[%s6130_s6] sm:$0x3]  ;;  %v372_v25 = vld [vmem:[%s6129_s7 + $0x28] sm:$0xff]  ;;  %v656_v4 = vunpack.c.l.s4 %v4721_v3 }
  0x90   :  { %4232 = vmatpush1.bf16.msra.mxu0 %v4231_v21  ;;  %v4245_v9 = vpack.c.bf16 %v370_v8, %v369_v6  ;;  %v189_v14 = vrot.slane %v5078_v13, %v5073_v12  ;;  %v371_v24 = vld [vmem:[%s6129_s7 + $0x20] sm:$0xff]  ;;  %v373_v30 = vld [vmem:[%s6129_s7 + $0x30] sm:$0xff]  ;;  %v376_v37 = vld [vmem:[%s6129_s7 + $0x48] sm:$0xff]  ;;  %v654_v8 = vcombine.high %v5006_v34, %v5006_v34 }
  0x91   :  { %4234 = vmatprep.subr.bf16.mxu0 %v4233_v22  ;;  %4243 = vmatpush1.bf16.msra.mxu1 %v4242_v7  ;;  %v375_v36 = vld [vmem:[%s6129_s7 + $0x40] sm:$0xff]  ;;  %v377_v43 = vld [vmem:[%s6129_s7 + $0x50] sm:$0xff]  ;;  %v378_v44 = vld [vmem:[%s6129_s7 + $0x58] sm:$0xff]  ;;  %v657_v5 = vunpack.c.0.s8 %v656_v4 }
  0x92   :  { %4244 = vmatprep.subr.bf16.mxu1 %v4717_v1  ;;  %v629_v40 = vld [vmem:[%s6094_s9] sm:$0x3]  ;;  %v4257_v48 = vpack.c.bf16 %v378_v44, %v377_v43  ;;  %v380_v50 = vld [vmem:[%s6129_s7 + $0x68] sm:$0xff]  ;;  %v382_v54 = vld [vmem:[%s6129_s7 + $0x78] sm:$0xff] }
  0x93   :  { %v159_v2 = vld [vmem:[%s6128_s5] sm:$0x3]  ;;  %v5132_v46 = vrot.slane %v629_v40, %v5118_v41  ;;  %v384_v57 = vld [vmem:[%s6129_s7 + $0x88] sm:$0xff]  ;;  %v5176_v6 = vsub.s32 %v657_v5, %v5070_v11 }
  0x94   :  { %4236 = vmatpush1.bf16.msra.mxu0 %v4235_v27  ;;  %v4248_v27 = vpack.c.bf16 %v372_v25, %v371_v24  ;;  %v379_v49 = vld [vmem:[%s6129_s7 + $0x60] sm:$0xff]  ;;  %v185_v24 = vrot.slane %v5078_v13, %v5118_v41  ;;  %v702_v13 = vcombine.high %v5018_v38, %v5018_v38 }
  0x95   :  { %4238 = vmatprep.subr.bf16.mxu0 %v4237_v28  ;;  %4246 = vmatpush1.bf16.msra.mxu1 %v4245_v9  ;;  %v383_v56 = vld [vmem:[%s6129_s7 + $0x80] sm:$0xff]  ;;  %v661_v9 = vrot.slane %v5006_v34, %v5176_v6 }
  0x96   :  { %4247 = vmatprep.subr.bf16.mxu1 %v4717_v1  ;;  %v750_v62 = vld [vmem:[%s6131_s25] sm:$0xff] }
  0x98   :  { %4240 = vmatpush1.bf16.msra.mxu0 %v4239_v31  ;;  %v374_v31 = vld [vmem:[%s6129_s7 + $0x38] sm:$0xff] }
  0x99   :  { %4271 = vmatprep.subr.bf16.mxu0 %v4717_v1  ;;  %4249 = vmatpush1.bf16.msra.mxu1 %v4248_v27 }
  0x9a   :  { %4250 = vmatprep.subr.bf16.mxu1 %v4717_v1 }
  0x9b   :  { %3935 = vmatmul.mubr.msk.f32.vlgmr.msra.gmra.mrb[0].mxu0 %vm192_vm0, %v5006_v34  ;;  %v677_v34 = vrot.slane %v661_v9, %v5176_v6 }
  0x9c   :  { %4273 = vmatpush3.bf16.msra.mxu0 %v4272_v35  ;;  %269 = vmatprep.mubr.f32.mxu0 %v4716_v0  ;;  %v4251_v35 = vpack.c.bf16 %v374_v31, %v373_v30 }
  0x9d   :  { %4274 = vmatprep.subr.bf16.mxu0 %v4717_v1 }
  0x9e   :  { %4252 = vmatpush1.bf16.msra.mxu1 %v4251_v35 }
  0x9f   :  { %3936 = vmatmul.mubr.msk.f32.gmra.mrb[2].mxu0 %vm192_vm0, %v5018_v38  ;;  %4253 = vmatprep.subr.bf16.mxu1 %v4717_v1 }
  0xa0   :  { %4276 = vmatpush3.bf16.msra.mxu0 %v4275_v39  ;;  %4067 = vmatprep.mubr.msk.f32.mxu0 %vm4718_vm1, %v4716_v0  ;;  %v4254_v39 = vpack.c.bf16 %v376_v37, %v375_v36 }
  0xa1   :  { %4277 = vmatprep.subr.bf16.mxu0 %v4717_v1 }
  0xa2   :  { %4255 = vmatpush1.bf16.msra.mxu1 %v4254_v39 }
  0xa3   :  { %4256 = vmatprep.subr.bf16.mxu1 %v4717_v1 }
  0xa4   :  { %4279 = vmatpush3.bf16.msra.mxu0 %v4278_v42 }
  0xa5   :  { %4280 = vmatprep.subr.bf16.mxu0 %v4717_v1 }
  0xa6   :  { %4258 = vmatpush1.bf16.msra.mxu1 %v4257_v48 }
  0xa7   :  { %4259 = vmatprep.subr.bf16.mxu1 %v4717_v1 }
  0xa8   :  { %4282 = vmatpush3.bf16.msra.mxu0 %v4281_v45 }
  0xa9   :  { %4283 = vmatprep.subr.bf16.mxu0 %v4717_v1 }
  0xac   :  { %4285 = vmatpush3.bf16.msra.mxu0 %v4284_v52  ;;  %v4260_v52 = vpack.c.bf16 %v380_v50, %v379_v49 }
  0xad   :  { %4287 = vmatprep.subr.bf16.mxu0 %v4286_v53  ;;  %v381_v53 = vld [vmem:[%s6129_s7 + $0x70] sm:$0xff] }
  0xae   :  { %4261 = vmatpush1.bf16.msra.mxu1 %v4260_v52  ;;  %v4263_v55 = vpack.c.bf16 %v382_v54, %v381_v53 }
  0xaf   :  { %4068 = vmatmul.mubr.msk.f32.vlgmr.msra.gmra.mrb[4].mxu0 %vm192_vm0, %v474_v58  ;;  %4262 = vmatprep.subr.bf16.mxu1 %v4717_v1  ;;  %v4266_v58 = vpack.c.bf16 %v384_v57, %v383_v56 }
  0xb0   :  { %4289 = vmatpush1.bf16.msra.mxu0 %v4288_v59  ;;  %622 = vmatprep.mubr.f32.mxu0 %v4716_v0  ;;  %v385_v59 = vld [vmem:[%s6129_s7 + $0x90] sm:$0xff] }
  0xb1   :  { %4291 = vmatprep.subr.bf16.mxu0 %v4290_v60  ;;  %v386_v60 = vld [vmem:[%s6129_s7 + $0x98] sm:$0xff] }
  0xb2   :  { %4264 = vmatpush1.bf16.msra.mxu1 %v4263_v55  ;;  %v4269_v61 = vpack.c.bf16 %v386_v60, %v385_v59 }
  0xb3   :  { %4265 = vmatprep.subr.bf16.mxu1 %v4717_v1 }
  0xb4   :  { %4293 = vmatpush1.bf16.msra.mxu0 %v4292_v63  ;;  %v751_v63 = vld [vmem:[%s6131_s25 + $0x8] sm:$0xff] }
  0xb6   :  { %4267 = vmatpush1.bf16.msra.mxu1 %v4266_v58 }
  0xb7   :  { %3941 = vmatmul.mubr.msk.f32.vlgmr.msra.gmra.mrb[6].mxu0 %vm308_vm3, %v159_v2  ;;  %4268 = vmatprep.subr.bf16.mxu1 %v4717_v1  ;;  %v5172_v2 = vpack.c.bf16 %v751_v63, %v750_v62 }
  0xba   :  { %4270 = vmatpush1.bf16.msra.mxu1 %v4269_v61 }
  0xbb   :  { %4295 = vmatprep.subr.bf16.mxu1 %v5172_v2 }
 0x16e   :  { %v5082_v15 = vpop.f32.mrb[0].mxu0 }
 0x16f   :  { %v267_v16 = vpop.f32.mrb[1].mxu0  ;;  %v266_v35 = vadd.f32 %v5082_v15, %v185_v24 }
 0x170   :  { %v5084_v17 = vadd.f32 %v267_v16, %v189_v14 }
 0x172   :  { %v3937_v18 = vmul.f32 -1.442695, %v5084_v17  ;;  %v5087_v19 = vpop.f32.mrb[2].mxu0 }
 0x173   :  { %v273_v20 = vpop.f32.mrb[3].mxu0  ;;  %v272_v15 = vadd.f32 %v5087_v19, %v185_v24 }
 0x174   :  { %4461 = vpow2.f32 %v3937_v18  ;;  %v5089_v21 = vadd.f32 %v273_v20, %v189_v14  ;;  %v668_v20 = vrot.slane %v654_v8, %v5176_v6 }
 0x176   :  { %v3938_v22 = vmul.f32 -1.442695, %v5089_v21  ;;  %v670_v27 = vcombine.high %v668_v20, %v668_v20 }
 0x178   :  { %4463 = vpow2.f32 %v3938_v22  ;;  %v669_v22 = vcombine.high %v661_v9, %v661_v9  ;;  %v698_v43 = vrot.slane %v670_v27, %v5176_v6 }
 0x17a   :  { %v691_v30 = vrot.slane %v669_v22, %v5176_v6 }
 0x17c   :  { %v3942_v54 = vcombine.high %v677_v34, %v691_v30 }
 0x17e   :  { %v4462_v23 = vpop.eup %4461  ;;  %v777_v9 = vrot.slane %v3942_v54, %v5176_v6 }
 0x17f   :  { %v282_v26 = vadd.f32 1.0, %v4462_v23 }
 0x181   :  { %4465 = vrcp.f32 %v282_v26 }
 0x182   :  { %v4464_v28 = vpop.eup %4463  ;;  %v5098_v29 = vpop.f32.mrb[4].mxu0 }
 0x183   :  { %v283_v32 = vadd.f32 1.0, %v4464_v28  ;;  %v4069_v33 = vpop.f32.mrb[5].mxu0  ;;  %v684_v28 = vrot.slane %v668_v20, %v5176_v6 }
 0x185   :  { %4467 = vrcp.f32 %v283_v32  ;;  %v5200_v32 = vrot.slane %v5018_v38, %v5176_v6  ;;  %v700_v44 = vcombine.high %v684_v28, %v684_v28 }
 0x187   :  { %v5209_v39 = vrot.slane %v5200_v32, %v5176_v6 }
 0x189   :  { %v763_v60 = vcombine.low %v700_v44, %v5209_v39 }
 0x18a   :  { %v5120_v42 = vpop.f32.mrb[6].mxu0 }
 0x18b   :  { %v4466_v45 = vpop.eup %4465  ;;  %646 = vrot.lane.b32.xlu1 %v5120_v42, %s4720_s0  ;;  %v5134_v47 = vpop.f32.mrb[7].mxu0 }
 0x18c   :  { %290 = vperm.xlu0 %4456, %v4466_v45   ;;  %v760_v45 = vcombine.low %v677_v34, %v691_v30 }
 0x18e   :  { %v770_v61 = vrot.slane %v760_v45, %v5176_v6 }
 0x18f   :  { %v4468_v51 = vpop.eup %4467  ;;  %650 = vrot.lane.b32.xlu1 %v5132_v46, %s4720_s0 }
 0x190   :  { %295 = vperm.xlu0 %4456, %v4468_v51  }
 0x1fd   :  { %v5178_v7 = vpop.permute.xlu1 %646 }
 0x1fe   :  { %v649_v14 = vadd.f32 %v5178_v7, %v5098_v29 }
 0x201   :  { %v5186_v16 = vpop.permute.xlu1 %650 }
 0x202   :  { %v653_v18 = vadd.f32 %v5186_v16, %v649_v14 }
 0x204   :  { %v1047_v23 = vrot.slane %v653_v18, %v5176_v6 }
 0x206   :  { %v1048_v25 = vcombine.high %v1047_v23, %v1047_v23  ;;  %v1055_v26 = vrot.slane %v1047_v23, %v5176_v6 }
 0x208   :  { %v1066_v31 = vrot.slane %v1055_v26, %v5118_v41  ;;  %v1062_v33 = vrot.slane %v1048_v25, %v5176_v6  ;;  %v791_v25 = vrot.slane %v763_v60, %v5176_v6  ;;  %v717_v26 = vcombine.high %v5200_v32, %v5200_v32  ;;  %v753_v60 = vld [vmem:[%s6131_s25 + $0x18] sm:$0xff] }
 0x20a   :  { %v1078_v36 = vrot.slane %v1066_v31, %v5176_v6  ;;  %v1071_v37 = vcombine.high %v1066_v31, %v1066_v31  ;;  %v1070_v53 = vrot.slane %v1062_v33, %v5118_v41  ;;  %v4722_v33 = vmov 1983009808  }
 0x20b   :  { %v291_v40 = vpop.permute.xlu0 %290 }
 0x20c   :  { %v298_v48 = vmul.f32 %v291_v40, %v266_v35  ;;  %v299_v49 = vmul.f32 %v291_v40, %v5084_v17  ;;  %v1094_v50 = vrot.slane %v1078_v36, %v5176_v6  ;;  %v1086_v51 = vcombine.high %v1078_v36, %v1078_v36 }
 0x20d   :  { %v1085_v52 = vrot.slane %v1071_v37, %v5176_v6  ;;  %v762_v17 = vcombine.low %v684_v28, %v698_v43  ;;  %v1126_v8 = vrot.slane %v1070_v53, %v5176_v6  ;;  %v335_v35 = vunpack.c.l.s4 %v4722_v33 }
 0x20e   :  { %v302_v55 = vrot.slane %v298_v48, 4  ;;  %v309_v56 = vsel %vm308_vm3, %v299_v49, 0.0  ;;  %1167 = vrot.lane.b32.xlu0 %v1094_v50, %s4720_s0  ;;  %v1108_v57 = vrot.slane %v1086_v51, %v5176_v6  ;;  %v1116_v3 = vcombine.high %v1094_v50, %v1094_v50 }
 0x20f   :  { %v310_v58 = vrot.slane %v309_v56, 4  ;;  %v296_v59 = vpop.permute.xlu0 %295  ;;  %v1087_v5 = vcombine.high %v1085_v52, %v1085_v52  ;;  %v5234_v28 = vrot.slane %v1085_v52, %v5176_v6  ;;  %v792_v36 = vcombine.low %v770_v61, %v777_v9 }
 0x210   :  { %v303_v19 = vadd.f32 %v302_v55, %v298_v48  ;;  %v300_v62 = vmul.f32 %v296_v59, %v272_v15  ;;  %v301_v63 = vmul.f32 %v296_v59, %v5089_v21  ;;  %1169 = vrot.lane.b32.xlu1 %v1108_v57, %s4720_s0  ;;  %v1118_v22 = vcombine.high %v1108_v57, %v1108_v57 }
 0x211   :  { %v311_v4 = vadd.f32 %v310_v58, %v309_v56  ;;  %v784_v21 = vrot.slane %v762_v17, %v5176_v6  ;;  %v1115_v40 = vrot.slane %v1087_v5, %v5176_v6  ;;  %v1134_v43 = vcombine.high %v1126_v8, %v1126_v8  ;;  %v752_v17 = vld [vmem:[%s6131_s25 + $0x10] sm:$0xff] }
 0x212   :  { %v304_v14 = vrot.slane %v303_v19, 2  ;;  %v316_v18 = vrot.slane %v300_v62, 4  ;;  %v322_v20 = vsel %vm308_vm3, %v301_v63, 0.0  ;;  %1171 = vrot.lane.b32.xlu0 %v1116_v3, %s4720_s0  ;;  %v1119_v32 = vcombine.high %v1070_v53, %v1070_v53 }
 0x213   :  { %v312_v23 = vrot.slane %v311_v4, 2  ;;  %v323_v24 = vrot.slane %v322_v20, 4  ;;  %v793_v49 = vcombine.low %v784_v21, %v791_v25  ;;  %v716_v50 = vrot.slane %v702_v13, %v5176_v6  ;;  %v754_v25 = vld [vmem:[%s6131_s25 + $0x20] sm:$0xff] }
 0x214   :  { %v305_v27 = vadd.f32 %v304_v14, %v303_v19  ;;  %v317_v34 = vadd.f32 %v316_v18, %v300_v62  ;;  %1173 = vrot.lane.b32.xlu1 %v1118_v22, %s4720_s0  ;;  %v1142_v15 = vrot.slane %v1126_v8, %v5176_v6  ;;  %v739_v52 = vrot.slane %v717_v26, %v5176_v6 }
 0x215   :  { %v313_v30 = vadd.f32 %v312_v23, %v311_v4  ;;  %v324_v31 = vadd.f32 %v323_v24, %v322_v20  ;;  %v336_v55 = vunpack.c.0.s8 %v335_v35  ;;  %v1156_v53 = vrot.slane %v1134_v43, %v5176_v6 }
 0x216   :  { %v318_v37 = vrot.slane %v317_v34, 2  ;;  %1175 = vrot.lane.b32.xlu0 %v5234_v28, %s4720_s0  ;;  %v306_v44 = vrot.slane %v305_v27, 1  ;;  %v1133_v57 = vrot.slane %v1119_v32, %v5176_v6  ;;  %v800_v58 = vrot.slane %v792_v36, %v5176_v6 }
 0x217   :  { %v325_v45 = vrot.slane %v324_v31, 2  ;;  %v314_v48 = vrot.slane %v313_v30, 1  ;;  %v807_v61 = vrot.slane %v793_v49, %v5176_v6  ;;  %v718_v19 = vcombine.high %v716_v50, %v716_v50 }
 0x218   :  { %v319_v51 = vadd.f32 %v318_v37, %v317_v34  ;;  %1177 = vrot.lane.b32.xlu1 %v1115_v40, %s4720_s0  ;;  %v307_v59 = vadd.f32 %v306_v44, %v305_v27  ;;  %v732_v62 = vrot.slane %v716_v50, %v5176_v6  ;;  %v1164_v63 = vcombine.high %v1142_v15, %v1142_v15  ;;  %v757_v44 = vld [vmem:[%s6131_s25 + $0x38] sm:$0xff] }
 0x219   :  { %v326_v54 = vadd.f32 %v325_v45, %v324_v31  ;;  %v315_v38 = vadd.f32 %v314_v48, %v313_v30  ;;  %v747_v4 = vcombine.high %v5209_v39, %v5209_v39  ;;  %v749_v5 = vcombine.high %v739_v52, %v739_v52  ;;  %v755_v39 = vld [vmem:[%s6131_s25 + $0x28] sm:$0xff] }
 0x21a   :  { %v320_v56 = vrot.slane %v319_v51, 1  ;;  %1181 = vrot.lane.b32.xlu0 %v1142_v15, %s4720_s0  ;;  %v339_v9 = vsub.s32 %v336_v55, %v5070_v11  ;;  %v1166_v14 = vcombine.high %v1156_v53, %v1156_v53  ;;  %v1135_v20 = vcombine.high %v1133_v57, %v1133_v57  ;;  %v759_v55 = vld [vmem:[%s6131_s25 + $0x48] sm:$0xff] }
 0x21b   :  { %v327_v13 = vrot.slane %v326_v54, 1  ;;  %v4298_v22 = vpack.c.bf16 %v753_v60, %v752_v17  ;;  %v333_v24 = vcombine.low %v307_v59, %v315_v38  ;;  %v808_v26 = vcombine.low %v800_v58, %v807_v61  ;;  %v1536_v17 = vld [vmem:[%s6095_s10] sm:$0xff]  ;;  %v1537_v60 = vld [vmem:[%s6095_s10 + $0x8] sm:$0xff]  ;;  %v1538_v61 = vld [vmem:[%s6095_s10 + $0x10] sm:$0xff] }
 0x21c   :  { %1183 = vrot.lane.b32.xlu1 %v1156_v53, %s4720_s0  ;;  %v321_v3 = vadd.f32 %v320_v56, %v319_v51  ;;  %v746_v27 = vrot.slane %v718_v19, %v5176_v6  ;;  %v748_v34 = vcombine.high %v732_v62, %v732_v62  ;;  %v1149_v30 = vrot.slane %v1133_v57, %v5176_v6 }
 0x21d   :  { %v328_v8 = vadd.f32 %v327_v13, %v326_v54  ;;  %v809_v31 = vcombine.low %v739_v52, %v747_v4  ;;  %v810_v33 = vcombine.low %v749_v5, %v732_v62  ;;  %v1163_v36 = vrot.slane %v1135_v20, %v5176_v6  ;;  %v758_v54 = vld [vmem:[%s6131_s25 + $0x40] sm:$0xff]  ;;  %v1539_v62 = vld [vmem:[%s6095_s10 + $0x18] sm:$0xff] }
 0x21e   :  { %1185 = vrot.lane.b32.xlu0 %v1164_v63, %s4720_s0  ;;  %v387_v18 = vsel %vm354_vm2, %v321_v3, %v307_v59  ;;  %v4302_v37 = vpack.c.bf16 %v755_v39, %v754_v25  ;;  %v340_v40 = vrot.slane %v333_v24, %v339_v9  ;;  %v1117_v32 = vcombine.high %v5234_v28, %v5234_v28 }
 0x21f   :  { %v388_v23 = vsel %vm354_vm2, %v328_v8, %v315_v38  ;;  %v341_v21 = vcombine.low %v321_v3, %v328_v8  ;;  %v811_v45 = vcombine.low %v746_v27, %v748_v34  ;;  %v818_v48 = vrot.slane %v809_v31, %v5176_v6 }
 0x220   :  { %1187 = vrot.lane.b32.xlu1 %v1166_v14, %s4720_s0  ;;  %3939 = vmatprep.mubr.msk.f32.mxu1 %vm308_vm3, %v388_v23  ;;  %v825_v49 = vrot.slane %v810_v33, %v5176_v6  ;;  %v1165_v28 = vcombine.high %v1149_v30, %v1149_v30  ;;  %v4310_v58 = vpack.c.bf16 %v759_v55, %v758_v54 }
 0x221   :  { %v348_v35 = vrot.slane %v341_v21, %v339_v9  ;;  %457 = vmatmul.mubr.f32.vlgmr.msra.gmra.mrb[0].mxu1 %v387_v18  ;;  %v832_v53 = vrot.slane %v811_v45, %v5176_v6  ;;  %v4314_v19 = vpack.c.bf16 %v1537_v60, %v1536_v17  ;;  %v4318_v63 = vpack.c.bf16 %v1539_v62, %v1538_v61 }
 0x222   :  { %4297 = vmatpush3.bf16.msra.mxu1 %v5172_v2  ;;  %1189 = vrot.lane.b32.xlu0 %v1149_v30, %s4720_s0  ;;  %v756_v2 = vld [vmem:[%s6131_s25 + $0x30] sm:$0xff]  ;;  %v833_v57 = vcombine.low %v818_v48, %v825_v49  ;;  %s4724_s25 = smov 80  }
 0x223   :  { %v353_v43 = vrot.slane %v348_v35, 7  ;;  %4299 = vmatprep.subr.bf16.mxu1 %v4298_v22  ;;  %4090 = vmatprep.mubr.msk.f32.mxu1 %vm192_vm0, %v808_v26  ;;  %v4306_v15 = vpack.c.bf16 %v757_v44, %v756_v2  ;;  %v847_v13 = vrot.slane %v832_v53, %v5176_v6 }
 0x224   :  { %1191 = vrot.lane.b32.xlu1 %v1163_v36, %s4720_s0  ;;  %v840_v38 = vrot.slane %v833_v57, %v5176_v6  ;;  %4315 = vmatprep.subr.bf16.mxu0 %v4314_v19 }
 0x225   :  { %v355_v50 = vsel %vm354_vm2, %v353_v43, %v340_v40  ;;  %4317 = vmatpush3.bf16.msra.mxu0 %v4314_v19 }
 0x226   :  { %4301 = vmatpush3.bf16.msra.mxu1 %v4298_v22  ;;  %1179 = vrot.lane.b32.xlu0 %v1117_v32, %s4720_s0  ;;  %v357_v51 = vsel %vm356_vm4, %v353_v43, %v355_v50  ;;  %v848_v59 = vcombine.low %v840_v38, %v847_v13 }
 0x227   :  { %4303 = vmatprep.subr.bf16.mxu1 %v4302_v37  ;;  %v359_v52 = vsel %vm358_vm7, %v353_v43, %v357_v51  ;;  %4319 = vmatprep.subr.bf16.mxu0 %v4318_v63 }
 0x228   :  { %1193 = vrot.lane.b32.xlu1 %v1165_v28, %s4720_s0  ;;  %v361_v56 = vsel %vm360_vm8, %v353_v43, %v359_v52 }
 0x229   :  { %366 = vst.msk [vmem:[#allocation13] sm:$0xf] %vm365_vm9, %v361_v56  ;;  %4321 = vmatpush3.bf16.msra.mxu0 %v4318_v63 }
 0x22a   :  { %4305 = vmatpush3.bf16.msra.mxu1 %v4302_v37  ;;  %639 = vrot.lane.b32.xlu0 %v5098_v29, %s4723_s2 }
 0x22b   :  { %4307 = vmatprep.subr.bf16.mxu1 %v4306_v15 }
 0x22e   :  { %4309 = vmatpush3.bf16.msra.mxu1 %v4306_v15 }
 0x22f   :  { %4311 = vmatprep.subr.bf16.mxu1 %v4310_v58 }
 0x232   :  { %4313 = vmatpush3.bf16.msra.mxu1 %v4310_v58 }
 0x235   :  { %4091 = vmatmul.mubr.msk.f32.vlgmr.msra.gmra.mrb[2].mxu1 %vm192_vm0, %v848_v59 }
 0x280   :  { %v5319_v3 = vpop.permute.xlu0 %1167 }
 0x282   :  { %v5327_v18 = vpop.permute.xlu1 %1169 }
 0x284   :  { %v5321_v4 = vpop.permute.xlu0 %1171 }
 0x286   :  { %v5331_v22 = vpop.permute.xlu1 %1173 }
 0x288   :  { %v5323_v5 = vpop.permute.xlu0 %1175 }
 0x28a   :  { %v1178_v34 = vpop.permute.xlu1 %1177 }
 0x28c   :  { %v5325_v8 = vpop.permute.xlu0 %1181 }
 0x28e   :  { %v1184_v32 = vpop.permute.xlu1 %1183 }
 0x290   :  { %v1186_v9 = vpop.permute.xlu0 %1185 }
 0x292   :  { %v1188_v50 = vpop.permute.xlu1 %1187 }
 0x294   :  { %v1190_v14 = vpop.permute.xlu0 %1189 }
 0x296   :  { %v1192_v54 = vpop.permute.xlu1 %1191 }
 0x298   :  { %v5329_v20 = vpop.permute.xlu0 %1179 }
 0x29c   :  { %v640_v23 = vpop.permute.xlu0 %639 }
 0x2f4   :  { %v458_v24 = vpop.f32.mrb[0].mxu1 }
 0x2f5   :  { %v630_v21 = vadd.f32 %v5120_v42, %v458_v24  ;;  %v642_v25 = vadd.f32 %v640_v23, %v458_v24  ;;  %v460_v39 = vpop.f32.mrb[1].mxu1 }
 0x2f7   :  { %v637_v26 = vadd.f32 %v5132_v46, %v630_v21  ;;  %v643_v27 = vadd.f32 %v642_v25, %v5120_v42 }
 0x2f9   :  { %v644_v30 = vadd.f32 %v643_v27, %v5132_v46  ;;  %v1230_v31 = vrot.slane %v637_v26, %v5176_v6  ;;  %v1194_v26 = vpop.permute.xlu1 %1193 }
 0x2fb   :  { %v1231_v33 = vcombine.high %v1230_v31, %v1230_v31  ;;  %v1238_v35 = vrot.slane %v1230_v31, %v5176_v6  ;;  %v1263_v36 = vrot.slane %v644_v30, %v5176_v6 }
 0x2fd   :  { %v1245_v37 = vrot.slane %v1231_v33, %v5176_v6  ;;  %v1264_v40 = vcombine.high %v1263_v36, %v1263_v36  ;;  %v1271_v43 = vrot.slane %v1263_v36, %v5176_v6  ;;  %v1249_v2 = vrot.slane %v1238_v35, %v5118_v41 }
 0x2ff   :  { %v1282_v42 = vrot.slane %v1271_v43, %v5118_v41  ;;  %v1278_v46 = vrot.slane %v1264_v40, %v5176_v6  ;;  %v1253_v45 = vrot.slane %v1245_v37, %v5118_v41 }
 0x301   :  { %v5346_v44 = vsel %vm1405_vm10, %v1249_v2, %v1282_v42  ;;  %v1286_v48 = vrot.slane %v1278_v46, %v5118_v41 }
 0x303   :  { %v5351_v49 = vsel %vm1405_vm10, %v1253_v45, %v1286_v48 }
 0x308   :  { %v4092_v28 = vpop.f32.mrb[2].mxu1 }
 0x309   :  { %v979_v51 = vcombine.high %v4092_v28, %v4092_v28  ;;  %v986_v15 = vrot.slane %v4092_v28, %v5176_v6  ;;  %v919_v52 = vpop.f32.mrb[3].mxu1 }
 0x30a   :  { %v930_v55 = vcombine.high %v919_v52, %v919_v52  ;;  %v937_v56 = vrot.slane %v919_v52, %v5176_v6 }
 0x30b   :  { %v993_v53 = vrot.slane %v979_v51, %v5176_v6  ;;  %v994_v57 = vcombine.high %v986_v15, %v986_v15  ;;  %v1002_v58 = vrot.slane %v986_v15, %v5176_v6 }
 0x30c   :  { %v944_v38 = vrot.slane %v930_v55, %v5176_v6  ;;  %v945_v13 = vcombine.high %v937_v56, %v937_v56  ;;  %v953_v59 = vrot.slane %v937_v56, %v5176_v6 }
 0x30d   :  { %v995_v17 = vcombine.high %v993_v53, %v993_v53  ;;  %v1009_v60 = vrot.slane %v993_v53, %v5176_v6  ;;  %v1016_v61 = vrot.slane %v994_v57, %v5176_v6  ;;  %v1024_v19 = vcombine.high %v1002_v58, %v1002_v58 }
 0x30e   :  { %v946_v62 = vcombine.high %v944_v38, %v944_v38  ;;  %v960_v63 = vrot.slane %v944_v38, %v5176_v6  ;;  %v967_v23 = vrot.slane %v945_v13, %v5176_v6  ;;  %v1217_v25 = vadd.f32 %v1184_v32, %v1002_v58 }
 0x30f   :  { %v1023_v24 = vrot.slane %v995_v17, %v5176_v6  ;;  %v1025_v21 = vcombine.high %v1016_v61, %v1016_v61  ;;  %v1218_v39 = vadd.f32 %v1186_v9, %v1016_v61  ;;  %v1219_v27 = vadd.f32 %v1188_v50, %v1024_v19  ;;  %v1541_v50 = vld [vmem:[%s6095_s10 + $0x28] sm:$0xff] }
 0x310   :  { %v974_v30 = vrot.slane %v946_v62, %v5176_v6  ;;  %v975_v31 = vcombine.high %v953_v59, %v953_v59  ;;  %v976_v33 = vcombine.high %v960_v63, %v960_v63  ;;  %v1221_v36 = vadd.f32 %v1192_v54, %v1009_v60  ;;  %v1544_v62 = vld [vmem:[%s6095_s10 + $0x40] sm:$0xff] }
 0x311   :  { %v1220_v35 = vadd.f32 %v1190_v14, %v1025_v21  ;;  %v1222_v37 = vadd.f32 %v1194_v26, %v1023_v24  ;;  %v977_v40 = vcombine.high %v967_v23, %v967_v23  ;;  %v1209_v2 = vadd.f32 %v5319_v3, %v953_v59  ;;  %v1540_v14 = vld [vmem:[%s6095_s10 + $0x20] sm:$0xff]  ;;  %v1546_v26 = vld [vmem:[%s6095_s10 + $0x50] sm:$0xff] }
 0x312   :  { %v978_v43 = vcombine.high %v974_v30, %v974_v30  ;;  %v1210_v42 = vadd.f32 %v5327_v18, %v967_v23  ;;  %v1211_v46 = vadd.f32 %v5321_v4, %v975_v31  ;;  %v1213_v32 = vadd.f32 %v5323_v5, %v960_v63  ;;  %v1545_v63 = vld [vmem:[%s6095_s10 + $0x48] sm:$0xff]  ;;  %v1548_v31 = vld [vmem:[%s6095_s10 + $0x60] sm:$0xff] }
 0x313   :  { %v1353_v45 = vcombine.low %v1220_v35, %v1221_v36  ;;  %v1212_v9 = vadd.f32 %v5331_v22, %v977_v40  ;;  %v1214_v48 = vadd.f32 %v1178_v34, %v974_v30  ;;  %v1352_v28 = vcombine.low %v1218_v39, %v1219_v27  ;;  %v1547_v27 = vld [vmem:[%s6095_s10 + $0x58] sm:$0xff]  ;;  %v1550_v36 = vld [vmem:[%s6095_s10 + $0x70] sm:$0xff] }
 0x314   :  { %v1215_v3 = vadd.f32 %v5329_v20, %v976_v33  ;;  %v1216_v18 = vadd.f32 %v5325_v8, %v978_v43  ;;  %v1303_v4 = vcombine.low %v1209_v2, %v1210_v42  ;;  %v1381_v34 = vrot.slane %v1222_v37, %v5176_v6  ;;  %v1542_v8 = vld [vmem:[%s6095_s10 + $0x30] sm:$0xff]  ;;  %v1543_v20 = vld [vmem:[%s6095_s10 + $0x38] sm:$0xff]  ;;  %v1549_v33 = vld [vmem:[%s6095_s10 + $0x68] sm:$0xff] }
 0x315   :  { %v1304_v51 = vcombine.low %v1211_v46, %v1212_v9  ;;  %v1305_v15 = vcombine.low %v1213_v32, %v1214_v48  ;;  %v1374_v22 = vrot.slane %v1353_v45, %v5176_v6  ;;  %v4322_v52 = vpack.c.bf16 %v1541_v50, %v1540_v14  ;;  %v1743_v37 = vld [vmem:[#allocation7] sm:$0xff]  ;;  %v1744_v40 = vld [vmem:[#allocation7 + $0x8] sm:$0xff]  ;;  %v1745_v43 = vld [vmem:[#allocation7 + $0x10] sm:$0xff] }
 0x316   :  { %v1351_v5 = vcombine.low %v1216_v18, %v1217_v25  ;;  %v1312_v54 = vrot.slane %v1303_v4, %v5176_v6  ;;  %v1333_v53 = vrot.slane %v1215_v3, %v5176_v6  ;;  %v1367_v58 = vrot.slane %v1352_v28, %v5176_v6  ;;  %v1746_v42 = vld [vmem:[#allocation7 + $0x18] sm:$0xff]  ;;  %v1747_v45 = vld [vmem:[#allocation7 + $0x20] sm:$0xff]  ;;  %v1748_v9 = vld [vmem:[#allocation7 + $0x28] sm:$0xff] }
 0x317   :  { %v1319_v55 = vrot.slane %v1304_v51, %v5176_v6  ;;  %v1326_v56 = vrot.slane %v1305_v15, %v5176_v6  ;;  %v1383_v38 = vcombine.low %v1374_v22, %v1381_v34  ;;  %4323 = vmatprep.subr.bf16.mxu0 %v4322_v52  ;;  %v4326_v13 = vpack.c.bf16 %v1543_v20, %v1542_v8  ;;  %v1749_v48 = vld [vmem:[#allocation7 + $0x30] sm:$0xff]  ;;  %v1750_v14 = vld [vmem:[#allocation7 + $0x38] sm:$0xff]  ;;  %v1751_v28 = vld [vmem:[#allocation7 + $0x40] sm:$0xff] }
 0x318   :  { %v1360_v57 = vrot.slane %v1351_v5, %v5176_v6  ;;  %4325 = vmatpush3.bf16.msra.mxu0 %v4322_v52  ;;  %v4330_v21 = vpack.c.bf16 %v1545_v63, %v1544_v62  ;;  %v4334_v30 = vpack.c.bf16 %v1547_v27, %v1546_v26  ;;  %v4338_v35 = vpack.c.bf16 %v1549_v33, %v1548_v31  ;;  %v1752_v3 = vld [vmem:[#allocation7 + $0x48] sm:$0xff]  ;;  %v1753_v4 = vld [vmem:[#allocation7 + $0x50] sm:$0xff]  ;;  %v1754_v51 = vld [vmem:[#allocation7 + $0x58] sm:$0xff] }
 0x319   :  { %v1334_v59 = vcombine.low %v1312_v54, %v1319_v55  ;;  %v1335_v17 = vcombine.low %v1326_v56, %v1333_v53  ;;  %4327 = vmatprep.subr.bf16.mxu0 %v4326_v13  ;;  %v1397_v24 = vrot.slane %v1383_v38, %v5176_v6  ;;  %v4342_v2 = vpack.c.bf16 %v1744_v40, %v1743_v37 }
 0x31a   :  { %v1382_v60 = vcombine.low %v1360_v57, %v1367_v58  ;;  %v4346_v46 = vpack.c.bf16 %v1746_v42, %v1745_v43  ;;  %v4350_v32 = vpack.c.bf16 %v1748_v9, %v1747_v45  ;;  %v4354_v50 = vpack.c.bf16 %v1750_v14, %v1749_v48 }
 0x31b   :  { %v1342_v61 = vrot.slane %v1334_v59, %v5176_v6  ;;  %v1349_v19 = vrot.slane %v1335_v17, %v5176_v6  ;;  %4343 = vmatprep.subr.bf16.mxu1 %v4342_v2  ;;  %v4358_v18 = vpack.c.bf16 %v1752_v3, %v1751_v28  ;;  %v4362_v15 = vpack.c.bf16 %v1754_v51, %v1753_v4 }
 0x31c   :  { %v1390_v23 = vrot.slane %v1382_v60, %v5176_v6  ;;  %4329 = vmatpush3.bf16.msra.mxu0 %v4326_v13  ;;  %4345 = vmatpush3.bf16.msra.mxu1 %v4342_v2 }
 0x31d   :  { %v1350_v25 = vcombine.low %v1342_v61, %v1349_v19  ;;  %4331 = vmatprep.subr.bf16.mxu0 %v4330_v21  ;;  %4347 = vmatprep.subr.bf16.mxu1 %v4346_v46 }
 0x31e   :  { %v1398_v39 = vcombine.low %v1390_v23, %v1397_v24 }
 0x31f   :  { %1399 = vrot.lane.b32.xlu1 %v1350_v25, %s4724_s25 }
 0x320   :  { %1401 = vrot.lane.b32.xlu0 %v1398_v39, %s4724_s25  ;;  %4333 = vmatpush3.bf16.msra.mxu0 %v4330_v21 }
 0x321   :  { %4335 = vmatprep.subr.bf16.mxu0 %v4334_v30  ;;  %4349 = vmatpush3.bf16.msra.mxu1 %v4346_v46 }
 0x322   :  { %4351 = vmatprep.subr.bf16.mxu1 %v4350_v32 }
 0x324   :  { %4337 = vmatpush3.bf16.msra.mxu0 %v4334_v30 }
 0x325   :  { %4339 = vmatprep.subr.bf16.mxu0 %v4338_v35  ;;  %4353 = vmatpush3.bf16.msra.mxu1 %v4350_v32 }
 0x326   :  { %4355 = vmatprep.subr.bf16.mxu1 %v4354_v50 }
 0x328   :  { %4341 = vmatpush3.bf16.msra.mxu0 %v4338_v35 }
 0x329   :  { %4121 = vmatprep.subr.mxu0 %v1550_v36  ;;  %4357 = vmatpush3.bf16.msra.mxu1 %v4354_v50 }
 0x32a   :  { %4359 = vmatprep.subr.bf16.mxu1 %v4358_v18 }
 0x32c   :  { %4122 = vmatpush3.msra.mxu0 %v1550_v36 }
 0x32d   :  { %4361 = vmatpush3.bf16.msra.mxu1 %v4358_v18 }
 0x32e   :  { %4363 = vmatprep.subr.bf16.mxu1 %v4362_v15 }
 0x331   :  { %4365 = vmatpush3.bf16.msra.mxu1 %v4362_v15 }
 0x391   :  { %v1400_v22 = vpop.permute.xlu1 %1399 }
 0x392   :  { %v1408_v5 = vsel %vm192_vm0, %v5346_v44, %v1400_v22  ;;  %v1402_v34 = vpop.permute.xlu0 %1401 }
 0x393   :  { %v1412_v52 = vcombine.high %v1408_v5, %v1408_v5  ;;  %v1419_v54 = vrot.slane %v1408_v5, %v5176_v6  ;;  %v1409_v55 = vsel %vm192_vm0, %v5351_v49, %v1402_v34 }
 0x394   :  { %v1460_v56 = vcombine.high %v1409_v55, %v1409_v55  ;;  %v1467_v53 = vrot.slane %v1409_v55, %v5176_v6 }
 0x395   :  { %v1426_v8 = vrot.slane %v1412_v52, %v5176_v6  ;;  %v1427_v20 = vcombine.high %v1419_v54, %v1419_v54  ;;  %v1435_v57 = vrot.slane %v1419_v54, %v5176_v6 }
 0x396   :  { %v1474_v58 = vrot.slane %v1460_v56, %v5176_v6  ;;  %v1475_v38 = vcombine.high %v1467_v53, %v1467_v53  ;;  %v1483_v44 = vrot.slane %v1467_v53, %v5176_v6 }
 0x397   :  { %v1428_v13 = vcombine.high %v1426_v8, %v1426_v8  ;;  %v1442_v59 = vrot.slane %v1426_v8, %v5176_v6  ;;  %v1449_v17 = vrot.slane %v1427_v20, %v5176_v6  ;;  %v1457_v60 = vcombine.high %v1435_v57, %v1435_v57 }
 0x398   :  { %v1522_v49 = vmax.f32 %v1435_v57, 0.0  ;;  %v1476_v61 = vcombine.high %v1474_v58, %v1474_v58  ;;  %v1490_v19 = vrot.slane %v1474_v58, %v5176_v6  ;;  %v1497_v62 = vrot.slane %v1475_v38, %v5176_v6  ;;  %v1755_v38 = vld [vmem:[#allocation7 + $0x60] sm:$0xff] }
 0x399   :  { %v1456_v63 = vrot.slane %v1428_v13, %v5176_v6  ;;  %v1458_v23 = vcombine.high %v1442_v59, %v1442_v59  ;;  %v1459_v24 = vcombine.high %v1449_v17, %v1449_v17  ;;  %v1523_v21 = vmax.f32 %v1449_v17, 0.0  ;;  %v1849_v17 = vld [vmem:[%s6099_s14 + $0x8] sm:$0xff] }
 0x39a   :  { %v1524_v25 = vmax.f32 %v1457_v60, 0.0  ;;  %v1526_v39 = vmax.f32 %v1442_v59, 0.0  ;;  %v1504_v26 = vrot.slane %v1476_v61, %v5176_v6  ;;  %v1505_v27 = vcombine.high %v1483_v44, %v1483_v44  ;;  %v1757_v59 = vld [vmem:[#allocation7 + $0x70] sm:$0xff]  ;;  %v1851_v60 = vld [vmem:[%s6099_s14 + $0x18] sm:$0xff] }
 0x39b   :  { %v1525_v30 = vmax.f32 %v1459_v24, 0.0  ;;  %v1527_v31 = vmax.f32 %v1456_v63, 0.0  ;;  %v1528_v33 = vmax.f32 %v1458_v23, 0.0  ;;  %v1572_v35 = vcombine.low %v1522_v49, %v1523_v21  ;;  %v1848_v49 = vld [vmem:[%s6099_s14] sm:$0xff]  ;;  %v1855_v63 = vld [vmem:[%s6099_s14 + $0x38] sm:$0xff] }
 0x39c   :  { %v1506_v36 = vcombine.high %v1490_v19, %v1490_v19  ;;  %v1507_v37 = vcombine.high %v1497_v62, %v1497_v62  ;;  %v1529_v40 = vmax.f32 %v1483_v44, 0.0  ;;  %v1530_v43 = vmax.f32 %v1497_v62, 0.0  ;;  %v1756_v44 = vld [vmem:[#allocation7 + $0x68] sm:$0xff]  ;;  %v1853_v62 = vld [vmem:[%s6099_s14 + $0x28] sm:$0xff]  ;;  %v1852_v21 = vld [vmem:[%s6099_s14 + $0x20] sm:$0xff] }
 0x39d   :  { %v1573_v2 = vcombine.low %v1524_v25, %v1525_v30  ;;  %v1574_v42 = vcombine.low %v1526_v39, %v1527_v31  ;;  %v1582_v46 = vrot.slane %v1572_v35, %v5176_v6  ;;  %v1531_v45 = vmax.f32 %v1505_v27, 0.0  ;;  %v1854_v25 = vld [vmem:[%s6099_s14 + $0x30] sm:$0xff]  ;;  %v1857_v39 = vld [vmem:[%s6099_s14 + $0x48] sm:$0xff]  ;;  %v1856_v31 = vld [vmem:[%s6099_s14 + $0x40] sm:$0xff] }
 0x39e   :  { %v1532_v9 = vmax.f32 %v1507_v37, 0.0  ;;  %v1533_v32 = vmax.f32 %v1490_v19, 0.0  ;;  %v1534_v48 = vmax.f32 %v1504_v26, 0.0  ;;  %v1535_v14 = vmax.f32 %v1506_v36, 0.0  ;;  %v1850_v19 = vld [vmem:[%s6099_s14 + $0x10] sm:$0xff]  ;;  %v1859_v26 = vld [vmem:[%s6099_s14 + $0x58] sm:$0xff] }
 0x39f   :  { %v1589_v50 = vrot.slane %v1573_v2, %v5176_v6  ;;  %v1596_v28 = vrot.slane %v1574_v42, %v5176_v6  ;;  %v1575_v3 = vcombine.low %v1528_v33, %v1529_v40  ;;  %v1621_v18 = vcombine.low %v1530_v43, %v1531_v45  ;;  %v1858_v33 = vld [vmem:[%s6099_s14 + $0x50] sm:$0xff]  ;;  %v1861_v35 = vld [vmem:[%s6099_s14 + $0x68] sm:$0xff]  ;;  %v1863_v36 = vld [vmem:[%s6099_s14 + $0x78] sm:$0xff] }
 0x3a0   :  { %v1622_v4 = vcombine.low %v1532_v9, %v1533_v32  ;;  %v1623_v51 = vcombine.low %v1534_v48, %v1535_v14  ;;  %v4366_v13 = vpack.c.bf16 %v1756_v44, %v1755_v38  ;;  %v4370_v61 = vpack.c.bf16 %v1851_v60, %v1849_v17  ;;  %v1860_v43 = vld [vmem:[%s6099_s14 + $0x60] sm:$0xff]  ;;  %v1862_v2 = vld [vmem:[%s6099_s14 + $0x70] sm:$0xff]  ;;  %v1865_v42 = vld [vmem:[%s6099_s14 + $0x88] sm:$0xff] }
 0x3a1   :  { %v1603_v15 = vrot.slane %v1575_v3, %v5176_v6  ;;  %v1604_v22 = vcombine.low %v1582_v46, %v1589_v50  ;;  %v1630_v5 = vrot.slane %v1621_v18, %v5176_v6  ;;  %v4372_v23 = vpack.c.bf16 %v1850_v19, %v1848_v49  ;;  %v1867_v46 = vld [vmem:[%s6099_s14 + $0x98] sm:$0xff]  ;;  %v1864_v32 = vld [vmem:[%s6099_s14 + $0x80] sm:$0xff]  ;;  %v1866_v48 = vld [vmem:[%s6099_s14 + $0x90] sm:$0xff] }
 0x3a2   :  { %v1637_v34 = vrot.slane %v1622_v4, %v5176_v6  ;;  %v1644_v52 = vrot.slane %v1623_v51, %v5176_v6  ;;  %4367 = vmatprep.subr.bf16.mxu1 %v4366_v13  ;;  %v4374_v24 = vpack.c.bf16 %v1855_v63, %v1853_v62  ;;  %4371 = vmatprep.subr.bf16.mxu0 %v4370_v61  ;;  %v1869_v14 = vld [vmem:[%s6099_s14 + $0xa8] sm:$0xff]  ;;  %v1871_v50 = vld [vmem:[%s6099_s14 + $0xb8] sm:$0xff]  ;;  %v1868_v18 = vld [vmem:[%s6099_s14 + $0xa0] sm:$0xff]  ;;  %v4725_v62 = vmov 0  }
 0x3a3   :  { %v1605_v54 = vcombine.low %v1596_v28, %v1603_v15  ;;  %v1612_v55 = vrot.slane %v1604_v22, %v5176_v6  ;;  %4369 = vmatpush3.bf16.msra.mxu1 %v4366_v13  ;;  %v4376_v27 = vpack.c.bf16 %v1854_v25, %v1852_v21  ;;  %v4378_v30 = vpack.c.bf16 %v1859_v26, %v1857_v39  ;;  %v1870_v4 = vld [vmem:[%s6099_s14 + $0xb0] sm:$0xff]  ;;  %v3945_v15 = vld [vmem:[%s6096_s11] ss:$0 sm:$0xff]  ;;  %v1877_v38 = vld [vmem:[%s6099_s14 + $0xe8] sm:$0xff] }
 0x3a4   :  { %v1645_v56 = vcombine.low %v1630_v5, %v1637_v34  ;;  %v1659_v20 = vrot.slane %v1644_v52, %v5176_v6  ;;  %4154 = vmatprep.subr.mxu1 %v1757_v59  ;;  %v4380_v37 = vpack.c.bf16 %v1858_v33, %v1856_v31  ;;  %v4382_v40 = vpack.c.bf16 %v1863_v36, %v1861_v35  ;;  %v1876_v44 = vld [vmem:[%s6099_s14 + $0xe0] sm:$0xff] }
 0x3a5   :  { %v1619_v53 = vrot.slane %v1605_v54, %v5176_v6  ;;  %v4384_v45 = vpack.c.bf16 %v1862_v2, %v1860_v43  ;;  %v4386_v9 = vpack.c.bf16 %v1867_v46, %v1865_v42  ;;  %v4388_v28 = vpack.c.bf16 %v1866_v48, %v1864_v32  ;;  %v3948_v13 = vld [vmem:[%s6098_s13] ss:$0 sm:$0xff]  ;;  %4457 = vset.pattern.permute.xlu1 %v4725_v62 }
 0x3a6   :  { %v1652_v8 = vrot.slane %v1645_v56, %v5176_v6  ;;  %v4390_v3 = vpack.c.bf16 %v1871_v50, %v1869_v14  ;;  %v4392_v51 = vpack.c.bf16 %v1870_v4, %v1868_v18  ;;  %v1873_v56 = vld [vmem:[%s6099_s14 + $0xc8] sm:$0xff]  ;;  %4458 = vset.pattern.permute.xlu0 %v4725_v62  ;;  %v1878_v63 = vld [vmem:[%s6100_s15] sm:$0x3] }
 0x3a7   :  { %v1620_v57 = vcombine.low %v1612_v55, %v1619_v53  ;;  %4155 = vmatpush3.msra.mxu1 %v1757_v59  ;;  %v1875_v53 = vld [vmem:[%s6099_s14 + $0xd8] sm:$0xff] }
 0x3a8   :  { %v1660_v58 = vcombine.low %v1652_v8, %v1659_v20  ;;  %4398 = vmatprep.subr.bf16.mxu1 %v4717_v1  ;;  %v4394_v8 = vpack.c.bf16 %v1875_v53, %v1873_v56  ;;  %v1872_v20 = vld [vmem:[%s6099_s14 + $0xc0] sm:$0xff] }
 0x3a9   :  { %4123 = vmatprep.mubr.msk.f32.mxu0 %vm1661_vm11, %v1620_v57  ;;  %v1874_v57 = vld [vmem:[%s6099_s14 + $0xd0] sm:$0xff] }
 0x3aa   :  { %4124 = vmatmul.mubr.msk.f32.vlgmr.msra.gmra.mrb[8].mxu0 %vm1661_vm11, %v1660_v58  ;;  %v4396_v58 = vpack.c.bf16 %v1874_v57, %v1872_v20 }
 0x3ab   :  { %1960 = vmatprep.mubr.f32.mxu0 %v4716_v0  ;;  %4373 = vmatpush1.bf16.msra.mxu0 %v4372_v23  ;;  %v1883_v23 = vrot.slane %v1878_v63, %v5118_v41 }
 0x3ac   :  { %4375 = vmatprep.subr.bf16.mxu0 %v4374_v24  ;;  %v1887_v24 = vrot.slane %v1878_v63, %v5073_v12 }
 0x3af   :  { %4377 = vmatpush1.bf16.msra.mxu0 %v4376_v27 }
 0x3b0   :  { %4379 = vmatprep.subr.bf16.mxu0 %v4378_v30 }
 0x3b3   :  { %4381 = vmatpush1.bf16.msra.mxu0 %v4380_v37 }
 0x3b4   :  { %4383 = vmatprep.subr.bf16.mxu0 %v4382_v40 }
 0x3b7   :  { %4385 = vmatpush1.bf16.msra.mxu0 %v4384_v45 }
 0x3b8   :  { %4387 = vmatprep.subr.bf16.mxu0 %v4386_v9 }
 0x3bb   :  { %4389 = vmatpush1.bf16.msra.mxu0 %v4388_v28 }
 0x3bc   :  { %4391 = vmatprep.subr.bf16.mxu0 %v4390_v3 }
 0x3bf   :  { %4393 = vmatpush1.bf16.msra.mxu0 %v4392_v51 }
 0x3c0   :  { %4395 = vmatprep.subr.bf16.mxu0 %v4394_v8 }
 0x3c3   :  { %4397 = vmatpush1.bf16.msra.mxu0 %v4396_v58 }
 0x3c4   :  { %1924 = vmatprep.subr.mxu0 %v1877_v38 }
 0x3c7   :  { %1925 = vmatpush1.msra.mxu0 %v1876_v44 }
 0x3c8   :  { %4413 = vmatprep.subr.bf16.mxu0 %v4717_v1 }
 0x47d   :  { %v4125_v22 = vpop.f32.mrb[8].mxu0 }
 0x47e   :  { %v1738_v5 = vadd.f32 %v4125_v22, %v3945_v15  ;;  %v1732_v34 = vpop.f32.mrb[9].mxu0 }
 0x47f   :  { %v1733_v52 = vadd.f32 %v3945_v15, %v1732_v34 }
 0x480   :  { %v1742_v55 = vmax.f32 %v1738_v5, 0.0 }
 0x481   :  { %v1741_v54 = vmax.f32 %v1733_v52, 0.0 }
 0x483   :  { %4156 = vmatprep.mubr.msk.f32.mxu1 %vm1661_vm11, %v1741_v54 }
 0x484   :  { %4157 = vmatmul.mubr.msk.f32.vlgmr.msra.gmra.mrb[4].mxu1 %vm1661_vm11, %v1742_v55 }
 0x485   :  { %4179 = vmatprep.mubr.msk.f32.mxu1 %vm4718_vm1, %v4716_v0 }
 0x557   :  { %v4158_v59 = vpop.f32.mrb[4].mxu1 }
 0x558   :  { %v1837_v17 = vpop.f32.mrb[5].mxu1  ;;  %v1843_v49 = vadd.f32 %v4158_v59, %v3948_v13 }
 0x559   :  { %v1838_v60 = vadd.f32 %v3948_v13, %v1837_v17 }
 0x55a   :  { %v1847_v19 = vmax.f32 %v1843_v49, 0.0 }
 0x55b   :  { %v1846_v61 = vmax.f32 %v1838_v60, 0.0 }
 0x55d   :  { %3951 = vmatmul.mubr.msk.f32.vlgmr.msra.gmra.mrb[10].mxu0 %vm1661_vm11, %v1846_v61 }
 0x55e   :  { %1966 = vmatprep.mubr.f32.mxu0 %v4716_v0 }
 0x561   :  { %3952 = vmatmul.mubr.msk.f32.gmra.mrb[12].mxu0 %vm1661_vm11, %v1847_v19 }
 0x562   :  { %4192 = vmatprep.mubr.msk.f32.mxu0 %vm4718_vm1, %v4716_v0 }
 0x630   :  { %v1962_v21 = vpop.f32.mrb[10].mxu0 }
 0x631   :  { %v1963_v25 = vadd.f32 %v1962_v21, %v1883_v23  ;;  %v1964_v39 = vpop.f32.mrb[11].mxu0 }
 0x632   :  { %v1965_v26 = vadd.f32 %v1964_v39, %v1887_v24 }
 0x634   :  { %v1977_v27 = vcombine.low %v1963_v25, %v1965_v26  ;;  %v1978_v30 = vcombine.high %v1963_v25, %v1965_v26  ;;  %v1968_v31 = vpop.f32.mrb[12].mxu0 }
 0x635   :  { %v1969_v33 = vadd.f32 %v1968_v31, %v1883_v23  ;;  %v1970_v35 = vpop.f32.mrb[13].mxu0 }
 0x636   :  { %v1985_v36 = vrot.slane %v1977_v27, %v5176_v6  ;;  %v1992_v37 = vrot.slane %v1978_v30, %v5176_v6  ;;  %v1971_v40 = vadd.f32 %v1970_v35, %v1887_v24 }
 0x638   :  { %v1993_v43 = vcombine.high %v1985_v36, %v1985_v36  ;;  %v1994_v2 = vcombine.high %v1992_v37, %v1992_v37  ;;  %v5564_v42 = vrot.slane %v1985_v36, %v5176_v6  ;;  %v5567_v46 = vrot.slane %v1992_v37, %v5176_v6 }
 0x639   :  { %v2027_v45 = vcombine.low %v1969_v33, %v1971_v40  ;;  %v2028_v9 = vcombine.high %v1969_v33, %v1971_v40 }
 0x63a   :  { %v5570_v32 = vrot.slane %v1993_v43, %v5176_v6  ;;  %v5573_v48 = vrot.slane %v1994_v2, %v5176_v6  ;;  %v2024_v14 = vcombine.high %v5567_v46, %v5567_v46  ;;  %v2081_v50 = vrot.slane %v5567_v46, 1 }
 0x63b   :  { %v2035_v28 = vrot.slane %v2027_v45, %v5176_v6  ;;  %v2042_v3 = vrot.slane %v2028_v9, %v5176_v6  ;;  %v2023_v18 = vcombine.high %v5564_v42, %v5564_v42  ;;  %v2077_v4 = vrot.slane %v5564_v42, 1 }
 0x63c   :  { %v2025_v51 = vcombine.high %v5570_v32, %v5570_v32  ;;  %v5587_v15 = vcombine.high %v5573_v48, %v5573_v48  ;;  %v2078_v22 = vrot.slane %v5570_v32, 1  ;;  %v2082_v5 = vrot.slane %v5573_v48, 1 }
 0x63d   :  { %v5591_v34 = vrot.slane %v2024_v14, 1  ;;  %v2043_v52 = vcombine.high %v2035_v28, %v2035_v28  ;;  %v2044_v54 = vcombine.high %v2042_v3, %v2042_v3  ;;  %v5594_v55 = vrot.slane %v2035_v28, %v5176_v6 }
 0x63e   :  { %v5596_v56 = vrot.slane %v2025_v51, 1  ;;  %v2239_v53 = vcombine.low %v2081_v50, %v2082_v5  ;;  %v2058_v8 = vrot.slane %v2042_v3, %v5176_v6  ;;  %v2084_v20 = vrot.slane %v5587_v15, 1 }
 0x63f   :  { %v5605_v57 = vrot.slane %v2043_v52, %v5176_v6  ;;  %v5608_v58 = vrot.slane %v2044_v54, %v5176_v6  ;;  %v2073_v38 = vcombine.high %v5594_v55, %v5594_v55  ;;  %v2085_v44 = vrot.slane %v5594_v55, 1 }
 0x640   :  { %v5613_v13 = vrot.slane %v2023_v18, 1  ;;  %v2237_v59 = vcombine.low %v2077_v4, %v2078_v22  ;;  %v2260_v17 = vrot.slane %v2239_v53, %v5176_v6  ;;  %v2267_v63 = vrot.slane %v5591_v34, %v5176_v6 }
 0x641   :  { %v2074_v60 = vcombine.high %v5605_v57, %v5605_v57  ;;  %v2086_v49 = vrot.slane %v5605_v57, 1  ;;  %v5623_v61 = vrot.slane %v2073_v38, 1  ;;  %v2285_v19 = vcombine.low %v2084_v20, %v2085_v44 }
 0x642   :  { %v2238_v62 = vcombine.low %v5613_v13, %v5596_v56  ;;  %v5635_v24 = vrot.slane %v2058_v8, 1  ;;  %v2090_v21 = vrot.slane %v5608_v58, 1  ;;  %v2246_v39 = vrot.slane %v2237_v59, %v5176_v6 }
 0x643   :  { %v5633_v23 = vrot.slane %v2074_v60, 1  ;;  %v2286_v25 = vcombine.low %v2086_v49, %v5623_v61  ;;  %v2269_v27 = vcombine.low %v2260_v17, %v2267_v63  ;;  %v2294_v31 = vrot.slane %v2285_v19, %v5176_v6 }
 0x644   :  { %v2253_v26 = vrot.slane %v2238_v62, %v5176_v6  ;;  %v2315_v37 = vrot.slane %v2090_v21, %v5176_v6  ;;  %v5656_v18 = vand.u32 127, %v182_v10 }
 0x645   :  { %v2287_v30 = vcombine.low %v5633_v23, %v5635_v24  ;;  %v2301_v33 = vrot.slane %v2286_v25, %v5176_v6  ;;  %v2283_v2 = vrot.slane %v2269_v27, %v5176_v6 }
 0x646   :  { %v2268_v35 = vcombine.low %v2246_v39, %v2253_v26  ;;  %v5660_v51 = vsub.s32 %v5656_v18, %v5070_v11 }
 0x647   :  { %v2308_v36 = vrot.slane %v2287_v30, %v5176_v6  ;;  %v2316_v40 = vcombine.low %v2294_v31, %v2301_v33 }
 0x648   :  { %v2276_v43 = vrot.slane %v2268_v35, %v5176_v6 }
 0x649   :  { %v2317_v45 = vcombine.low %v2308_v36, %v2315_v37  ;;  %v2324_v14 = vrot.slane %v2316_v40, %v5176_v6 }
 0x64a   :  { %v2284_v9 = vcombine.low %v2276_v43, %v2283_v2 }
 0x64b   :  { %v2331_v28 = vrot.slane %v2317_v45, %v5176_v6 }
 0x64c   :  { %2334 = vperm.xlu1 %4457, %v2284_v9  }
 0x64d   :  { %v2332_v3 = vcombine.low %v2324_v14, %v2331_v28 }
 0x64f   :  { %2337 = vperm.xlu0 %4458, %v2332_v3  }
 0x6cb   :  { %v2335_v52 = vpop.permute.xlu1 %2334 }
 0x6cc   :  { %v2344_v53 = vrot.slane %v2335_v52, %v5660_v51 }
 0x6ce   :  { %v2338_v54 = vpop.permute.xlu0 %2337 }
 0x6cf   :  { %v2348_v8 = vrot.slane %v2338_v54, %v5660_v51 }
 0x6d1   :  { %v2349_v38 = vsel %vm354_vm2, %v2348_v8, %v2344_v53 }
 0x6d2   :  { %v2352_v59 = vsel %vm2351_vm12, %v2349_v38, -inf }
 0x6d3   :  { %2353 = vmax.xlane.f32.xlu1 %v2352_v59 }
 0x760   :  { %v2354_v17 = vpop.xlane.xlu1 %2353 }
 0x761   :  { %v2359_v10 = vrot.slane %v2354_v17, %v5118_v41  ;;  %v2363_v60 = vrot.slane %v2354_v17, %v5073_v12 }
 0x763   :  { %v2364_v19 = vcombine.low %v2359_v10, %v2363_v60 }
 0x765   :  { %v2371_v62 = vrot.slane %v2364_v19, %v5176_v6 }
 0x767   :  { %v2378_v63 = vrot.slane %v2371_v62, %v5176_v6 }
 0x769   :  { %v2382_v25 = vrot.slane %v2378_v63, %v5118_v41  ;;  %v2389_v39 = vrot.slane %v2378_v63, %v5073_v12 }
 0x76b   :  { %2384 = vbcast.lane.b32.xlu0 %v2382_v25, 256 }
 0x76f   :  { %2391 = vbcast.lane.b32.xlu0 %v2389_v39, 256 }
 0x7dd   :  { %v2385_v26 = vpop.permute.xlu0 %2384 }
 0x7de   :  { %v2393_v27 = vcombine.high %v2385_v26, %v2385_v26  ;;  %v2400_v30 = vrot.slane %v2385_v26, %v5176_v6 }
 0x7e0   :  { %v2407_v31 = vrot.slane %v2393_v27, %v5176_v6  ;;  %v2408_v33 = vcombine.high %v2400_v30, %v2400_v30  ;;  %v2416_v35 = vrot.slane %v2400_v30, %v5176_v6 }
 0x7e1   :  { %v2392_v36 = vpop.permute.xlu0 %2391 }
 0x7e2   :  { %v2409_v37 = vcombine.high %v2407_v31, %v2407_v31  ;;  %v2423_v40 = vrot.slane %v2407_v31, %v5176_v6  ;;  %v2430_v43 = vrot.slane %v2408_v33, %v5176_v6  ;;  %v2438_v2 = vcombine.high %v2416_v35, %v2416_v35 }
 0x7e3   :  { %v5679_v45 = vsub.f32 %v2077_v4, %v2416_v35  ;;  %v2441_v9 = vcombine.high %v2392_v36, %v2392_v36  ;;  %v2448_v14 = vrot.slane %v2392_v36, %v5176_v6 }
 0x7e4   :  { %v2437_v28 = vrot.slane %v2409_v37, %v5176_v6  ;;  %v2439_v3 = vcombine.high %v2423_v40, %v2423_v40  ;;  %v2440_v52 = vcombine.high %v2430_v43, %v2430_v43  ;;  %v5685_v54 = vsub.f32 %v2078_v22, %v2430_v43 }
 0x7e5   :  { %v5688_v53 = vsub.f32 %v5613_v13, %v2438_v2  ;;  %v5692_v8 = vsub.f32 %v2081_v50, %v2423_v40  ;;  %v2517_v4 = vmul.f32 1.442695, %v5679_v45  ;;  %v2455_v38 = vrot.slane %v2441_v9, %v5176_v6 }
 0x7e6   :  { %v5697_v59 = vsub.f32 %v5596_v56, %v2440_v52  ;;  %v5701_v17 = vsub.f32 %v2082_v5, %v2437_v28  ;;  %v5704_v32 = vsub.f32 %v5591_v34, %v2439_v3  ;;  %v2519_v22 = vmul.f32 1.442695, %v5685_v54 }
 0x7e7   :  { %4469 = vpow2.f32 %v2517_v4  ;;  %v2521_v46 = vmul.f32 1.442695, %v5688_v53  ;;  %v2525_v50 = vmul.f32 1.442695, %v5692_v8  ;;  %v2456_v13 = vcombine.high %v2448_v14, %v2448_v14 }
 0x7e8   :  { %4471 = vpow2.f32 %v2519_v22  ;;  %v2523_v10 = vmul.f32 1.442695, %v5697_v59  ;;  %v2527_v56 = vmul.f32 1.442695, %v5701_v17  ;;  %v2529_v48 = vmul.f32 1.442695, %v5704_v32 }
 0x7e9   :  { %4473 = vpow2.f32 %v2521_v46  ;;  %v2457_v5 = vcombine.high %v2455_v38, %v2455_v38  ;;  %v2464_v34 = vrot.slane %v2448_v14, %v5176_v6  ;;  %v2471_v60 = vrot.slane %v2455_v38, %v5176_v6 }
 0x7ea   :  { %4475 = vpow2.f32 %v2523_v10  ;;  %v2478_v19 = vrot.slane %v2456_v13, %v5176_v6 }
 0x7eb   :  { %4477 = vpow2.f32 %v2525_v50  ;;  %v2485_v62 = vrot.slane %v2457_v5, %v5176_v6  ;;  %v2486_v63 = vcombine.high %v2464_v34, %v2464_v34  ;;  %v2487_v25 = vcombine.high %v2471_v60, %v2471_v60 }
 0x7ec   :  { %4479 = vpow2.f32 %v2527_v56  ;;  %v2488_v39 = vcombine.high %v2478_v19, %v2478_v19  ;;  %v5718_v26 = vsub.f32 %v2084_v20, %v2464_v34  ;;  %v5722_v27 = vsub.f32 %v2085_v44, %v2478_v19 }
 0x7ed   :  { %4481 = vpow2.f32 %v2529_v48  ;;  %v5726_v30 = vsub.f32 %v2086_v49, %v2486_v63  ;;  %v5729_v31 = vsub.f32 %v5633_v23, %v2471_v60  ;;  %v5732_v33 = vsub.f32 %v5635_v24, %v2485_v62 }
 0x7ee   :  { %v5735_v35 = vsub.f32 %v5623_v61, %v2488_v39  ;;  %v5739_v20 = vsub.f32 %v2090_v21, %v2487_v25  ;;  %v2531_v55 = vmul.f32 1.442695, %v5718_v26  ;;  %v2533_v44 = vmul.f32 1.442695, %v5722_v27 }
 0x7ef   :  { %v2535_v57 = vmul.f32 1.442695, %v5726_v30  ;;  %v2539_v23 = vmul.f32 1.442695, %v5729_v31  ;;  %v2541_v61 = vmul.f32 1.442695, %v5732_v33 }
 0x7f0   :  { %4483 = vpow2.f32 %v2531_v55  ;;  %v2537_v49 = vmul.f32 1.442695, %v5735_v35  ;;  %v2543_v58 = vmul.f32 1.442695, %v5739_v20 }
 0x7f1   :  { %v4470_v24 = vpop.eup %4469  ;;  %4485 = vpow2.f32 %v2533_v44 }
 0x7f2   :  { %v4472_v36 = vpop.eup %4471  ;;  %4487 = vpow2.f32 %v2535_v57 }
 0x7f3   :  { %v4474_v21 = vpop.eup %4473  ;;  %4489 = vpow2.f32 %v2537_v49  ;;  %v2559_v37 = vcombine.low %v4470_v24, %v4472_v36 }
 0x7f4   :  { %v4476_v40 = vpop.eup %4475  ;;  %4491 = vpow2.f32 %v2539_v23 }
 0x7f5   :  { %v4478_v43 = vpop.eup %4477  ;;  %4493 = vpow2.f32 %v2541_v61  ;;  %v2560_v2 = vcombine.low %v4474_v21, %v4476_v40  ;;  %v2568_v3 = vrot.slane %v2559_v37, %v5176_v6 }
 0x7f6   :  { %v4480_v9 = vpop.eup %4479  ;;  %4495 = vpow2.f32 %v2543_v58 }
 0x7f7   :  { %v4482_v14 = vpop.eup %4481  ;;  %v2561_v28 = vcombine.low %v4478_v43, %v4480_v9  ;;  %v2575_v52 = vrot.slane %v2560_v2, %v5176_v6 }
 0x7f8   :  { %v2589_v38 = vrot.slane %v4482_v14, %v5176_v6 }
 0x7f9   :  { %v2582_v4 = vrot.slane %v2561_v28, %v5176_v6  ;;  %v2590_v22 = vcombine.low %v2568_v3, %v2575_v52 }
 0x7fa   :  { %v4484_v46 = vpop.eup %4483 }
 0x7fb   :  { %v4486_v50 = vpop.eup %4485  ;;  %v2591_v13 = vcombine.low %v2582_v4, %v2589_v38  ;;  %v2598_v10 = vrot.slane %v2590_v22, %v5176_v6 }
 0x7fc   :  { %v4488_v56 = vpop.eup %4487  ;;  %v2607_v48 = vcombine.low %v4484_v46, %v4486_v50 }
 0x7fd   :  { %v4490_v5 = vpop.eup %4489  ;;  %v2605_v34 = vrot.slane %v2591_v13, %v5176_v6 }
 0x7fe   :  { %v4492_v60 = vpop.eup %4491  ;;  %v2608_v19 = vcombine.low %v4488_v56, %v4490_v5  ;;  %v2616_v55 = vrot.slane %v2607_v48, %v5176_v6 }
 0x7ff   :  { %v4494_v62 = vpop.eup %4493  ;;  %v2606_v63 = vcombine.low %v2598_v10, %v2605_v34 }
 0x800   :  { %v4496_v25 = vpop.eup %4495  ;;  %v2609_v39 = vcombine.low %v4492_v60, %v4494_v62  ;;  %v2623_v44 = vrot.slane %v2608_v19, %v5176_v6 }
 0x801   :  { %2656 = vperm.xlu0 %4458, %v2606_v63   ;;  %v2637_v49 = vrot.slane %v4496_v25, %v5176_v6 }
 0x802   :  { %v2630_v57 = vrot.slane %v2609_v39, %v5176_v6  ;;  %v2638_v23 = vcombine.low %v2616_v55, %v2623_v44 }
 0x804   :  { %v2639_v24 = vcombine.low %v2630_v57, %v2637_v49  ;;  %v2646_v61 = vrot.slane %v2638_v23, %v5176_v6 }
 0x806   :  { %v2653_v36 = vrot.slane %v2639_v24, %v5176_v6 }
 0x808   :  { %v2654_v58 = vcombine.low %v2646_v61, %v2653_v36 }
 0x80a   :  { %2659 = vperm.xlu0 %4458, %v2654_v58  }
 0x880   :  { %v2657_v21 = vpop.permute.xlu0 %2656 }
 0x881   :  { %v2664_v40 = vrot.slane %v2657_v21, %v5660_v51 }
 0x889   :  { %v2660_v37 = vpop.permute.xlu0 %2659 }
 0x88a   :  { %v2668_v43 = vrot.slane %v2660_v37, %v5660_v51 }
 0x88c   :  { %v2669_v2 = vsel %vm354_vm2, %v2668_v43, %v2664_v40 }
 0x88d   :  { %v2671_v9 = vsel %vm2351_vm12, %v2669_v2, 0.0 }
 0x88e   :  { %2672 = vadd.xlane.f32.xlu0 %v2671_v9 }
 0x91b   :  { %v2673_v14 = vpop.xlane.xlu0 %2672 }
 0x91c   :  { %4497 = vlog2.f32 %v2673_v14 }
 0x926   :  { %v4498_v28 = vpop.eup %4497 }
 0x927   :  { %v2675_v3 = vmul.f32 0.6931472, %v4498_v28 }
 0x929   :  { %v2680_v52 = vrot.slane %v2675_v3, %v5118_v41  ;;  %v2684_v4 = vrot.slane %v2675_v3, %v5073_v12 }
 0x92b   :  { %v2685_v38 = vcombine.low %v2680_v52, %v2684_v4 }
 0x92d   :  { %v2692_v22 = vrot.slane %v2685_v38, %v5176_v6 }
 0x92f   :  { %v2699_v46 = vrot.slane %v2692_v22, %v5176_v6 }
 0x931   :  { %v2703_v50 = vrot.slane %v2699_v46, %v5118_v41  ;;  %v2710_v13 = vrot.slane %v2699_v46, %v5073_v12 }
 0x933   :  { %2705 = vbcast.lane.b32.xlu1 %v2703_v50, 256 }
 0x937   :  { %2712 = vbcast.lane.b32.xlu1 %v2710_v13, 256 }
 0x9a5   :  { %v2706_v10 = vpop.permute.xlu1 %2705 }
 0x9a6   :  { %v2714_v56 = vcombine.high %v2706_v10, %v2706_v10  ;;  %v2721_v48 = vrot.slane %v2706_v10, %v5176_v6 }
 0x9a8   :  { %v2728_v5 = vrot.slane %v2714_v56, %v5176_v6  ;;  %v2729_v34 = vcombine.high %v2721_v48, %v2721_v48  ;;  %v2737_v60 = vrot.slane %v2721_v48, %v5176_v6 }
 0x9a9   :  { %v2713_v19 = vpop.permute.xlu1 %2712 }
 0x9aa   :  { %v2730_v62 = vcombine.high %v2728_v5, %v2728_v5  ;;  %v2744_v63 = vrot.slane %v2728_v5, %v5176_v6  ;;  %v2751_v25 = vrot.slane %v2729_v34, %v5176_v6  ;;  %v2759_v39 = vcombine.high %v2737_v60, %v2737_v60 }
 0x9ab   :  { %v5776_v55 = vsub.f32 %v5679_v45, %v2737_v60  ;;  %v2762_v44 = vcombine.high %v2713_v19, %v2713_v19  ;;  %v2769_v57 = vrot.slane %v2713_v19, %v5176_v6 }
 0x9ac   :  { %v2758_v49 = vrot.slane %v2730_v62, %v5176_v6  ;;  %v2760_v23 = vcombine.high %v2744_v63, %v2744_v63  ;;  %v2761_v24 = vcombine.high %v2751_v25, %v2751_v25  ;;  %v5781_v61 = vsub.f32 %v5685_v54, %v2751_v25 }
 0x9ad   :  { %v5784_v36 = vsub.f32 %v5688_v53, %v2759_v39  ;;  %v2776_v58 = vrot.slane %v2762_v44, %v5176_v6  ;;  %v2777_v21 = vcombine.high %v2769_v57, %v2769_v57  ;;  %v5791_v45 = vsub.f32 %v5692_v8, %v2744_v63 }
 0x9ae   :  { %v5788_v37 = vsub.f32 %v5697_v59, %v2761_v24  ;;  %v5794_v40 = vsub.f32 %v5701_v17, %v2758_v49  ;;  %v2852_v43 = vcombine.low %v5776_v55, %v5781_v61  ;;  %v2785_v2 = vrot.slane %v2769_v57, %v5176_v6 }
 0x9af   :  { %v2778_v54 = vcombine.high %v2776_v58, %v2776_v58  ;;  %v2792_v53 = vrot.slane %v2776_v58, %v5176_v6  ;;  %v2799_v9 = vrot.slane %v2777_v21, %v5176_v6  ;;  %v5802_v14 = vsub.f32 %v5704_v32, %v2760_v23 }
 0x9b0   :  { %v2853_v8 = vcombine.low %v5784_v36, %v5788_v37  ;;  %v2854_v59 = vcombine.low %v5791_v45, %v5794_v40  ;;  %v2861_v17 = vrot.slane %v2852_v43, %v5176_v6  ;;  %v2807_v3 = vcombine.high %v2785_v2, %v2785_v2 }
 0x9b1   :  { %v2806_v28 = vrot.slane %v2778_v54, %v5176_v6  ;;  %v2808_v52 = vcombine.high %v2792_v53, %v2792_v53  ;;  %v2809_v4 = vcombine.high %v2799_v9, %v2799_v9  ;;  %v5811_v38 = vsub.f32 %v5718_v26, %v2785_v2 }
 0x9b2   :  { %v5814_v22 = vsub.f32 %v5722_v27, %v2799_v9  ;;  %v5817_v32 = vsub.f32 %v5729_v31, %v2792_v53  ;;  %v2868_v46 = vrot.slane %v2853_v8, %v5176_v6  ;;  %v5821_v50 = vsub.f32 %v5726_v30, %v2807_v3 }
 0x9b3   :  { %v5824_v13 = vsub.f32 %v5735_v35, %v2809_v4  ;;  %v5827_v10 = vsub.f32 %v5732_v33, %v2806_v28  ;;  %v5830_v26 = vsub.f32 %v5739_v20, %v2808_v52  ;;  %v2875_v31 = vrot.slane %v2854_v59, %v5176_v6 }
 0x9b4   :  { %v2900_v27 = vcombine.low %v5811_v38, %v5814_v22  ;;  %v2882_v56 = vrot.slane %v5802_v14, %v5176_v6  ;;  %v2883_v48 = vcombine.low %v2861_v17, %v2868_v46  ;;  %v3135_v2 = vrot.slane %v5656_v18, %v5176_v6 }
 0x9b5   :  { %v2901_v30 = vcombine.low %v5821_v50, %v5824_v13  ;;  %v2902_v35 = vcombine.low %v5817_v32, %v5827_v10  ;;  %v2930_v19 = vrot.slane %v5830_v26, %v5176_v6 }
 0x9b6   :  { %v2884_v33 = vcombine.low %v2875_v31, %v2882_v56  ;;  %v2891_v5 = vrot.slane %v2883_v48, %v5176_v6  ;;  %v2909_v20 = vrot.slane %v2900_v27, %v5176_v6  ;;  %v3136_v53 = vcombine.high %v3135_v2, %v3135_v2 }
 0x9b7   :  { %v2916_v34 = vrot.slane %v2901_v30, %v5176_v6  ;;  %v2923_v60 = vrot.slane %v2902_v35, %v5176_v6  ;;  %v3143_v9 = vrot.slane %v3135_v2, %v5176_v6 }
 0x9b8   :  { %v2898_v62 = vrot.slane %v2884_v33, %v5176_v6  ;;  %v3150_v8 = vrot.slane %v3136_v53, %v5176_v6 }
 0x9b9   :  { %v2931_v63 = vcombine.low %v2909_v20, %v2916_v34  ;;  %v2932_v25 = vcombine.low %v2923_v60, %v2930_v19 }
 0x9ba   :  { %v5848_v39 = vcombine.low %v2891_v5, %v2898_v62  ;;  %v3151_v59 = vcombine.low %v3143_v9, %v3150_v8 }
 0x9bb   :  { %v2939_v44 = vrot.slane %v2931_v63, %v5176_v6  ;;  %v2946_v57 = vrot.slane %v2932_v25, %v5176_v6 }
 0x9bc   :  { %2949 = vperm.xlu0 %4458, %v5848_v39   ;;  %v3158_v17 = vrot.slane %v3151_v59, %v5176_v6 }
 0x9bd   :  { %v5853_v49 = vcombine.low %v2939_v44, %v2946_v57 }
 0x9be   :  { %v3165_v28 = vrot.slane %v3158_v17, %v5176_v6 }
 0x9bf   :  { %2952 = vperm.xlu1 %4457, %v5853_v49  }
 0x9c0   :  { %v3169_v3 = vrot.slane %v3165_v28, %v5118_v41  ;;  %v3176_v35 = vrot.slane %v3165_v28, %v5073_v12 }
 0x9c2   :  { %3171 = vbcast.lane.b32.xlu0 %v3169_v3, 256 }
 0xa3b   :  { %v2950_v23 = vpop.permute.xlu0 %2949 }
 0xa3c   :  { %v2957_v58 = vrot.slane %v2950_v23, %v5660_v51 }
 0xa3e   :  { %v2953_v24 = vpop.permute.xlu1 %2952 }
 0xa3f   :  { %v2961_v21 = vrot.slane %v2953_v24, %v5660_v51  ;;  %v3172_v33 = vpop.permute.xlu0 %3171 }
 0xa40   :  { %v3180_v5 = vcombine.high %v3172_v33, %v3172_v33  ;;  %v3187_v20 = vrot.slane %v3172_v33, %v5176_v6 }
 0xa41   :  { %v2962_v43 = vsel %vm354_vm2, %v2961_v21, %v2957_v58 }
 0xa42   :  { %v2964_v54 = vsel %vm2351_vm12, %v2962_v43, -inf  ;;  %v3194_v34 = vrot.slane %v3180_v5, %v5176_v6  ;;  %v3195_v60 = vcombine.high %v3187_v20, %v3187_v20  ;;  %v3203_v62 = vrot.slane %v3187_v20, %v5176_v6 }
 0xa43   :  { %2965 = vmax.xlane.f32.xlu1 %v2964_v54 }
 0xa44   :  { %v3196_v19 = vcombine.high %v3194_v34, %v3194_v34  ;;  %v3210_v57 = vrot.slane %v3194_v34, %v5176_v6  ;;  %v3217_v23 = vrot.slane %v3195_v60, %v5176_v6  ;;  %v3225_v54 = vcombine.high %v3203_v62, %v3203_v62 }
 0xa46   :  { %v3224_v43 = vrot.slane %v3196_v19, %v5176_v6  ;;  %v3226_v17 = vcombine.high %v3210_v57, %v3210_v57  ;;  %v3227_v28 = vcombine.high %v3217_v23, %v3217_v23 }
 0xad0   :  { %v2966_v52 = vpop.xlane.xlu1 %2965 }
 0xad1   :  { %v2971_v4 = vrot.slane %v2966_v52, %v5118_v41  ;;  %v2975_v46 = vrot.slane %v2966_v52, %v5073_v12 }
 0xad3   :  { %v2976_v27 = vcombine.low %v2971_v4, %v2975_v46 }
 0xad5   :  { %v2983_v31 = vrot.slane %v2976_v27, %v5176_v6 }
 0xad7   :  { %v2990_v56 = vrot.slane %v2983_v31, %v5176_v6 }
 0xad9   :  { %v2994_v48 = vrot.slane %v2990_v56, %v5118_v41  ;;  %v3001_v30 = vrot.slane %v2990_v56, %v5073_v12 }
 0xadb   :  { %2996 = vbcast.lane.b32.xlu0 %v2994_v48, 256 }
 0xadf   :  { %3003 = vbcast.lane.b32.xlu0 %v3001_v30, 256 }
 0xae3   :  { %3178 = vbcast.lane.b32.xlu0 %v3176_v35, 256 }
 0xb4d   :  { %v2997_v63 = vpop.permute.xlu0 %2996 }
 0xb4e   :  { %v3005_v25 = vcombine.high %v2997_v63, %v2997_v63  ;;  %v3012_v44 = vrot.slane %v2997_v63, %v5176_v6 }
 0xb50   :  { %v3019_v24 = vrot.slane %v3005_v25, %v5176_v6  ;;  %v3020_v58 = vcombine.high %v3012_v44, %v3012_v44  ;;  %v3028_v21 = vrot.slane %v3012_v44, %v5176_v6 }
 0xb51   :  { %v3004_v2 = vpop.permute.xlu0 %3003 }
 0xb52   :  { %v3021_v53 = vcombine.high %v3019_v24, %v3019_v24  ;;  %v3035_v9 = vrot.slane %v3019_v24, %v5176_v6  ;;  %v3042_v8 = vrot.slane %v3020_v58, %v5176_v6  ;;  %v3050_v59 = vcombine.high %v3028_v21, %v3028_v21 }
 0xb53   :  { %vm3115_vm13 = vcmp.ge.f32.partialorder %v5776_v55, %v3028_v21  ;;  %v3053_v3 = vcombine.high %v3004_v2, %v3004_v2  ;;  %v3060_v31 = vrot.slane %v3004_v2, %v5176_v6 }
 0xb54   :  { %v3049_v52 = vrot.slane %v3021_v53, %v5176_v6  ;;  %v3051_v4 = vcombine.high %v3035_v9, %v3035_v9  ;;  %v3052_v46 = vcombine.high %v3042_v8, %v3042_v8  ;;  %vm3116_vm14 = vcmp.ge.f32.partialorder %v5781_v61, %v3042_v8 }
 0xb55   :  { %vm3117_vm15 = vcmp.ge.f32.partialorder %v5784_v36, %v3050_v59  ;;  %vm3119_vm3 = vcmp.ge.f32.partialorder %v5791_v45, %v3035_v9  ;;  %v3277_v27 = vsel %vm3116_vm14, %v3217_v23, 7  ;;  %v3276_v55 = vsel %vm3115_vm13, %v3203_v62, 7  ;;  %v3179_v56 = vpop.permute.xlu0 %3178 }
 0xb56   :  { %vm3118_vm4 = vcmp.ge.f32.partialorder %v5788_v37, %v3052_v46  ;;  %vm3120_vm5 = vcmp.ge.f32.partialorder %v5794_v40, %v3049_v52  ;;  %vm3121_vm6 = vcmp.ge.f32.partialorder %v5802_v14, %v3051_v4  ;;  %v3278_v48 = vsel %vm3117_vm15, %v3225_v54, 7 }
 0xb57   :  { %v3279_v30 = vsel %vm3118_vm4, %v3227_v28, 7  ;;  %v3280_v35 = vsel %vm3119_vm3, %v3210_v57, 7  ;;  %v3281_v33 = vsel %vm3120_vm5, %v3224_v43, 7  ;;  %v3282_v61 = vsel %vm3121_vm6, %v3226_v17, 7 }
 0xb58   :  { %v3290_v5 = vcombine.low %v3276_v55, %v3277_v27  ;;  %v3291_v36 = vcombine.low %v3278_v48, %v3279_v30  ;;  %v3067_v45 = vrot.slane %v3053_v3, %v5176_v6  ;;  %v3068_v20 = vcombine.high %v3060_v31, %v3060_v31 }
 0xb59   :  { %v3076_v34 = vrot.slane %v3060_v31, %v5176_v6  ;;  %v3228_v60 = vcombine.high %v3179_v56, %v3179_v56  ;;  %v3235_v37 = vrot.slane %v3179_v56, %v5176_v6  ;;  %v3292_v40 = vcombine.low %v3280_v35, %v3281_v33 }
 0xb5a   :  { %v3299_v14 = vrot.slane %v3290_v5, %v5176_v6  ;;  %v3069_v19 = vcombine.high %v3067_v45, %v3067_v45  ;;  %v3083_v62 = vrot.slane %v3067_v45, %v5176_v6  ;;  %v3090_v63 = vrot.slane %v3068_v20, %v5176_v6 }
 0xb5b   :  { %v3098_v25 = vcombine.high %v3076_v34, %v3076_v34  ;;  %v3242_v44 = vrot.slane %v3228_v60, %v5176_v6  ;;  %v3306_v57 = vrot.slane %v3291_v36, %v5176_v6  ;;  %vm3122_vm7 = vcmp.ge.f32.partialorder %v5811_v38, %v3076_v34 }
 0xb5c   :  { %v3097_v23 = vrot.slane %v3069_v19, %v5176_v6  ;;  %v3099_v24 = vcombine.high %v3083_v62, %v3083_v62  ;;  %v3243_v58 = vcombine.high %v3235_v37, %v3235_v37  ;;  %v3100_v21 = vcombine.high %v3090_v63, %v3090_v63 }
 0xb5d   :  { %vm3123_vm8 = vcmp.ge.f32.partialorder %v5814_v22, %v3090_v63  ;;  %vm3126_vm9 = vcmp.ge.f32.partialorder %v5817_v32, %v3083_v62  ;;  %v3244_v43 = vcombine.high %v3242_v44, %v3242_v44  ;;  %vm5907_vm11 = vcmp.ge.f32.partialorder %v5821_v50, %v3098_v25 }
 0xb5e   :  { %vm3127_vm13 = vcmp.ge.f32.partialorder %v5827_v10, %v3097_v23  ;;  %v3251_v2 = vrot.slane %v3235_v37, %v5176_v6  ;;  %v3258_v53 = vrot.slane %v3242_v44, %v5176_v6  ;;  %vm3128_vm14 = vcmp.ge.f32.partialorder %v5830_v26, %v3099_v24 }
 0xb5f   :  { %v3265_v9 = vrot.slane %v3243_v58, %v5176_v6  ;;  %v3272_v8 = vrot.slane %v3244_v43, %v5176_v6  ;;  %v3313_v32 = vrot.slane %v3292_v40, %v5176_v6  ;;  %v3320_v4 = vrot.slane %v3282_v61, %v5176_v6  ;;  %v3450_v43 = vld [vmem:[%s6134_s24] sm:$0xff] }
 0xb60   :  { %v3273_v59 = vcombine.high %v3251_v2, %v3251_v2  ;;  %v3274_v17 = vcombine.high %v3258_v53, %v3258_v53  ;;  %v3283_v50 = vsel %vm3122_vm7, %v3251_v2, 7  ;;  %v3287_v28 = vsel %vm3126_vm9, %v3258_v53, 7 }
 0xb61   :  { %v3275_v3 = vcombine.high %v3265_v9, %v3265_v9  ;;  %v3284_v10 = vsel %vm3123_vm8, %v3265_v9, 7  ;;  %v3288_v52 = vsel %vm3127_vm13, %v3272_v8, 7  ;;  %vm3125_vm15 = vcmp.ge.f32.partialorder %v5824_v13, %v3100_v21  ;;  %v3452_v8 = vld [vmem:[%s6134_s24 + $0x10] sm:$0xff] }
 0xb62   :  { %v3289_v26 = vsel %vm3128_vm14, %v3274_v17, 7  ;;  %v3338_v46 = vcombine.low %v3283_v50, %v3284_v10  ;;  %v3340_v27 = vcombine.low %v3287_v28, %v3288_v52  ;;  %v3285_v31 = vsel %vm5907_vm11, %v3273_v59, 7  ;;  %v3454_v28 = vld [vmem:[%s6134_s24 + $0x20] sm:$0xff] }
 0xb63   :  { %v3286_v55 = vsel %vm3125_vm15, %v3275_v3, 7  ;;  %v3321_v56 = vcombine.low %v3299_v14, %v3306_v57  ;;  %v3322_v38 = vcombine.low %v3313_v32, %v3320_v4  ;;  %v3368_v22 = vrot.slane %v3289_v26, %v5176_v6  ;;  %v3453_v32 = vld [vmem:[%s6134_s24 + $0x18] sm:$0xff]  ;;  %v3455_v3 = vld [vmem:[%s6134_s24 + $0x28] sm:$0xff]  ;;  %v3456_v4 = vld [vmem:[%s6134_s24 + $0x30] sm:$0xff] }
 0xb64   :  { %v3339_v48 = vcombine.low %v3285_v31, %v3286_v55  ;;  %v3361_v30 = vrot.slane %v3340_v27, %v5176_v6  ;;  %v3347_v13 = vrot.slane %v3338_v46, %v5176_v6  ;;  %v4402_v17 = vpack.c.bf16 %v3453_v32, %v3452_v8  ;;  %v3457_v26 = vld [vmem:[%s6134_s24 + $0x38] sm:$0xff]  ;;  %v3458_v31 = vld [vmem:[%s6134_s24 + $0x40] sm:$0xff]  ;;  %v3459_v55 = vld [vmem:[%s6134_s24 + $0x48] sm:$0xff] }
 0xb65   :  { %v3329_v35 = vrot.slane %v3321_v56, %v5176_v6  ;;  %v3336_v33 = vrot.slane %v3322_v38, %v5176_v6  ;;  %v4405_v52 = vpack.c.bf16 %v3455_v3, %v3454_v28  ;;  %v4408_v27 = vpack.c.bf16 %v3457_v26, %v3456_v4  ;;  %v3561_v32 = vld [vmem:[#allocation8 + $0x20] sm:$0xff] }
 0xb66   :  { %v3354_v61 = vrot.slane %v3339_v48, %v5176_v6  ;;  %v3370_v5 = vcombine.low %v3361_v30, %v3368_v22  ;;  %v4411_v56 = vpack.c.bf16 %v3459_v55, %v3458_v31  ;;  %vm3435_vm4 = vcmask 653312   ;;  %v4515_v48 = vld [vmem:[#allocation2] sm:$0xff] }
 0xb67   :  { %v3337_v36 = vcombine.low %v3329_v35, %v3336_v33  ;;  %vm3543_vm5 = vcmask 719872   ;;  %vm2121_vm6 = vcmask 17408  }
 0xb68   :  { %v3369_v45 = vcombine.low %v3347_v13, %v3354_v61  ;;  %v3384_v20 = vrot.slane %v3370_v5, %v5176_v6  ;;  %v4516_v13 = vld [vmem:[#allocation2 + $0x8] sm:$0xff] }
 0xb69   :  { %3387 = vperm.xlu0 %4458, %v3337_v36  }
 0xb6a   :  { %v3377_v34 = vrot.slane %v3369_v45, %v5176_v6 }
 0xb6c   :  { %v3385_v60 = vcombine.low %v3377_v34, %v3384_v20 }
 0xb6e   :  { %3390 = vperm.xlu0 %4458, %v3385_v60  }
 0xbe8   :  { %v3388_v37 = vpop.permute.xlu0 %3387 }
 0xbe9   :  { %v3395_v14 = vrot.slane %v3388_v37, %v5660_v51 }
 0xbed   :  { %v3391_v40 = vpop.permute.xlu0 %3390 }
 0xbee   :  { %v3399_v19 = vrot.slane %v3391_v40, %v5660_v51  ;;  %v3451_v51 = vld [vmem:[%s6134_s24 + $0x8] sm:$0xff] }
 0xbef   :  { %v4399_v54 = vpack.c.bf16 %v3451_v51, %v3450_v43  ;;  %v3557_v51 = vld [vmem:[#allocation8] sm:$0xff] }
 0xbf0   :  { %v3400_v62 = vsel %vm354_vm2, %v3399_v19, %v3395_v14 }
 0xbf1   :  { %v3401_v63 = vsel %vm2351_vm12, %v3400_v62, 2147483647  ;;  %4400 = vmatpush3.bf16.msra.mxu1 %v4399_v54  ;;  %v3558_v54 = vld [vmem:[#allocation8 + $0x8] sm:$0xff] }
 0xbf2   :  { %v3403_v25 = vshra.s32 %v3401_v63, 16  ;;  %v3402_v57 = vand.u32 65535, %v3401_v63  ;;  %4401 = vmatprep.subr.bf16.mxu1 %v4717_v1 }
 0xbf4   :  { %v3405_v44 = vcvt.s32.f32 %v3403_v25  ;;  %v3404_v24 = vcvt.s32.f32 %v3402_v57  ;;  %v4517_v57 = vld [vmem:[%s6094_s9] sm:$0x3]  ;;  %s4726_s9 = smov 48  }
 0xbf5   :  { %4403 = vmatpush3.bf16.msra.mxu1 %v4402_v17 }
 0xbf6   :  { %3406 = vmin.xlane.f32.xlu1 %v3405_v44  ;;  %4404 = vmatprep.subr.bf16.mxu1 %v4717_v1 }
 0xbf9   :  { %4406 = vmatpush3.bf16.msra.mxu1 %v4405_v52 }
 0xbfa   :  { %4407 = vmatprep.subr.bf16.mxu1 %v4717_v1 }
 0xbfd   :  { %4409 = vmatpush3.bf16.msra.mxu1 %v4408_v27 }
 0xbfe   :  { %4410 = vmatprep.subr.bf16.mxu1 %v4717_v1 }
 0xc01   :  { %4412 = vmatpush3.bf16.msra.mxu1 %v4411_v56 }
 0xc02   :  { %4419 = vmatprep.subr.bf16.mxu1 %v4717_v1 }
 0xc83   :  { %v3407_v23 = vpop.xlane.xlu1 %3406 }
 0xc84   :  { %vm3408_vm3 = vcmp.eq.f32.partialorder %v3405_v44, %v3407_v23  ;;  %v3413_v21 = vcvt.f32.s32 %v3407_v23  ;;  %v3550_v23 = vrot.slane %v4517_v57, %v5073_v12  ;;  %v3734_v57 = vld [vmem:[#allocation11 + $0x18] sm:$0xff] }
 0xc85   :  { %v3409_v58 = vsel %vm3408_vm3, %v3404_v24, inf  ;;  %v2105_v24 = vcombine.low %v5564_v42, %v5587_v15 }
 0xc86   :  { %3410 = vmin.xlane.f32.xlu0 %v3409_v58  ;;  %v3414_v53 = vshll.u32 %v3413_v21, 16 }
 0xc87   :  { %v2112_v58 = vrot.slane %v2105_v24, %v5176_v6  ;;  %v3735_v24 = vld [vmem:[#allocation11 + $0x20] sm:$0xff] }
 0xc89   :  { %v5993_v21 = vrot.slane %v2112_v58, %v5176_v6 }
 0xd13   :  { %v3411_v2 = vpop.xlane.xlu0 %3410 }
 0xd14   :  { %v3412_v9 = vcvt.f32.s32 %v3411_v2  ;;  %v3559_v2 = vld [vmem:[#allocation8 + $0x10] sm:$0xff] }
 0xd16   :  { %v3415_v59 = vadd.s32 %v3414_v53, %v3412_v9  ;;  %v4414_v53 = vpack.c.bf16 %v3558_v54, %v3557_v51  ;;  %v3560_v9 = vld [vmem:[#allocation8 + $0x18] sm:$0xff] }
 0xd17   :  { %v4417_v8 = vpack.c.bf16 %v3560_v9, %v3559_v2  ;;  %v3959_v2 = vld [vmem:[%s6106_s21] ss:$0 sm:$0xff]  ;;  %s4729_s21 = smov [#allocation13]  }
 0xd18   :  { %vm3416_vm12 = vcmp.eq.s32.totalorder %v5656_v18, %v3415_v59  ;;  %4415 = vmatpush3.bf16.msra.mxu0 %v4414_v53  ;;  %s3909_s12 = sshll.u32 %s4729_s21, 4  ;;  %s3910_s12 = int_to_ptr.vmem [resolvable:$true] %s3909_s12 }
 0xd19   :  { %v3953_v50 = vsel %vm3416_vm12, 1.0, %v4716_v0  ;;  %4416 = vmatprep.subr.bf16.mxu0 %v4717_v1  ;;  %s4650_s8 = scalar_lea.vmem %s3910_s12, 64  ;;  %p4655_p7 = scmp.lt.s32.totalorder %s3910_s12, %s3910_s12 }
 0xd1a   :  { %v3422_v10 = vrot.slane %v3953_v50, %v5118_v41  ;;  %v3429_v46 = vrot.slane %v3953_v50, %v5073_v12  ;;  %p4651_p6 = scmp.ne.s32.totalorder %s3910_s12, %s4650_s8  ;;  %p4656_p8 = scmp.lt.s32.totalorder %s4650_s8, %s4650_s8 }
 0xd1c   :  { %3424 = vbcast.lane.b32.xlu1 %v3422_v10, 256  ;;  %4418 = vmatpush3.bf16.msra.mxu0 %v4417_v8  ;;  %p4657_p9 = por %p4656_p8, %p4655_p7 }
 0xd1d   :  { %4190 = vmatprep.subr.mxu0 %v4716_v0 }
 0xd1e   :  { %p4658_p10 = pnand %p4657_p9, %p4651_p6 }
 0xd20   :  { %3431 = vbcast.lane.b32.xlu1 %v3429_v46, 256  ;;  %4191 = vmatpush3.msra.mxu0 %v3561_v32  ;;  %v2122_v32 = vsel %vm2121_vm6, %v5993_v21, -inf }
 0xd21   :  { %4425 = vmatprep.subr.bf16.mxu0 %v4717_v1 }
 0xd24   :  { %3541 = vrot.lane.b32.xlu1 %v5134_v47, %s4720_s0 }
 0xd8e   :  { %v3425_v38 = vpop.permute.xlu1 %3424 }
 0xd8f   :  { %v3433_v30 = vmul.f32 %v4515_v48, %v3425_v38  ;;  %v3646_v38 = vld [vmem:[#allocation10 + $0x8] sm:$0xff] }
 0xd91   :  { %v3436_v22 = vsel %vm3435_vm4, %v3433_v30, 0.0 }
 0xd92   :  { %v3437_v35 = vrot.slane %v3436_v22, 4  ;;  %v3432_v33 = vpop.permute.xlu1 %3431 }
 0xd93   :  { %v3434_v61 = vmul.f32 %v4516_v13, %v3432_v33 }
 0xd94   :  { %v3438_v5 = vadd.f32 %v3437_v35, %v3436_v22 }
 0xd95   :  { %v3443_v36 = vsel %vm3435_vm4, %v3434_v61, 0.0 }
 0xd96   :  { %v3439_v45 = vrot.slane %v3438_v5, 2  ;;  %v3444_v20 = vrot.slane %v3443_v36, 4  ;;  %v3542_v59 = vpop.permute.xlu1 %3541 }
 0xd97   :  { %v3544_v28 = vsel %vm3543_vm5, %v5178_v7, %v3542_v59 }
 0xd98   :  { %v3440_v34 = vadd.f32 %v3439_v45, %v3438_v5  ;;  %v3445_v60 = vadd.f32 %v3444_v20, %v3443_v36  ;;  %v3647_v45 = vld [vmem:[#allocation10 + $0x10] sm:$0xff]  ;;  %v3648_v20 = vld [vmem:[#allocation10 + $0x18] sm:$0xff] }
 0xd9a   :  { %v3446_v37 = vrot.slane %v3445_v60, 2  ;;  %v3441_v47 = vrot.slane %v3440_v34, 1 }
 0xd9c   :  { %v3447_v40 = vadd.f32 %v3446_v37, %v3445_v60  ;;  %v3442_v19 = vadd.f32 %v3441_v47, %v3440_v34  ;;  %v4423_v34 = vpack.c.bf16 %v3648_v20, %v3647_v45  ;;  %v3649_v60 = vld [vmem:[#allocation10 + $0x20] sm:$0xff]  ;;  %v3731_v37 = vld [vmem:[#allocation11] sm:$0xff]  ;;  %v3732_v47 = vld [vmem:[#allocation11 + $0x8] sm:$0xff] }
 0xd9e   :  { %v3448_v14 = vrot.slane %v3447_v40, 1 }
 0xda0   :  { %v3449_v62 = vadd.f32 %v3448_v14, %v3447_v40  ;;  %v4426_v40 = vpack.c.bf16 %v3732_v47, %v3731_v37  ;;  %v3955_v14 = vld [vmem:[%s6102_s17] ss:$0 sm:$0xff] }
 0xda2   :  { %v3462_v63 = vsel %vm354_vm2, %v3449_v62, %v3442_v19 }
 0xda3   :  { %4180 = vmatmul.mubr.msk.f32.vlgmr.msra.gmra.mrb[6].mxu1 %vm192_vm0, %v3462_v63  ;;  %vm2178_vm0 = vcmask 542208  }
 0xda4   :  { %4205 = vmatprep.mubr.msk.f32.mxu1 %vm4718_vm1, %v4716_v0  ;;  %v2179_v43 = vsel %vm2178_vm0, %v5993_v21, -inf }
 0xe76   :  { %v3531_v25 = vpop.f32.mrb[6].mxu1 }
 0xe77   :  { %3536 = vrot.lane.b32.xlu1 %v3531_v25, %s4724_s25  ;;  %v4181_v44 = vpop.f32.mrb[7].mxu1 }
 0xe78   :  { %v3733_v44 = vld [vmem:[#allocation11 + $0x10] sm:$0xff] }
 0xe7b   :  { %3551 = vrot.lane.b32.xlu1 %v3550_v23, %s4720_s0  ;;  %s4727_s0 = smov 64   ;;  %v4429_v23 = vpack.c.bf16 %v3734_v57, %v3733_v44 }
 0xe9f   :  { %2180 = vmax.xlane.f32.xlu1 %v2179_v43 }
 0xee9   :  { %v3537_v17 = vpop.permute.xlu1 %3536 }
 0xeea   :  { %v3539_v50 = vadd.f32 %v3537_v17, %v5098_v29 }
 0xeec   :  { %v3546_v3 = vadd.f32 %v3544_v28, %v3539_v50 }
 0xeed   :  { %v3552_v10 = vpop.permute.xlu1 %3551 }
 0xeee   :  { %v3553_v52 = vsel %vm3543_vm5, %v5186_v16, %v3552_v10  ;;  %v3645_v16 = vld [vmem:[#allocation10] sm:$0xff] }
 0xeef   :  { %v3555_v4 = vadd.f32 %v3553_v52, %v3546_v3  ;;  %v4420_v48 = vpack.c.bf16 %v3646_v38, %v3645_v16 }
 0xef1   :  { %v3556_v26 = vmax.f32 %v3555_v4, 0.0  ;;  %4421 = vmatpush3.bf16.msra.mxu1 %v4420_v48 }
 0xef2   :  { %4422 = vmatprep.subr.bf16.mxu1 %v4717_v1 }
 0xef3   :  { %3570 = vrot.lane.b32.xlu0 %v3556_v26, %s4726_s9 }
 0xef5   :  { %4424 = vmatpush3.bf16.msra.mxu1 %v4423_v34 }
 0xef6   :  { %4203 = vmatprep.subr.mxu1 %v4716_v0 }
 0xef9   :  { %4204 = vmatpush3.msra.mxu1 %v3649_v60 }
 0xf2c   :  { %v2181_v46 = vpop.xlane.xlu1 %2180 }
 0xf2d   :  { %v2186_v27 = vrot.slane %v2181_v46, %v5118_v41  ;;  %v2190_v31 = vrot.slane %v2181_v46, %v5073_v12 }
 0xf2f   :  { %v6005_v55 = vsub.f32 %v5564_v42, %v2186_v27  ;;  %v6008_v29 = vsub.f32 %v5587_v15, %v2190_v31 }
 0xf31   :  { %v2195_v7 = vmul.f32 1.442695, %v6005_v55  ;;  %v2197_v56 = vmul.f32 1.442695, %v6008_v29 }
 0xf33   :  { %4499 = vpow2.f32 %v2195_v7 }
 0xf34   :  { %4501 = vpow2.f32 %v2197_v56 }
 0xf3d   :  { %v4500_v30 = vpop.eup %4499 }
 0xf3e   :  { %v4502_v22 = vpop.eup %4501 }
 0xf3f   :  { %v2201_v35 = vcombine.low %v4500_v30, %v4502_v22 }
 0xf41   :  { %v2208_v33 = vrot.slane %v2201_v35, %v5176_v6 }
 0xf43   :  { %v2215_v13 = vrot.slane %v2208_v33, %v5176_v6 }
 0xf45   :  { %2216 = vrot.lane.b32.xlu1 %v2215_v13, %s4727_s0 }
 0xf65   :  { %v3571_v61 = vpop.permute.xlu0 %3570 }
 0xf66   :  { %4193 = vmatmul.mubr.msk.f32.vlgmr.msra.gmra.mrb[14].mxu0 %vm1405_vm10, %v3571_v61 }
 0xf67   :  { %4218 = vmatprep.mubr.msk.f32.mxu0 %vm4718_vm1, %v4716_v0  ;;  %4427 = vmatpush3.bf16.msra.mxu0 %v4426_v40  ;;  %vm3816_vm1 = vcmask 394240  }
 0xf68   :  { %4428 = vmatprep.subr.bf16.mxu0 %v4717_v1  ;;  %v3957_v1 = vld [vmem:[%s6104_s19] ss:$0 sm:$0xff]  ;;  %s4728_s19 = smov 72  }
 0xf6b   :  { %4430 = vmatpush3.bf16.msra.mxu0 %v4429_v23 }
 0xf6c   :  { %4216 = vmatprep.subr.mxu0 %v4716_v0 }
 0xf6f   :  { %4217 = vmatpush3.msra.mxu0 %v3735_v24 }
 0xfb7   :  { %v2217_v5 = vpop.permute.xlu1 %2216 }
 0xfb8   :  { %v2219_v36 = vsel %vm2121_vm6, %v2217_v5, 0.0 }
 0xfb9   :  { %2220 = vadd.xlane.f32.xlu1 %v2219_v36 }
0x1039   :  { %v3640_v19 = vpop.f32.mrb[14].mxu0 }
0x103a   :  { %v3641_v62 = vadd.f32 %v3955_v14, %v3640_v19  ;;  %v4194_v63 = vpop.f32.mrb[15].mxu0 }
0x103c   :  { %v3644_v25 = vmax.f32 %v3641_v62, 0.0 }
0x103e   :  { %4206 = vmatmul.mubr.msk.f32.vlgmr.msra.gmra.mrb[8].mxu1 %vm1405_vm10, %v3644_v25 }
0x1046   :  { %v2221_v56 = vpop.xlane.xlu1 %2220 }
0x1111   :  { %v3726_v58 = vpop.f32.mrb[8].mxu1 }
0x1112   :  { %v3727_v43 = vadd.f32 %v3957_v1, %v3726_v58  ;;  %v4207_v51 = vpop.f32.mrb[9].mxu1 }
0x1114   :  { %v3730_v54 = vmax.f32 %v3727_v43, 0.0 }
0x1116   :  { %4219 = vmatmul.mubr.msk.f32.vlgmr.msra.gmra.mrb[16].mxu0 %vm1405_vm10, %v3730_v54 }
0x11e9   :  { %v3812_v53 = vpop.f32.mrb[16].mxu0 }
0x11ea   :  { %v3813_v9 = vadd.f32 %v3959_v2, %v3812_v53  ;;  %v4220_v0 = vpop.f32.mrb[17].mxu0 }
0x11ec   :  { %v3817_v8 = vsel %vm3816_vm1, %v3813_v9, -inf }
0x11ed   :  { %3818 = vmax.xlane.f32.xlu0 %v3817_v8 }
0x11f1   :  { %2123 = vmax.xlane.f32.xlu0 %v2122_v32 }
0x127a   :  { %v3819_v59 = vpop.xlane.xlu0 %3818 }
0x127b   :  { %v3820_v17 = vsub.f32 %v3813_v9, %v3819_v59 }
0x127d   :  { %v3821_v50 = vmul.f32 1.442695, %v3820_v17 }
0x127e   :  { %v2124_v28 = vpop.xlane.xlu0 %2123 }
0x127f   :  { %4503 = vpow2.f32 %v3821_v50  ;;  %v2129_v3 = vrot.slane %v2124_v28, %v5118_v41  ;;  %v2133_v10 = vrot.slane %v2124_v28, %v5073_v12 }
0x1281   :  { %v2136_v52 = vsub.f32 %v5564_v42, %v2129_v3  ;;  %v2137_v4 = vsub.f32 %v5587_v15, %v2133_v10 }
0x1283   :  { %v2138_v26 = vmul.f32 1.442695, %v2136_v52  ;;  %v2140_v46 = vmul.f32 1.442695, %v2137_v4 }
0x1285   :  { %4505 = vpow2.f32 %v2138_v26 }
0x1286   :  { %4507 = vpow2.f32 %v2140_v46 }
0x1287   :  { %4509 = vlog2.f32 %v2221_v56 }
0x1289   :  { %v4504_v27 = vpop.eup %4503 }
0x128a   :  { %v3823_v21 = vsel %vm3816_vm1, %v4504_v27, 0.0 }
0x128b   :  { %3824 = vadd.xlane.f32.xlu0 %v3823_v21 }
0x128f   :  { %v4506_v31 = vpop.eup %4505 }
0x1290   :  { %v4508_v7 = vpop.eup %4507 }
0x1291   :  { %v2144_v16 = vcombine.low %v4506_v31, %v4508_v7  ;;  %v4510_v15 = vpop.eup %4509 }
0x1292   :  { %v2223_v30 = vmul.f32 0.6931472, %v4510_v15 }
0x1293   :  { %v2151_v38 = vrot.slane %v2144_v16, %v5176_v6 }
0x1294   :  { %v2228_v22 = vrot.slane %v2223_v30, %v5118_v41  ;;  %v2232_v35 = vrot.slane %v2223_v30, %v5073_v12 }
0x1295   :  { %v2158_v48 = vrot.slane %v2151_v38, %v5176_v6 }
0x1296   :  { %v2235_v33 = vsub.f32 %v6005_v55, %v2228_v22  ;;  %v2236_v13 = vsub.f32 %v6008_v29, %v2232_v35 }
0x1297   :  { %v2160_v42 = vsel %vm2121_vm6, %v2158_v48, 0.0 }
0x1298   :  { %2161 = vadd.xlane.f32.xlu0 %v2160_v42  ;;  %v3849_v61 = vcombine.low %v2235_v33, %v2236_v13 }
0x129a   :  { %v3856_v5 = vrot.slane %v3849_v61, %v5176_v6 }
0x129c   :  { %v3863_v36 = vrot.slane %v3856_v5, %v5176_v6 }
0x12ae   :  { %3868 = vperm.xlu0 %4458, %v5848_v39  }
0x12b2   :  { %3871 = vperm.xlu0 %4458, %v5853_v49  }
0x12b6   :  { %3864 = vrot.lane.b32.xlu0 %v3863_v36, %s4728_s19 }
0x1318   :  { %v3825_v45 = vpop.xlane.xlu0 %3824 }
0x1319   :  { %4511 = vlog2.f32 %v3825_v45 }
0x131a   :  { %4661 = shalt.err (!%p4658_p10)
}
0x131b   :  { %s4662_s2 = scalar_lea.hbm %s6107_s22, 64 }
0x131c   :  { %p4663_p11 = scmp.ne.s32.totalorder %s6107_s22, %s4662_s2  ;;  %p4666_p12 = scmp.lt.u32.totalorder %s4662_s2, %s6107_s22 }
0x131e   :  { %p4668_p13 = pnand %p4666_p12, %p4663_p11 }
0x1320   :  { %4671 = shalt.err (!%p4668_p13)
}
0x1321   :  { %3912 = dma.vmem_to_hbm [thread:$0]  %s3910_s12, 64, %s6107_s22, [#allocation4]   ;;  %vm3888_vm10 = vcmask 23552   ;;  %v3873_v44 = vadd.s32 4294967280, %v5656_v18  ;;  %vm3890_vm7 = vcmask 64512   ;;  %vm3892_vm8 = vcmask 89088  }
0x1322   :  { %vm3894_vm9 = vcmask 130048   ;;  %vm3896_vm11 = vcmask 187392   ;;  %vm3898_vm13 = vcmask 523264   ;;  %s4730_s22 = smov [#allocation14]   ;;  %vm3900_vm14 = vcmask 924672  }
0x1323   :  { %v4512_v39 = vpop.eup %4511  ;;  %v3876_v23 = vsub.s32 %v3873_v44, %v5070_v11  ;;  %s3919_s28 = sshll.u32 %s4730_s22, 4  ;;  %s3920_s28 = int_to_ptr.vmem [resolvable:$true] %s3919_s28 }
0x1324   :  { %v3827_v49 = vmul.f32 0.6931472, %v4512_v39  ;;  %s4672_s18 = scalar_lea.vmem %s3920_s28, 32  ;;  %p4677_p1 = scmp.lt.s32.totalorder %s3920_s28, %s3920_s28 }
0x1325   :  { %v2162_v29 = vpop.xlane.xlu0 %2161  ;;  %p4673_p0 = scmp.ne.s32.totalorder %s3920_s28, %s4672_s18  ;;  %p4678_p2 = scmp.lt.s32.totalorder %s4672_s18, %s4672_s18 }
0x1326   :  { %v3828_v55 = vsub.f32 %v3820_v17, %v3827_v49  ;;  %4513 = vlog2.f32 %v2162_v29 }
0x1327   :  { %p4679_p3 = por %p4678_p2, %p4677_p1 }
0x1328   :  { %3885 = vrot.lane.b32.xlu1 %v3828_v55, %s4727_s0 }
0x1329   :  { %p4680_p4 = pnand %p4679_p3, %p4673_p0 }
0x132d   :  { %v3869_v19 = vpop.permute.xlu0 %3868 }
0x132e   :  { %v3877_v1 = vrot.slane %v3869_v19, %v3876_v23 }
0x1330   :  { %v4514_v20 = vpop.eup %4513 }
0x1331   :  { %v2164_v34 = vmul.f32 0.6931472, %v4514_v20  ;;  %v3872_v63 = vpop.permute.xlu0 %3871 }
0x1333   :  { %v2169_v60 = vrot.slane %v2164_v34, %v5118_v41  ;;  %v2173_v37 = vrot.slane %v2164_v34, %v5073_v12  ;;  %v3881_v12 = vrot.slane %v3872_v63, %v3876_v23 }
0x1335   :  { %v2176_v47 = vsub.f32 %v2136_v52, %v2169_v60  ;;  %v2177_v40 = vsub.f32 %v2137_v4, %v2173_v37  ;;  %v3865_v24 = vpop.permute.xlu0 %3864  ;;  %v3882_v43 = vsel %vm354_vm2, %v3881_v12, %v3877_v1 }
0x1337   :  { %v3831_v14 = vcombine.low %v2176_v47, %v2177_v40 }
0x1339   :  { %v3838_v62 = vrot.slane %v3831_v14, %v5176_v6 }
0x133b   :  { %v3845_v25 = vrot.slane %v3838_v62, %v5176_v6 }
0x133d   :  { %v3889_v57 = vsel %vm3888_vm10, %v3845_v25, 0.0 }
0x133e   :  { %v3891_v41 = vsel %vm3890_vm7, %v3889_v57, %v3865_v24 }
0x133f   :  { %v3893_v58 = vsel %vm3892_vm8, %v3891_v41, 0.0 }
0x1340   :  { %v3895_v51 = vsel %vm3894_vm9, %v3893_v58, %v3882_v43 }
0x1341   :  { %v3897_v6 = vsel %vm3896_vm11, %v3895_v51, 0.0 }
0x139a   :  { %v3886_v18 = vpop.permute.xlu1 %3885 }
0x139b   :  { %v3899_v54 = vsel %vm3898_vm13, %v3897_v6, %v3886_v18 }
0x139c   :  { %v3901_v11 = vsel %vm3900_vm14, %v3899_v54, 0.0 }
0x139d   :  { %3902 = vst [vmem:[#allocation14] sm:$0x3] %v3901_v11 }
0x139e   :  { %4683 = shalt.err (!%p4680_p4)
}
0x139f   :  { %s6135_s3 = sld [smem:[#allocation30_spill]] }
0x13a5   :  { %s4684_s10 = scalar_lea.hbm %s6135_s3, 32 }
0x13a6   :  { %p4685_p5 = scmp.ne.s32.totalorder %s6135_s3, %s4684_s10  ;;  %p4688_p6 = scmp.lt.u32.totalorder %s4684_s10, %s6135_s3 }
0x13a8   :  { %p4690_p7 = pnand %p4688_p6, %p4685_p5 }
0x13aa   :  { %4693 = shalt.err (!%p4690_p7)
}
0x13ab   :  { %3922 = dma.vmem_to_hbm [thread:$0]  %s3920_s28, 32, %s6135_s3, [#allocation15]  }
0x13ac   :  { %4702 = dma.done.wait [#allocation4], 64  }
0x13ad   :  { %4703 = vsyncadd [#allocation4], 4294967232 }
0x13ae   :  { %4704 = dma.done.wait [#allocation15], 32  }
0x13af   :  { %4705 = vsyncadd [#allocation15], 4294967264 }
0x13b0   :  { %3929 = vsyncpa [#allocation3], 1 }
0x13b1   :  { %3930 = vsyncpa [#allocation6], 1 }
0x13b2   :  { %3931 = vsyncpa [#allocation9], 1 }
0x13b3   :  { %3932 = vsyncpa [#allocation12], 1 }
0x13b4   :  { %3933 = vsyncpa [#allocation4], 1 }
0x13b5   :  { %3934 = vsyncpa [#allocation15], 1 }

</bundles_post_ra>
